<compile_context>
chip_gen: v5e
topology: v5e:2x2
jax: 0.10.0
libtpu: 0.0.40
codegen_flags: <defaults>
</compile_context>

<pallas_src>
import functools

import jax
import jax.numpy as jnp
from jax.experimental import pallas as pl
from jax.experimental.pallas import tpu as pltpu


def _round_up(x, m):
    return ((x + m - 1) // m) * m


def _pick_time_block(T, halo, target):
    """Largest multiple of `halo` that divides T and is <= target, preferring
    choices that leave at least 2 time tiles (megacore on v7x).
    Returns None if T has no multiple-of-`halo` divisor at all."""
    divs = [m for m in range(halo, T + 1, halo) if T % m == 0]
    if not divs:
        return None
    target = max(target, halo)
    cands = [m for m in divs if m <= target] or [divs[0]]
    multi = [m for m in cands if T // m >= 2]
    return max(multi) if multi else max(cands)


def _drl_kernel(x_ref, xl_ref, xr_ref, mask_ref, w1_ref, b1_ref, w2_ref,
                b2_ref, o_ref, xp_ref, *, dilation: int, halo: int, precision):
    """One (batch, time-tile) block per grid step.

    x_ref   : (C, Tb)        current time tile (residual input + center tap)
    xl_ref  : (C, halo)      block just left of the tile (garbage at t == 0)
    xr_ref  : (C, halo)      block just right of the tile (garbage at last t)
    mask_ref: (1, Tb)
    w1_ref  : (3, Cout, Cin) dilated-conv weights, tap-major
    b1_ref  : (Cout, 1)      f32
    w2_ref  : (Cout, Cout)   1x1 conv weights
    b2_ref  : (Cout, 1)      f32
    o_ref   : (Cout, Tb)
    xp_ref  : (C, halo + Tb + halo) VMEM scratch (zero-padded tile)
    """
    d = dilation
    t = pl.program_id(1)
    n_t = pl.num_programs(1)
    tb = x_ref.shape[-1]

    # Assemble [left halo | tile | right halo] once in VMEM scratch.  Halo
    # columns are zeroed at the sequence ends == the conv's zero padding.
    xp_ref[:, halo:halo + tb] = x_ref[...]
    xl = xl_ref[...]
    xr = xr_ref[...]
    xp_ref[:, :halo] = jnp.where(t > 0, xl, jnp.zeros_like(xl))
    xp_ref[:, halo + tb:] = jnp.where(t < n_t - 1, xr, jnp.zeros_like(xr))

    # Three dilation taps = three accumulating MXU matmuls against static
    # slices of the padded scratch (no (3C, Tb) concat round trip).
    acc = jnp.dot(w1_ref[0], xp_ref[:, halo - d:halo - d + tb],
                  preferred_element_type=jnp.float32, precision=precision)
    acc += jnp.dot(w1_ref[1], xp_ref[:, halo:halo + tb],
                   preferred_element_type=jnp.float32, precision=precision)
    acc += jnp.dot(w1_ref[2], xp_ref[:, halo + d:halo + d + tb],
                   preferred_element_type=jnp.float32, precision=precision)

    h = jnp.maximum(acc + b1_ref[...], 0.0)                     # bias + ReLU (f32)
    out = jnp.dot(w2_ref[...], h.astype(w2_ref.dtype),
                  preferred_element_type=jnp.float32, precision=precision)
    out = out + b2_ref[...]

    # Residual add + mask in the same pass; single f32 epilogue, then cast down.
    res = x_ref[...].astype(jnp.float32) + out
    o_ref[...] = (res * mask_ref[...].astype(jnp.float32)).astype(o_ref.dtype)


def dilated_residual_layer(x, mask, w1, b1, w2, b2, *, dilation: int,
                           time_block: int = 4096):
    """x: (N, C, T), mask: (N, 1, T) -> (N, C, T).  Output dtype follows x."""
    N, C, T = x.shape
    c_out = w1.shape[0]
    assert c_out == C, "residual connection requires in_channels == out_channels"
    assert 0 < dilation < T

    # Halo width: smallest multiple of 128 covering the dilation (lane aligned).
    halo = max(128, _round_up(dilation, 128))
    target = max(time_block, 8 * halo)          # amortize halo over-fetch
    t_blk = _pick_time_block(T, halo, target)

    # Parameters: tap-major stacked conv1 weights, f32 biases, mask in x dtype.
    w_dtype = x.dtype
    w1s = jnp.transpose(w1, (2, 0, 1)).astype(w_dtype)    # (3, Cout, Cin)
    w2c = w2.astype(w_dtype)
    b1c = b1.reshape(c_out, 1).astype(jnp.float32)
    b2c = b2.reshape(c_out, 1).astype(jnp.float32)
    mask = mask.astype(x.dtype)

    precision = (jax.lax.Precision.HIGHEST
                 if x.dtype == jnp.float32 else jax.lax.Precision.DEFAULT)

    x_spec = pl.BlockSpec((None, C, t_blk if t_blk else T), lambda n, t: (n, 0, t))

    if t_blk is not None:
        n_t = T // t_blk
        tpb = t_blk // halo
        xl_src, xr_src = x, x
        l_spec = pl.BlockSpec(
            (None, C, halo), lambda n, t: (n, 0, jnp.maximum(t * tpb - 1, 0)))
        r_spec = pl.BlockSpec(
            (None, C, halo),
            lambda n, t: (n, 0, jnp.minimum((t + 1) * tpb, T // halo - 1)))
    else:
        # Guarded fallback (T has no multiple-of-128 divisor): one full-length
        # tile; halo inputs are tiny dummies (their content is zeroed in-kernel
        # because there is a single time tile), so no full-(C,T) halo DMA.
        t_blk, n_t = T, 1
        xl_src = jnp.zeros((N, C, halo), x.dtype)
        xr_src = xl_src
        l_spec = pl.BlockSpec((None, C, halo), lambda n, t: (n, 0, 0))
        r_spec = l_spec

    mask_spec = pl.BlockSpec((None, 1, t_blk), lambda n, t: (n, 0, t))
    out_spec = pl.BlockSpec((None, C, t_blk), lambda n, t: (n, 0, t))

    def full(shape):
        return pl.BlockSpec(shape, lambda n, t: (0,) * len(shape))

    kernel = functools.partial(_drl_kernel, dilation=dilation, halo=halo,
                               precision=precision)

    # VMEM budget: double-buffered blocks + padded scratch + f32 temporaries,
    # with 2x margin, clamped to [32 MiB, 64 MiB] (v7x physical limit).
    itemsize = jnp.dtype(x.dtype).itemsize
    per_step = (C * t_blk + 2 * C * halo + t_blk + C * t_blk)   # x, halos, mask, out
    vmem_est = (2 * per_step * itemsize
                + C * (t_blk + 2 * halo) * itemsize             # padded scratch
                + (3 * C * C + C * C + 2 * C) * 4               # weights + biases
                + 4 * C * t_blk * 4)                            # f32 acc/h/out/res
    vmem_limit = int(min(max(2 * vmem_est, 32 << 20), 64 << 20))

    return pl.pallas_call(
        kernel,
        out_shape=jax.ShapeDtypeStruct((N, C, T), x.dtype),
        grid=(N, n_t),
        in_specs=[
            x_spec,                       # current tile (residual + center tap)
            l_spec,                       # left halo (tiny)
            r_spec,                       # right halo (tiny)
            mask_spec,
            full((3, c_out, C)),          # stacked conv1 weights
            full((c_out, 1)),             # b1
            full((c_out, c_out)),         # w2 (1x1 conv)
            full((c_out, 1)),             # b2
        ],
        out_specs=out_spec,
        scratch_shapes=[pltpu.VMEM((C, t_blk + 2 * halo), x.dtype)],
        compiler_params=pltpu.CompilerParams(
            dimension_semantics=("parallel", "parallel"),
            vmem_limit_bytes=vmem_limit),
    )(x, xl_src, xr_src, mask, w1s, b1c, w2c, b2c)


def _reference(x, mask, w1, b1, w2, b2, dilation):
    """Plain-JAX reference (same math, no Pallas)."""
    N, C, T = x.shape
    hp = jax.lax.Precision.HIGHEST
    xp = jnp.pad(x, ((0, 0), (0, 0), (dilation, dilation)))
    acc = jnp.zeros((N, w1.shape[0], T), jnp.float32)
    for k in range(3):
        xs = jax.lax.dynamic_slice_in_dim(xp, k * dilation, T, axis=2)
        acc = acc + jnp.einsum("oc,nct->not", w1[:, :, k], xs, precision=hp)
    h = jnp.maximum(acc + b1[None, :, None], 0.0)
    out = jnp.einsum("oc,nct->not", w2, h, precision=hp) + b2[None, :, None]
    return (x + out) * mask


if __name__ == "__main__":
    # Small demo: batch=2, channels=16, seq=2048, dilation=4 -> 1024-wide time
    # tiles (n_t=2, exercises the halo path).  Also run bf16 activations and the
    # guarded non-divisible-T fallback path.
    N, C, T = 2, 16, 2048
    dilation = 4

    key = jax.random.PRNGKey(0)
    k_x, k_w1, k_b1, k_w2, k_b2 = jax.random.split(key, 5)

    x = jax.random.normal(k_x, (N, C, T), dtype=jnp.float32)
    lens = jnp.array([T, (3 * T) // 4])
    mask = (jnp.arange(T)[None, :] < lens[:, None]).astype(jnp.float32)
    mask = mask[:, None, :]                                    # (N, 1, T)

    w1 = 0.1 * jax.random.normal(k_w1, (C, C, 3), dtype=jnp.float32)  # (Cout, Cin, 3)
    b1 = 0.1 * jax.random.normal(k_b1, (C,), dtype=jnp.float32)
    w2 = 0.1 * jax.random.normal(k_w2, (C, C), dtype=jnp.float32)     # 1x1 conv
    b2 = 0.1 * jax.random.normal(k_b2, (C,), dtype=jnp.float32)

    # ---- f32 path (tiled, precision=HIGHEST) ----
    y = dilated_residual_layer(x, mask, w1, b1, w2, b2, dilation=dilation)
    y = jax.block_until_ready(y)
    y_ref = _reference(x, mask, w1, b1, w2, b2, dilation)
    assert jnp.allclose(y, y_ref, atol=1e-3, rtol=1e-3), "f32 mismatch vs reference"

    # ---- bf16 activation path (halved HBM traffic) ----
    xb = x.astype(jnp.bfloat16)
    yb = dilated_residual_layer(xb, mask, w1, b1, w2, b2, dilation=dilation)
    yb = jax.block_until_ready(yb)
    y_ref_b = _reference(xb.astype(jnp.float32), mask,
                         w1.astype(jnp.bfloat16).astype(jnp.float32), b1,
                         w2.astype(jnp.bfloat16).astype(jnp.float32), b2, dilation)
    assert jnp.allclose(yb.astype(jnp.float32), y_ref_b, atol=5e-2, rtol=5e-2), \
        "bf16 mismatch vs reference"

    # ---- fallback path (T not divisible by 128 -> single tile, dummy halos) ----
    Tf = 1000
    xf = jax.random.normal(k_x, (1, C, Tf), dtype=jnp.float32)
    maskf = jnp.ones((1, 1, Tf), jnp.float32)
    yf = dilated_residual_layer(xf, maskf, w1, b1, w2, b2, dilation=3)
    yf = jax.block_until_ready(yf)
    yf_ref = _reference(xf, maskf, w1, b1, w2, b2, 3)
    assert jnp.allclose(yf, yf_ref, atol=1e-3, rtol=1e-3), "fallback mismatch"

    print("KERNEL_OK")
</pallas_src>

<mosaic_0001>
module attributes {stable_mosaic.version = 11 : i64} {
  func.func @_drl_kernel(%arg0: i32, %arg1: i32, %arg2: memref<1x16x1024xf32, #tpu.memory_space<vmem>>, %arg3: memref<1x16x128xf32, #tpu.memory_space<vmem>>, %arg4: memref<1x16x128xf32, #tpu.memory_space<vmem>>, %arg5: memref<1x1x1024xf32, #tpu.memory_space<vmem>>, %arg6: memref<3x16x16xf32, #tpu.memory_space<vmem>>, %arg7: memref<16x1xf32, #tpu.memory_space<vmem>>, %arg8: memref<16x16xf32, #tpu.memory_space<vmem>>, %arg9: memref<16x1xf32, #tpu.memory_space<vmem>>, %arg10: memref<1x16x1024xf32, #tpu.memory_space<vmem>>, %arg11: memref<16x1280xf32, #tpu.memory_space<vmem>>) attributes {dimension_semantics = [#tpu.dimension_semantics<parallel>, #tpu.dimension_semantics<parallel>], iteration_bounds = array<i64: 2, 2>, scalar_prefetch = 0 : i64, scratch_operands = 1 : i64, tpu.core_type = #tpu.core_type<tc>, window_params = [{transform_indices = @transform_0, window_bounds = array<i64: 1, 16, 1024>}, {transform_indices = @transform_1, window_bounds = array<i64: 1, 16, 128>}, {transform_indices = @transform_2, window_bounds = array<i64: 1, 16, 128>}, {transform_indices = @transform_3, window_bounds = array<i64: 1, 1, 1024>}, {pipeline_mode = #tpu.pipeline_mode<synchronous>, transform_indices = @transform_4, window_bounds = array<i64: 3, 16, 16>}, {pipeline_mode = #tpu.pipeline_mode<synchronous>, transform_indices = @transform_5, window_bounds = array<i64: 16, 1>}, {pipeline_mode = #tpu.pipeline_mode<synchronous>, transform_indices = @transform_6, window_bounds = array<i64: 16, 16>}, {pipeline_mode = #tpu.pipeline_mode<synchronous>, transform_indices = @transform_7, window_bounds = array<i64: 16, 1>}, {transform_indices = @transform_8, window_bounds = array<i64: 1, 16, 1024>}]} {
    %c0 = arith.constant 0 : index
    %c0_0 = arith.constant 0 : index
    %c0_1 = arith.constant 0 : index
    %0 = vector.load %arg2[%c0, %c0_0, %c0_1] : memref<1x16x1024xf32, #tpu.memory_space<vmem>>, vector<1x16x1024xf32>
    %1 = vector.shape_cast %0 : vector<1x16x1024xf32> to vector<16x1024xf32>
    %c0_2 = arith.constant 0 : index
    %c128 = arith.constant 128 : index
    %2 = vector.load %arg11[%c0_2, %c128] : memref<16x1280xf32, #tpu.memory_space<vmem>>, vector<16x1024xf32>
    tpu.vector_store %arg11[%c0_2, %c128], %1 {strides = array<i32>} : memref<16x1280xf32, #tpu.memory_space<vmem>>, vector<16x1024xf32>,
    %c0_3 = arith.constant 0 : index
    %c0_4 = arith.constant 0 : index
    %c0_5 = arith.constant 0 : index
    %3 = vector.load %arg3[%c0_3, %c0_4, %c0_5] : memref<1x16x128xf32, #tpu.memory_space<vmem>>, vector<1x16x128xf32>
    %4 = vector.shape_cast %3 : vector<1x16x128xf32> to vector<16x128xf32>
    %c0_6 = arith.constant 0 : index
    %c0_7 = arith.constant 0 : index
    %c0_8 = arith.constant 0 : index
    %5 = vector.load %arg4[%c0_6, %c0_7, %c0_8] : memref<1x16x128xf32, #tpu.memory_space<vmem>>, vector<1x16x128xf32>
    %6 = vector.shape_cast %5 : vector<1x16x128xf32> to vector<16x128xf32>
    %c0_i32 = arith.constant 0 : i32
    %7 = arith.cmpi sgt, %arg1, %c0_i32 : i32
    %cst = arith.constant 0.000000e+00 : f32
    %8 = vector.broadcast %cst : f32 to vector<16x128xf32>
    %9 = arith.select %7, %4, %8 : vector<16x128xf32>
    %c0_9 = arith.constant 0 : index
    %c0_10 = arith.constant 0 : index
    %10 = vector.load %arg11[%c0_9, %c0_10] : memref<16x1280xf32, #tpu.memory_space<vmem>>, vector<16x128xf32>
    tpu.vector_store %arg11[%c0_9, %c0_10], %9 {strides = array<i32>} : memref<16x1280xf32, #tpu.memory_space<vmem>>, vector<16x128xf32>,
    %c1_i32 = arith.constant 1 : i32
    %11 = arith.cmpi slt, %arg1, %c1_i32 : i32
    %cst_11 = arith.constant 0.000000e+00 : f32
    %12 = vector.broadcast %cst_11 : f32 to vector<16x128xf32>
    %13 = arith.select %11, %6, %12 : vector<16x128xf32>
    %c0_12 = arith.constant 0 : index
    %c1152 = arith.constant 1152 : index
    %14 = vector.load %arg11[%c0_12, %c1152] : memref<16x1280xf32, #tpu.memory_space<vmem>>, vector<16x128xf32>
    tpu.vector_store %arg11[%c0_12, %c1152], %13 {strides = array<i32>} : memref<16x1280xf32, #tpu.memory_space<vmem>>, vector<16x128xf32>,
    %c0_13 = arith.constant 0 : index
    %c0_14 = arith.constant 0 : index
    %c0_15 = arith.constant 0 : index
    %15 = vector.load %arg6[%c0_13, %c0_14, %c0_15] : memref<3x16x16xf32, #tpu.memory_space<vmem>>, vector<1x16x16xf32>
    %16 = vector.shape_cast %15 : vector<1x16x16xf32> to vector<16x16xf32>
    %c0_16 = arith.constant 0 : index
    %c124 = arith.constant 124 : index
    %17 = vector.load %arg11[%c0_16, %c124] : memref<16x1280xf32, #tpu.memory_space<vmem>>, vector<16x1024xf32>
    %cst_17 = arith.constant dense<0.000000e+00> : vector<16x1024xf32>
    %18 = tpu.matmul %16, %17, %cst_17 {dimension_numbers = #tpu.dot_dimension_numbers<[1], [0], [0], [1], [0, 0, 1, 1], [], []>, precision = #tpu.contract_precision<fp32>} : vector<16x16xf32>, vector<16x1024xf32>, vector<16x1024xf32> -> vector<16x1024xf32>
    %c1 = arith.constant 1 : index
    %c0_18 = arith.constant 0 : index
    %c0_19 = arith.constant 0 : index
    %19 = vector.load %arg6[%c1, %c0_18, %c0_19] : memref<3x16x16xf32, #tpu.memory_space<vmem>>, vector<1x16x16xf32>
    %20 = vector.shape_cast %19 : vector<1x16x16xf32> to vector<16x16xf32>
    %c0_20 = arith.constant 0 : index
    %c128_21 = arith.constant 128 : index
    %21 = vector.load %arg11[%c0_20, %c128_21] : memref<16x1280xf32, #tpu.memory_space<vmem>>, vector<16x1024xf32>
    %cst_22 = arith.constant dense<0.000000e+00> : vector<16x1024xf32>
    %22 = tpu.matmul %20, %21, %cst_22 {dimension_numbers = #tpu.dot_dimension_numbers<[1], [0], [0], [1], [0, 0, 1, 1], [], []>, precision = #tpu.contract_precision<fp32>} : vector<16x16xf32>, vector<16x1024xf32>, vector<16x1024xf32> -> vector<16x1024xf32>
    %23 = arith.addf %18, %22 : vector<16x1024xf32>
    %c2 = arith.constant 2 : index
    %c0_23 = arith.constant 0 : index
    %c0_24 = arith.constant 0 : index
    %24 = vector.load %arg6[%c2, %c0_23, %c0_24] : memref<3x16x16xf32, #tpu.memory_space<vmem>>, vector<1x16x16xf32>
    %25 = vector.shape_cast %24 : vector<1x16x16xf32> to vector<16x16xf32>
    %c0_25 = arith.constant 0 : index
    %c132 = arith.constant 132 : index
    %26 = vector.load %arg11[%c0_25, %c132] : memref<16x1280xf32, #tpu.memory_space<vmem>>, vector<16x1024xf32>
    %cst_26 = arith.constant dense<0.000000e+00> : vector<16x1024xf32>
    %27 = tpu.matmul %25, %26, %cst_26 {dimension_numbers = #tpu.dot_dimension_numbers<[1], [0], [0], [1], [0, 0, 1, 1], [], []>, precision = #tpu.contract_precision<fp32>} : vector<16x16xf32>, vector<16x1024xf32>, vector<16x1024xf32> -> vector<16x1024xf32>
    %28 = arith.addf %23, %27 : vector<16x1024xf32>
    %c0_27 = arith.constant 0 : index
    %c0_28 = arith.constant 0 : index
    %29 = vector.load %arg7[%c0_27, %c0_28] : memref<16x1xf32, #tpu.memory_space<vmem>>, vector<16x1xf32>
    %30 = vector.broadcast %29 : vector<16x1xf32> to vector<16x1024xf32>
    %31 = arith.addf %28, %30 : vector<16x1024xf32>
    %cst_29 = arith.constant 0.000000e+00 : f32
    %32 = vector.broadcast %cst_29 : f32 to vector<16x1024xf32>
    %33 = arith.maximumf %31, %32 : vector<16x1024xf32>
    %c0_30 = arith.constant 0 : index
    %c0_31 = arith.constant 0 : index
    %34 = vector.load %arg8[%c0_30, %c0_31] : memref<16x16xf32, #tpu.memory_space<vmem>>, vector<16x16xf32>
    %cst_32 = arith.constant dense<0.000000e+00> : vector<16x1024xf32>
    %35 = tpu.matmul %34, %33, %cst_32 {dimension_numbers = #tpu.dot_dimension_numbers<[1], [0], [0], [1], [0, 0, 1, 1], [], []>, precision = #tpu.contract_precision<fp32>} : vector<16x16xf32>, vector<16x1024xf32>, vector<16x1024xf32> -> vector<16x1024xf32>
    %c0_33 = arith.constant 0 : index
    %c0_34 = arith.constant 0 : index
    %36 = vector.load %arg9[%c0_33, %c0_34] : memref<16x1xf32, #tpu.memory_space<vmem>>, vector<16x1xf32>
    %37 = vector.broadcast %36 : vector<16x1xf32> to vector<16x1024xf32>
    %38 = arith.addf %35, %37 : vector<16x1024xf32>
    %c0_35 = arith.constant 0 : index
    %c0_36 = arith.constant 0 : index
    %c0_37 = arith.constant 0 : index
    %39 = vector.load %arg2[%c0_35, %c0_36, %c0_37] : memref<1x16x1024xf32, #tpu.memory_space<vmem>>, vector<1x16x1024xf32>
    %40 = vector.shape_cast %39 : vector<1x16x1024xf32> to vector<16x1024xf32>
    %41 = arith.addf %40, %38 : vector<16x1024xf32>
    %c0_38 = arith.constant 0 : index
    %c0_39 = arith.constant 0 : index
    %c0_40 = arith.constant 0 : index
    %42 = vector.load %arg5[%c0_38, %c0_39, %c0_40] : memref<1x1x1024xf32, #tpu.memory_space<vmem>>, vector<1x1x1024xf32>
    %43 = vector.shape_cast %42 : vector<1x1x1024xf32> to vector<1x1024xf32>
    %44 = vector.broadcast %43 : vector<1x1024xf32> to vector<16x1024xf32>
    %45 = arith.mulf %41, %44 : vector<16x1024xf32>
    %c0_41 = arith.constant 0 : index
    %c0_42 = arith.constant 0 : index
    %c0_43 = arith.constant 0 : index
    %46 = vector.load %arg10[%c0_41, %c0_42, %c0_43] : memref<1x16x1024xf32, #tpu.memory_space<vmem>>, vector<1x16x1024xf32>
    %47 = vector.shape_cast %46 : vector<1x16x1024xf32> to vector<16x1024xf32>
    %48 = vector.shape_cast %45 : vector<16x1024xf32> to vector<1x16x1024xf32>
    tpu.vector_store %arg10[%c0_41, %c0_42, %c0_43], %48 {strides = array<i32>} : memref<1x16x1024xf32, #tpu.memory_space<vmem>>, vector<1x16x1024xf32>,
    return
  }
  func.func @transform_0(%arg0: i32, %arg1: i32) -> (i32, i32, i32) {
    %c0_i32 = arith.constant 0 : i32
    %c0_i32_0 = arith.constant 0 : i32
    return %arg0, %c0_i32, %arg1 : i32, i32, i32
  }
  func.func @transform_1(%arg0: i32, %arg1: i32) -> (i32, i32, i32) {
    %c8_i32 = arith.constant 8 : i32
    %0 = arith.muli %arg1, %c8_i32 : i32
    %c1_i32 = arith.constant 1 : i32
    %1 = arith.subi %0, %c1_i32 : i32
    %c0_i32 = arith.constant 0 : i32
    %2 = arith.maxsi %1, %c0_i32 : i32
    %c0_i32_0 = arith.constant 0 : i32
    %c0_i32_1 = arith.constant 0 : i32
    return %arg0, %c0_i32_0, %2 : i32, i32, i32
  }
  func.func @transform_2(%arg0: i32, %arg1: i32) -> (i32, i32, i32) {
    %c1_i32 = arith.constant 1 : i32
    %0 = arith.addi %arg1, %c1_i32 : i32
    %c8_i32 = arith.constant 8 : i32
    %1 = arith.muli %0, %c8_i32 : i32
    %c15_i32 = arith.constant 15 : i32
    %2 = arith.minsi %1, %c15_i32 : i32
    %c0_i32 = arith.constant 0 : i32
    %c0_i32_0 = arith.constant 0 : i32
    return %arg0, %c0_i32, %2 : i32, i32, i32
  }
  func.func @transform_3(%arg0: i32, %arg1: i32) -> (i32, i32, i32) {
    %c0_i32 = arith.constant 0 : i32
    %c0_i32_0 = arith.constant 0 : i32
    return %arg0, %c0_i32, %arg1 : i32, i32, i32
  }
  func.func @transform_4(%arg0: i32, %arg1: i32) -> (i32, i32, i32) {
    %c0_i32 = arith.constant 0 : i32
    %c0_i32_0 = arith.constant 0 : i32
    %c0_i32_1 = arith.constant 0 : i32
    %c0_i32_2 = arith.constant 0 : i32
    return %c0_i32, %c0_i32_0, %c0_i32_1 : i32, i32, i32
  }
  func.func @transform_5(%arg0: i32, %arg1: i32) -> (i32, i32) {
    %c0_i32 = arith.constant 0 : i32
    %c0_i32_0 = arith.constant 0 : i32
    %c0_i32_1 = arith.constant 0 : i32
    return %c0_i32, %c0_i32_0 : i32, i32
  }
  func.func @transform_6(%arg0: i32, %arg1: i32) -> (i32, i32) {
    %c0_i32 = arith.constant 0 : i32
    %c0_i32_0 = arith.constant 0 : i32
    %c0_i32_1 = arith.constant 0 : i32
    return %c0_i32, %c0_i32_0 : i32, i32
  }
  func.func @transform_7(%arg0: i32, %arg1: i32) -> (i32, i32) {
    %c0_i32 = arith.constant 0 : i32
    %c0_i32_0 = arith.constant 0 : i32
    %c0_i32_1 = arith.constant 0 : i32
    return %c0_i32, %c0_i32_0 : i32, i32
  }
  func.func @transform_8(%arg0: i32, %arg1: i32) -> (i32, i32, i32) {
    %c0_i32 = arith.constant 0 : i32
    %c0_i32_0 = arith.constant 0 : i32
    return %arg0, %c0_i32, %arg1 : i32, i32, i32
  }
}

</mosaic_0001>

<bundles_post_ra>
// kernel: tpu_custom_call.1
= control target key start
LH: loop header
LB: loop body
LE: loop exit
PB: predicated region body
PF: predicated region fallthrough
CT: control target
= control target key end

     0   :  { %s9792_s0 = inlined_call_operand.hbm [shape: f32[2,16,2048], index: 0, kind: input, shape index: {}]   ;;  %s9793_s1 = inlined_call_operand.hbm [shape: f32[2,16,2048], index: 1, kind: input, shape index: {}]   ;;  %s9794_s2 = inlined_call_operand.hbm [shape: f32[2,16,2048], index: 2, kind: input, shape index: {}]   ;;  %s9795_s3 = inlined_call_operand.vmem [shape: f32[2,1,2048], index: 3, kind: input, shape index: {}]   ;;  %s9796_s4 = inlined_call_operand.hbm [shape: f32[3,16,16], index: 4, kind: input, shape index: {}]   ;;  %s9797_s5 = inlined_call_operand.vmem [shape: f32[16,1], index: 5, kind: input, shape index: {}]   ;;  %s9798_s6 = inlined_call_operand.hbm [shape: f32[16,16], index: 6, kind: input, shape index: {}]   ;;  %s9799_s7 = inlined_call_operand.vmem [shape: f32[16,1], index: 7, kind: input, shape index: {}]   ;;  %s9800_s8 = inlined_call_operand.hbm [shape: f32[2,16,2048], index: 8, kind: output, shape index: {}]  }
   0x1   :  { %9830 = sst [smem:[#allocation33_spill]] %s9792_s0 }
   0x2   :  { %9831 = sst [smem:[#allocation34_spill]] %s9793_s1 }
   0x3   :  { %9832 = sst [smem:[#allocation35_spill]] %s9794_s2 }
   0x4   :  { %9833 = sst [smem:[#allocation36_spill]] %s9795_s3 }
   0x5   :  { %9834 = sst [smem:[#allocation37_spill]] %s9796_s4 }
   0x6   :  { %9835 = sst [smem:[#allocation38_spill]] %s9797_s5 }
   0x7   :  { %9836 = sst [smem:[#allocation39_spill]] %s9798_s6 }
   0x8   :  { %9837 = sst [smem:[#allocation40_spill]] %s9799_s7 }
   0x9   :  { %9838 = sst [smem:[#allocation41_spill]] %s9800_s8 }
   0xa   :  { %13 = vsyncpa [#allocation4], 0 }
   0xb   :  { %15 = vsyncpa [#allocation4 + $0x1], 0 }
   0xc   :  { %16 = vsyncpa [#allocation7], 0 }
   0xd   :  { %18 = vsyncpa [#allocation7 + $0x1], 0 }
   0xe   :  { %19 = vsyncpa [#allocation10], 0 }
   0xf   :  { %20 = vsyncpa [#allocation5], 0 }
  0x10   :  { %22 = vsyncpa [#allocation5 + $0x1], 0  ;;  %s7848_s27 = smov 0   ;;  %s7850_s28 = smov 0  }
  0x11   :  { %s7852_s29 = smov 0   ;;  %s7854_s30 = smov 0  }
  0x12   :  { %s7856_s9 = smov 0   ;;  %s7858_s10 = smov 0  }
  0x13   :  { %s7860_s11 = smov 0   ;;  %s7862_s12 = smov 0  }
  0x14   :  { %s7864_s13 = smov 0   ;;  %s7866_s14 = smov 0  }
  0x15   :  { %s7868_s15 = smov 0   ;;  %s7870_s16 = smov 0  }
  0x16   :  { %s7872_s17 = smov 0   ;;  %s7874_s18 = smov 0  }
  0x17 LB: > { %9839 = sst [smem:[#allocation18_spill]] %s7736_s27  ;;  %s7919_s19 = sadd.s32 4294967295, %s7788_s18   ;;  %s7788_s18 = sphi %s7874_s18, %s28_s18   ;;  %s7784_s17 = sphi %s7872_s17, %s9904_s17   ;;  %s7780_s16 = sphi %s7870_s16, %s9903_s16   ;;  %s7776_s15 = sphi %s7868_s15, %s9902_s15   ;;  %s7772_s14 = sphi %s7866_s14, %s9901_s14   ;;  %s7768_s13 = sphi %s7864_s13, %s9900_s13   ;;  %s7764_s12 = sphi %s7862_s12, %s9908_s12   ;;  %s7760_s11 = sphi %s7860_s11, %s9907_s11   ;;  %s7756_s10 = sphi %s7858_s10, %s9898_s10   ;;  %s7752_s9 = sphi %s7856_s9, %s9897_s9   ;;  %s7748_s30 = sphi %s7854_s30, %s9896_s30   ;;  %s7744_s29 = sphi %s7852_s29, %s9906_s29   ;;  %s7740_s28 = sphi %s7850_s28, %s9905_s28   ;;  %s7736_s27 = sphi %s7848_s27, %s9895_s27  }
  0x18   : > { %9840 = sst [smem:[#allocation19_spill]] %s7740_s28  ;;  %p7259_p0 = scmp.ge.s32.totalorder %s7788_s18, 1 }
  0x19   : > { %9841 = sst [smem:[#allocation20_spill]] %s7752_s9  ;;  %p63_p1 = scmp.eq.s32.totalorder %s7919_s19, 0 }
  0x1a   : > { %9842 = sst [smem:[#allocation21_spill]] %s7756_s10  ;;  %p272_p2 = scmp.eq.s32.totalorder %s7919_s19, 3 }
  0x1b   : > { %9843 = sst [smem:[#allocation22_spill]] %s7768_s13  ;;  %p285_p3 = scmp.lt.s32.totalorder %s7788_s18, 5 }
  0x1c   : > { %9844 = sst [smem:[#allocation23_spill]] %s7772_s14  ;;  %s7790_s24 = smov [#allocation9]  }
  0x1d   : > { %9845 = sst [smem:[#allocation24_spill]] %s7776_s15  ;;  %p7928_p4 = pnand %p7259_p0, %p285_p3 }
  0x1e   : > { %9846 = sst [smem:[#allocation25_spill]] %s7780_s16  ;;  %s298_s25 = sshll.u32 %s7790_s24, 4  ;;  %s299_s25 = int_to_ptr.vmem [resolvable:$true] %s298_s25 }
  0x1f   : > { %9847 = sst [smem:[#allocation26_spill]] %s7784_s17  ;;  %p7313_p5 = pneg %p7928_p4 }
  0x20   : > { %s9848_s4 = sld [smem:[#allocation37_spill]]  ;;  %s9804_s20 = smov 128  }
  0x21   : > { %s9849_s23 = scalar_select %p7928_p4, 1, 0 }
  0x22   : > { %p7936_p6 = pnand %p7313_p5, %p63_p1  ;;  %s9806_s21 = smov 8  }
  0x23   : > { %9850 = sst [smem:[#allocation27_spill]] %s9849_s23  ;;  %s40_s24 = sadd.s32 1, %s7784_s17 }
  0x24   : > { %p57_p8 = scmp.eq.s32.totalorder %s7788_s18, 0  ;;  %s7949_s8 = sshll.u32 %s7780_s16, 3 }
  0x25   : > { %s85_s3 = sadd.s32 1, %s7756_s10  ;;  %s7254_s7 = sadd.s32 4294967295, %s7949_s8 }
  0x26   : > { %s296_s22 = sshll.u32 %s9848_s4, 4  ;;  %s37_s4 = sadd.s32 1, %s7780_s16  ;;  %s297_s22 = int_to_ptr.hbm [resolvable:$true] %s296_s22 }
  0x27   : > { %7316 = dma.hbm_to_vmem [thread:$0]  (!%p7936_p6), %s297_s22, 768, %s299_s25, [#allocation10], %s9804_s20, %s9804_s20, %s9806_s21  }
  0x28   : > { %p38_p7 = scmp.ge.s32.totalorder %s37_s4, 2  ;;  %p74_p10 = scmp.gt.s32.totalorder %s7254_s7, 0 }
  0x29   : > { %p92_p11 = scmp.ne.s32.totalorder %s7756_s10, %s7752_s9  ;;  %p98_p3 = scmp.ne.s32.totalorder %s7752_s9, %s7748_s30 }
  0x2a   : > { %s9910_s4 = smov (%p38_p7, %s37_s4), 0  ;;  %s9912_s24 = smov (!%p38_p7, %s40_s24), %s7784_s17 }
  0x2b   : > { %9852 = sst [smem:[#allocation28_spill]] %s9910_s4  ;;  %s45_s15 = ssub.s32 %s7780_s16, %s9910_s4 }
  0x2c   : > { %p42_p9 = scmp.ge.s32.totalorder %s9912_s24, 2  ;;  %s7255_s22 = sshll.u32 %s9910_s4, 3 }
  0x2d   : > { %s9916_s7 = smov (!%p74_p10, %s7254_s7), 0  ;;  %s7256_s20 = sadd.s32 4294967295, %s7255_s22 }
  0x2e   : > { %s9914_s24 = smov (%p42_p9, %s9912_s24), 0  ;;  %p78_p12 = scmp.gt.s32.totalorder %s7256_s20, 0 }
  0x2f   : > { %9853 = sst [smem:[#allocation29_spill]] %s9914_s24  ;;  %s7965_s25 = ssub.s32 %s7784_s17, %s9914_s24 }
  0x30   : > { %9854 = sst [smem:[#allocation30_spill]] %s7965_s25  ;;  %s7968_s21 = sor.u32 %s45_s15, %s7965_s25 }
  0x31   : > { %p47_p13 = scmp.eq.s32.totalorder %s7968_s21, 0  ;;  %p7973_p0 = por %p92_p11, %p57_p8 }
  0x32   : > { %s9918_s20 = smov (!%p78_p12, %s7256_s20), 0  ;;  %s7979_s24 = sadd.s32 8, %s7255_s22 }
  0x33   : > { %s81_s16 = ssub.s32 %s9916_s7, %s9918_s20  ;;  %p114_p5 = scmp.lt.s32.totalorder %s7979_s24, 15 }
  0x34   : > { %s82_s5 = sor.u32 %s81_s16, %s7965_s25  ;;  %p7985_p7 = por %p98_p3, %p63_p1 }
  0x35   : > { %p83_p9 = scmp.eq.s32.totalorder %s82_s5, 0  ;;  %p9822_p10 = scmp.lt.s32.totalorder %s7788_s18, 4 }
  0x36   : > { %s7991_s14 = sshll.u32 %s7784_s17, 5  ;;  %s356_s30 = sand.u32 1, %s7788_s18  }
  0x37   : > { %s7994_s23 = scalar_select %p83_p9, %s7756_s10, %s85_s3  }
  0x38   : > { %s358_s22 = sand.u32 1, %s7756_s10   ;;  %s368_s20 = sadd.s32 %s7991_s14, %s9916_s7 }
  0x39   : > { %9857 = sst [smem:[#allocation31_spill]] %s7994_s23  ;;  %s7267_s9 = sshll.u32 %s358_s22, 4 }
  0x3a   : > { %s7271_s2 = sshll.u32 %s368_s20, 3  ;;  %s360_s16 = scalar_lea.vmem [#allocation6], %s7267_s9 }
  0x3b   : > { %s373_s25 = sshll.u32 %s360_s16, 4  ;;  %s9858_s1 = sld [smem:[#allocation34_spill]]  ;;  %s374_s25 = int_to_ptr.vmem [resolvable:$true] %s373_s25 }
  0x3c   : > { %p7324_p11 = pnand %p9822_p10, %p7973_p0  ;;  %s9859_s6 = sld [smem:[#allocation39_spill]] }
  0x3d   : > { %s9817_s28 = smov 2048   ;;  %s9860_s22 = smov 8  }
  0x3e   : > { %s9861_s4 = smov 128   ;;  %s7794_s20 = smov [#allocation11]  }
  0x3f   : > { %s315_s16 = sshll.u32 %s7794_s20, 4  ;;  %p56_p12 = scmp.ne.s32.totalorder %s7768_s13, %s7764_s12  ;;  %s316_s16 = int_to_ptr.vmem [resolvable:$true] %s315_s16 }
  0x40   : > { %p62_p3 = scmp.ne.s32.totalorder %s7764_s12, %s7760_s11  ;;  %s332_s21 = sand.u32 1, %s7768_s13  }
  0x41   : > { %s370_s5 = scalar_lea.hbm %s9858_s1, %s7271_s2  ;;  %s8009_s2 = scalar_lea.sflag [#allocation7], %s356_s30 }
  0x42   : > { %s371_s3 = sshll.u32 %s370_s5, 4  ;;  %s313_s27 = sshll.u32 %s9859_s6, 4  ;;  %s372_s3 = int_to_ptr.hbm [resolvable:$true] %s371_s3  ;;  %s314_s27 = int_to_ptr.hbm [resolvable:$true] %s313_s27 }
  0x43   : > { %7326 = dma.hbm_to_vmem [thread:$0]  (!%p7324_p11), %s372_s3, 256, %s374_s25, %s8009_s2, %s9817_s28, %s9861_s4, %s9860_s22  }
  0x44   : > { %7319 = dma.hbm_to_vmem [thread:$0]  (!%p7936_p6), %s314_s27, 256, %s316_s16, [#allocation10], %s9861_s4, %s9861_s4, %s9860_s22  }
  0x45   : > { %s7252_s5 = sadd.s32 4294967294, %s7788_s18   ;;  %s49_s30 = sadd.s32 1, %s7768_s13 }
  0x46   : > { %s8027_s7 = scalar_select %p47_p13, %s7768_s13, %s49_s30  }
  0x47   : > { %p8031_p0 = por %p57_p8, %p56_p12  ;;  %p8039_p9 = por %p272_p2, %p56_p12 }
  0x48   : > { %9862 = sst [smem:[#allocation32_spill]] %s8027_s7  ;;  %p278_p6 = scmp.eq.s32.totalorder %s7252_s5, 3 }
  0x49   : > { %p8045_p11 = por %p63_p1, %p62_p3  ;;  %s7263_s27 = sshll.u32 %s332_s21, 7 }
  0x4a   : > { %p8050_p13 = por %p278_p6, %p62_p3  ;;  %s341_s20 = sadd.s32 %s7991_s14, %s7949_s8 }
  0x4b   : > { %s7266_s16 = sshll.u32 %s341_s20, 3  ;;  %s9867_s0 = sld [smem:[#allocation33_spill]] }
  0x4c   : > { %s9868_s1 = sld [smem:[#allocation19_spill]]  ;;  %s336_s6 = scalar_lea.vmem [#allocation3], %s7263_s27 }
  0x4d   : > { %s9869_s17 = sld [smem:[#allocation18_spill]]  ;;  %s346_s7 = sshll.u32 %s336_s6, 4  ;;  %s347_s7 = int_to_ptr.vmem [resolvable:$true] %s346_s7 }
  0x4e   : > { %s9870_s23 = sld [smem:[#allocation30_spill]]  ;;  %p7321_p2 = pnand %p9822_p10, %p8031_p0 }
  0x4f   : > { %s333_s20 = scalar_lea.sflag [#allocation4], %s332_s21  ;;  %s7795_s10 = smov 1024  }
  0x50   : > { %s7796_s28 = smov 64   ;;  %s7292_s27 = sadd.s32 8, %s7949_s8 }
  0x51   : > { %s343_s5 = scalar_lea.hbm %s9867_s0, %s7266_s16  ;;  %s9871_s16 = smov 2048  }
  0x52   : > { %s344_s13 = sshll.u32 %s343_s5, 4  ;;  %p110_p12 = scmp.lt.s32.totalorder %s7292_s27, 15  ;;  %s345_s13 = int_to_ptr.hbm [resolvable:$true] %s344_s13 }
  0x53   : > { %7323 = dma.hbm_to_vmem [thread:$0]  (!%p7321_p2), %s345_s13, 2048, %s347_s7, %s333_s20, %s9871_s16, %s7795_s10, %s7796_s28  }
  0x54   : > { %s121_s6 = sadd.s32 1, %s7744_s29  ;;  %s9920_s24 = smov (!%p114_p5, %s7979_s24), 15 }
  0x55   : > { %s9922_s27 = smov (!%p110_p12, %s7292_s27), 15  ;;  %p128_p3 = scmp.ne.s32.totalorder %s7744_s29, %s9868_s1 }
  0x56   : > { %p134_p6 = scmp.ne.s32.totalorder %s9868_s1, %s9869_s17  ;;  %s117_s9 = ssub.s32 %s9922_s27, %s9920_s24 }
  0x57   : > { %s385_s30 = sand.u32 1, %s7744_s29   ;;  %s118_s21 = sor.u32 %s117_s9, %s9870_s23 }
  0x58   : > { %p8077_p0 = por %p128_p3, %p57_p8  ;;  %p119_p2 = scmp.eq.s32.totalorder %s118_s21, 0 }
  0x59   : > { %p8083_p10 = por %p134_p6, %p63_p1  ;;  %s7272_s10 = sshll.u32 %s385_s30, 4 }
  0x5a   : > { %s395_s13 = sadd.s32 %s7991_s14, %s9922_s27  ;;  %s9874_s23 = sld [smem:[#allocation35_spill]] }
  0x5b   : > { %s8089_s1 = scalar_select %p119_p2, %s7744_s29, %s121_s6  }
  0x5c   : > { %s7275_s17 = sshll.u32 %s395_s13, 3  ;;  %s387_s28 = scalar_lea.vmem [#allocation8], %s7272_s10 }
  0x5d   : > { %s400_s9 = sshll.u32 %s387_s28, 4  ;;  %p9875_p8 = scmp.lt.s32.totalorder %s7788_s18, 4  ;;  %s401_s9 = int_to_ptr.vmem [resolvable:$true] %s400_s9 }
  0x5e   : > { %424 = sbr.rel (%p7928_p4) target bundleno = 1037 (0x40d), region = 52  ;;  %s8105_s27 = sand.u32 (!%p7928_p4), 1, %s7764_s12  }
  0x5f   : > { %p7327_p5 = pnand %p9875_p8, %p8077_p0  ;;  %s7277_s6 = sshll.u32 (!%p7928_p4), %s8105_s27, 7 }
  0x60   : > { %s397_s20 = scalar_lea.hbm %s9874_s23, %s7275_s17  ;;  %s427_s30 = scalar_lea.sflag (!%p7928_p4), [#allocation4], %s8105_s27 }
  0x61   : > { %s398_s0 = sshll.u32 %s397_s20, 4  ;;  %s8111_s21 = scalar_lea.vmem (!%p7928_p4), [#allocation3], %s7277_s6  ;;  %s399_s0 = int_to_ptr.hbm [resolvable:$true] %s398_s0 }
  0x62   : > { %7329 = dma.hbm_to_vmem [thread:$0]  (!%p7327_p5), %s399_s0, 256, %s401_s9, %s8009_s2, %s9871_s16, %s9861_s4, %s9860_s22  }
  0x63   : > { %7715 = dma.done.wait (%p8045_p11), %s427_s30, 2048  }
  0x64   : > { %7717 = vsyncadd (%p8045_p11), %s427_s30, 4294965248  ;;  %s9877_s0 = sld [smem:[#allocation20_spill]]  ;;  %s436_s2 = sand.u32 1, %s7919_s19  }
  0x65   : > { %s437_s16 = scalar_lea.sflag [#allocation7], %s436_s2 }
  0x6a   : > { %s438_s22 = sand.u32 1, %s9877_s0  }
  0x6b   : > { %s8119_s4 = sshll.u32 %s438_s22, 4 }
  0x6c   : > { %s440_s5 = scalar_lea.vmem [#allocation6], %s8119_s4 }
  0x6d   : > { %7719 = dma.done.wait (%p7985_p7), %s437_s16, 256  }
  0x6e   : > { %7721 = vsyncadd (%p7985_p7), %s437_s16, 4294967040  ;;  %s9878_s10 = sld [smem:[#allocation19_spill]] }
  0x74   : > { %s448_s13 = sand.u32 1, %s9878_s10  }
  0x75   : > { %s8127_s25 = sshll.u32 %s448_s13, 4 }
  0x76   : > { %s450_s17 = scalar_lea.vmem [#allocation8], %s8127_s25 }
  0x77   : > { %7723 = dma.done.wait (%p8083_p10), %s437_s16, 256  }
  0x78   : > { %7725 = vsyncadd (%p8083_p10), %s437_s16, 4294967040 }
  0x79   : > { %7727 = dma.done.wait (%p63_p1), [#allocation10], 1024  }
  0x7a   : > { %7729 = vsyncadd (%p63_p1), [#allocation10], 4294966272  ;;  %s9879_s15 = sld [smem:[#allocation23_spill]]  ;;  %vm606_vm0 = vcmask 130048   ;;  %v8140_v0 = vld [vmem:[%s8111_s21 + $0x40] sm:$0xff]  ;;  %v604_v2 = vld [vmem:[#allocation9 + $0x10] sm:$0xff] }
  0x7b   : > { %v8143_v1 = vld [vmem:[%s8111_s21] sm:$0xff]  ;;  %v627_v3 = vand.u32 4294901760, %v8140_v0  ;;  %v608_v5 = vsel %vm606_vm0, %v604_v2, 0  ;;  %v8151_v6 = vld [vmem:[%s8111_s21 + $0x48] sm:$0xff]  ;;  %v605_v7 = vld [vmem:[#allocation9 + $0x18] sm:$0xff]  ;;  %s7797_s19 = smov 4  }
  0x7c   : > { %v8147_v4 = vand.u32 4294901760, %v8143_v1  ;;  %v8154_v8 = vld [vmem:[%s8111_s21 + $0x8] sm:$0xff]  ;;  %v8156_v9 = vand.u32 4294901760, %v608_v5  ;;  %v8159_v10 = vand.u32 4294901760, %v8151_v6  ;;  %v611_v11 = vsel %vm606_vm0, %v605_v7, 0  ;;  %2173 = vrot.lane.b32.xlu2 %v8151_v6, %s7797_s19  ;;  %v8199_v31 = vld [vmem:[%s8111_s21 + $0x50] sm:$0xff] }
  0x7d   : > { %v8163_v12 = vand.u32 4294901760, %v8154_v8  ;;  %v663_v13 = vsub.f32 %v8140_v0, %v627_v3  ;;  %729 = vmatpush.msra.mxu3 %v627_v3  ;;  %628 = vmatpush.msra.mxu0 %v627_v3  ;;  %v8170_v15 = vand.u32 4294901760, %v611_v11  ;;  %v8212_v38 = vand.u32 4294901760, %v8199_v31  ;;  %v8227_v42 = vld [vmem:[%s8111_s21 + $0x10] sm:$0xff]  ;;  %v8252_v49 = vld [vmem:[%s8111_s21 + $0x58] sm:$0xff]  ;;  %v8295_v2 = vld [vmem:[%s8111_s21 + $0x60] sm:$0xff] }
  0x7e   : > { %v669_v14 = vsub.f32 %v8143_v1, %v8147_v4  ;;  %v8173_v16 = vsub.f32 %v608_v5, %v8156_v9  ;;  %v853_v17 = vsub.f32 %v8151_v6, %v8159_v10  ;;  %v8232_v43 = vand.u32 4294901760, %v8227_v42  ;;  %v8263_v54 = vld [vmem:[%s8111_s21 + $0x18] sm:$0xff]  ;;  %v8306_v5 = vld [vmem:[%s8111_s21 + $0x20] sm:$0xff]  ;;  %s7798_s24 = smov 124   ;;  %s9882_s28 = sld [smem:[#allocation38_spill]] }
  0x7f   : > { %v859_v18 = vsub.f32 %v8154_v8, %v8163_v12  ;;  %699 = vmatpush.msra.mxu2 %v663_v13  ;;  %731 = vmatpush.msra.mxu3 %v8147_v4  ;;  %v664_v19 = vand.u32 4294901760, %v663_v13  ;;  %v8185_v21 = vsub.f32 %v611_v11, %v8170_v15  ;;  %v8220_v40 = vsub.f32 %v8199_v31, %v8212_v38  ;;  %s9884_s22 = sld [smem:[#allocation40_spill]]  ;;  %s9650_s23 = scalar_lea.vmem [#allocation12], %s7277_s6 }
  0x80   : > { %p567_p4 = scmp.gt.s32.totalorder %s9879_s15, 0  ;;  %v670_v20 = vand.u32 4294901760, %v669_v14  ;;  %v8188_v22 = vand.u32 4294901760, %v8173_v16  ;;  %630 = vmatpush.msra.mxu0 %v8147_v4  ;;  %v854_v23 = vand.u32 4294901760, %v853_v17  ;;  %v1049_v46 = vsub.f32 %v8227_v42, %v8232_v43  ;;  %p575_p1 = scmp.lt.s32.totalorder %s9879_s15, 1 }
  0x81   : > { %v860_v24 = vand.u32 4294901760, %v859_v18  ;;  %702 = vmatpush.msra.mxu2 %v669_v14  ;;  %v665_v25 = vsub.f32 %v663_v13, %v664_v19  ;;  %v8192_v27 = vand.u32 4294901760, %v8185_v21  ;;  %v1044_v45 = vand.u32 4294901760, %v8220_v40  ;;  %s9608_s10 = sshll.u32 %s9879_s15, 3  ;;  %s9892_s30 = sld [smem:[#allocation41_spill]] }
  0x82   : > { %s8181_s8 = scalar_select %p567_p4, 255, 0  ;;  %762 = vmatpush.msrb.mxu0 %v664_v19  ;;  %v671_v26 = vsub.f32 %v669_v14, %v670_v20  ;;  %705 = vmatmul.f32.vlgmr.msra.gmra.mxu2 %v8173_v16  ;;  %v634_v28 = vsub.f32 %v8173_v16, %v8188_v22  ;;  %v855_v29 = vsub.f32 %v853_v17, %v854_v23  ;;  %v1050_v47 = vand.u32 4294901760, %v1049_v46  ;;  %v8317_v14 = vld [vmem:[%s8111_s21 + $0x68] sm:$0xff] }
  0x83   : > { %735 = vmatmul.f32.vlgmr.msra.gmra.mxu3 %v8188_v22  ;;  %v861_v30 = vsub.f32 %v859_v18, %v860_v24  ;;  %818 = vmatpush.msrb.mxu2 %v8159_v10  ;;  %v666_v33 = vand.u32 4294901760, %v665_v25  ;;  %v642_v39 = vsub.f32 %v8185_v21, %v8192_v27  ;;  %v1045_v48 = vsub.f32 %v8220_v40, %v1044_v45  ;;  %s8968_s7 = scalar_select %p575_p1, 255, 0 }
  0x84   : > { %v7470_v32 = vld [vmem:[%s440_s5 + $0x8] sm:%s8181_s8]  ;;  %v672_v34 = vand.u32 4294901760, %v671_v26  ;;  %766 = vmatpush.msrb.mxu0 %v670_v20  ;;  %v8205_v35 = vand.u32 4294901760, %v634_v28  ;;  %v856_v36 = vand.u32 4294901760, %v855_v29  ;;  %2155 = vrot.lane.b32.xlu2 %v8154_v8, %s7797_s19  ;;  %v1051_v50 = vsub.f32 %v1049_v46, %v1050_v47  ;;  %s9883_s0 = smov %s9882_s28  ;;  %p524_p10 = scmp.lt.s32.totalorder %s9608_s10, 15 }
  0x85   : > { %v862_v37 = vand.u32 4294901760, %v861_v30  ;;  %2169 = vrot.lane.b32.xlu0 %v7470_v32, %s7797_s19  ;;  %667 = vmatpush.msra.mxu1 %v666_v33  ;;  %v8224_v41 = vand.u32 4294901760, %v642_v39  ;;  %v7473_v44 = vld [vmem:[%s440_s5] sm:%s8181_s8]  ;;  %v1197_v51 = vand.u32 4294901760, %v8252_v49  ;;  %v1046_v52 = vand.u32 4294901760, %v1045_v48  ;;  %v8385_v48 = vld [vmem:[%s8111_s21 + $0x78] sm:$0xff] }
  0x86   : > { %820 = vmatpush.msrb.mxu2 %v8163_v12  ;;  %636 = vmatmul.f32.vlgmr.msra.gmra.mxu0 %v8205_v35  ;;  %v1052_v55 = vand.u32 4294901760, %v1051_v50  ;;  %v1199_v56 = vand.u32 4294901760, %v8263_v54  ;;  %v1389_v7 = vand.u32 4294901760, %v8306_v5  ;;  %v8363_v39 = vld [vmem:[%s8111_s21 + $0x30] sm:$0xff]  ;;  %vm2187_vm1 = vcmask 31744   ;;  %s9890_s5 = sld [smem:[#allocation24_spill]] }
  0x87   : > { %857 = vmatpush.msrb.mxu3 %v856_v36  ;;  %673 = vmatpush.msra.mxu1 %v672_v34  ;;  %v1233_v53 = vsub.f32 %v8252_v49, %v1197_v51  ;;  %v8347_v36 = vld [vmem:[%s8111_s21 + $0x70] sm:$0xff]  ;;  %vm3821_vm2 = vcmask 1014784   ;;  %s525_s25 = scalar_select %p524_p10, %s9608_s10, 15 }
  0x88   : > { %952 = vmatpush.msra.mxu2 %v854_v23  ;;  %675 = vmatmul.f32.vlgmr.msra.gmra.mxu1 %v8156_v9  ;;  %v1239_v58 = vsub.f32 %v8263_v54, %v1199_v56  ;;  %v1429_v11 = vsub.f32 %v8306_v5, %v1389_v7  ;;  %v8325_v23 = vld [vmem:[%s8111_s21 + $0x28] sm:$0xff]  ;;  %s9893_s2 = smov %s9892_s30 }
  0x89   : > { %863 = vmatpush.msrb.mxu3 %v862_v37  ;;  %791 = vmatpush.msrb.mxu1 %v627_v3  ;;  %v1234_v57 = vand.u32 4294901760, %v1233_v53  ;;  %v1387_v3 = vand.u32 4294901760, %v8295_v2  ;;  %v1579_v25 = vand.u32 4294901760, %v8325_v23  ;;  %v8352_v37 = vand.u32 4294901760, %v8347_v36 }
  0x8a   : > { %889 = vmatpush.msra.mxu0 %v853_v17  ;;  %710 = vmatmul.f32.gmra.mxu2 %v8185_v21  ;;  %v1240_v60 = vand.u32 4294901760, %v1239_v58 }
  0x8b   : > { %741 = vmatmul.f32.gmra.mxu3 %v8192_v27  ;;  %793 = vmatpush.msrb.mxu1 %v8147_v4  ;;  %v1235_v59 = vsub.f32 %v1233_v53, %v1234_v57  ;;  %v1423_v4 = vsub.f32 %v8295_v2, %v1387_v3  ;;  %v1619_v28 = vsub.f32 %v8325_v23, %v1579_v25 }
  0x8c   : > { %981 = vmatpush.msra.mxu3 %v8159_v10  ;;  %956 = vmatpush.msra.mxu2 %v860_v24  ;;  %v1241_v61 = vsub.f32 %v1239_v58, %v1240_v60  ;;  %p522_p7 = scmp.lt.s32.totalorder %s9890_s5, 1  ;;  %s7287_s6 = sshll.u32 %s9890_s5, 5 }
  0x8d   : > { %919 = vmatpush.msra.mxu1 %v8159_v10  ;;  %892 = vmatpush.msra.mxu0 %v859_v18  ;;  %v1236_v62 = vand.u32 4294901760, %v1235_v59  ;;  %v1424_v10 = vand.u32 4294901760, %v1423_v4  ;;  %v1577_v18 = vand.u32 4294901760, %v8317_v14  ;;  %v1620_v30 = vand.u32 4294901760, %v1619_v28  ;;  %s7074_s20 = sadd.s32 %s7287_s6, %s9608_s10  ;;  %s7063_s10 = scalar_lea.sflag [#allocation5], %s8105_s27 }
  0x8e   : > { %983 = vmatpush.msra.mxu3 %v8163_v12  ;;  %644 = vmatmul.f32.gmra.mxu0 %v8224_v41  ;;  %v1242_v63 = vand.u32 4294901760, %v1241_v61  ;;  %s523_s13 = scalar_select %p522_p7, %s9890_s5, 1 }
  0x8f   : > { %921 = vmatpush.msra.mxu1 %v8163_v12  ;;  %2151 = vrot.lane.b32.xlu1 %v7473_v44, %s7797_s19  ;;  %v1430_v12 = vand.u32 4294901760, %v1429_v11  ;;  %v1425_v13 = vsub.f32 %v1423_v4, %v1424_v10  ;;  %v1613_v20 = vsub.f32 %v8317_v14, %v1577_v18  ;;  %v1621_v32 = vsub.f32 %v1619_v28, %v1620_v30  ;;  %s7077_s5 = sshll.u32 %s9650_s23, 4  ;;  %s7078_s5 = int_to_ptr.vmem [resolvable:$true] %s7077_s5 }
  0x90   : > { %2171 = vrot.lane.b32.xlu0 %v8140_v0, %s7797_s19  ;;  %679 = vmatmul.f32.gmra.mxu1 %v8170_v15 }
  0x91   : > { %2177 = vrot.lane.b32.xlu2 %v8252_v49, %s7797_s19  ;;  %v1431_v17 = vsub.f32 %v1429_v11, %v1430_v12  ;;  %v1426_v19 = vand.u32 4294901760, %v1425_v13  ;;  %v1614_v26 = vand.u32 4294901760, %v1613_v20  ;;  %v1622_v34 = vand.u32 4294901760, %v1621_v32 }
  0x92   : > { %826 = vmatmul.f32.vlgmr.msrb.gmra.mxu2 %v8205_v35 }
  0x93   : > { %865 = vmatmul.f32.vlgmr.msrb.gmra.mxu3 %v8156_v9  ;;  %1079 = vmatpush.msrb.mxu2 %v8220_v40  ;;  %v1432_v24 = vand.u32 4294901760, %v1431_v17  ;;  %v1615_v29 = vsub.f32 %v1613_v20, %v1614_v26  ;;  %v8366_v40 = vand.u32 4294901760, %v8363_v39 }
  0x94   : > { %1109 = vmatpush.msrb.mxu3 %v8212_v38 }
  0x95   : > { %1082 = vmatpush.msrb.mxu2 %v1049_v46  ;;  %v1616_v33 = vand.u32 4294901760, %v1615_v29  ;;  %v8374_v44 = vsub.f32 %v8363_v39, %v8366_v40 }
  0x96   : > { %1111 = vmatpush.msrb.mxu3 %v8232_v43  ;;  %768 = vmatmul.f32.vlgmr.msrb.gmra.mxu0 %v8156_v9 }
  0x97   : > { %1008 = vmatpush.msrb.mxu0 %v8212_v38  ;;  %2153 = vrot.lane.b32.xlu1 %v8143_v1, %s7797_s19  ;;  %v1810_v46 = vand.u32 4294901760, %v8374_v44 }
  0x98   : > { %795 = vmatmul.f32.vlgmr.msrb.gmra.mxu1 %v8156_v9  ;;  %2175 = vrot.lane.b32.xlu0 %v8199_v31, %s7797_s19 }
  0x99   : > { %1047 = vmatpush.msrb.mxu1 %v1046_v52  ;;  %1010 = vmatpush.msrb.mxu0 %v8232_v43  ;;  %v8396_v52 = vld [vmem:[%s8111_s21 + $0x38] sm:$0xff] }
  0x9a   : > { %834 = vmatmul.f32.gmra.mxu2 %v8224_v41  ;;  %2161 = vrot.lane.b32.xlu2 %v8306_v5, %s7797_s19 }
  0x9b   : > { %869 = vmatmul.f32.gmra.mxu3 %v8170_v15  ;;  %1053 = vmatpush.msrb.mxu1 %v1052_v55  ;;  %v8406_v55 = vand.u32 4294901760, %v8396_v52 }
  0x9e   : > { %772 = vmatmul.f32.gmra.mxu0 %v8170_v15 }
  0x9f   : > { %2157 = vrot.lane.b32.xlu1 %v8227_v42, %s7797_s19 }
  0xa0   : > { %799 = vmatmul.f32.gmra.mxu1 %v8170_v15  ;;  %2159 = vrot.lane.b32.xlu0 %v8263_v54, %s7797_s19 }
  0xa2   : > { %958 = vmatmul.f32.vlgmr.msra.gmra.mxu2 %v8156_v9  ;;  %2183 = vrot.lane.b32.xlu2 %v8347_v36, %s7797_s19 }
  0xa3   : > { %985 = vmatmul.f32.vlgmr.msra.gmra.mxu3 %v8156_v9  ;;  %1198 = vmatpush.msra.mxu2 %v1197_v51 }
  0xa4   : > { %1237 = vmatpush.msra.mxu3 %v1236_v62 }
  0xa5   : > { %1200 = vmatpush.msra.mxu2 %v1199_v56 }
  0xa6   : > { %1243 = vmatpush.msra.mxu3 %v1242_v63  ;;  %895 = vmatmul.f32.vlgmr.msra.gmra.mxu0 %v8173_v16 }
  0xa7   : > { %1142 = vmatpush.msra.mxu0 %v1044_v45  ;;  %2179 = vrot.lane.b32.xlu1 %v8295_v2, %s7797_s19 }
  0xa8   : > { %925 = vmatmul.f32.vlgmr.msra.gmra.mxu1 %v8188_v22  ;;  %2181 = vrot.lane.b32.xlu0 %v8317_v14, %s7797_s19 }
  0xa9   : > { %1171 = vmatpush.msra.mxu1 %v8212_v38  ;;  %1146 = vmatpush.msra.mxu0 %v1050_v47  ;;  %v8358_v38 = vsub.f32 %v8347_v36, %v8352_v37  ;;  %v1811_v47 = vsub.f32 %v8374_v44, %v1810_v46 }
  0xaa   : > { %962 = vmatmul.f32.gmra.mxu2 %v8170_v15  ;;  %2167 = vrot.lane.b32.xlu2 %v8396_v52, %s7797_s19 }
  0xab   : > { %989 = vmatmul.f32.gmra.mxu3 %v8170_v15  ;;  %1173 = vmatpush.msra.mxu1 %v8232_v43  ;;  %v1804_v43 = vand.u32 4294901760, %v8358_v38 }
  0xad   : > { %v1805_v45 = vsub.f32 %v8358_v38, %v1804_v43 }
  0xae   : > { %900 = vmatmul.f32.gmra.mxu0 %v8185_v21 }
  0xaf   : > { %2163 = vrot.lane.b32.xlu1 %v8325_v23, %s7797_s19  ;;  %v1806_v50 = vand.u32 4294901760, %v1805_v45 }
  0xb0   : > { %931 = vmatmul.f32.gmra.mxu1 %v8192_v27  ;;  %2165 = vrot.lane.b32.xlu0 %v8363_v39, %s7797_s19 }
  0xb2   : > { %1085 = vmatmul.f32.vlgmr.msrb.gmra.mxu2 %v8173_v16  ;;  %3785 = vrot.lane.b32.xlu2 %v8143_v1, %s7798_s24 }
  0xb3   : > { %1115 = vmatmul.f32.vlgmr.msrb.gmra.mxu3 %v8188_v22  ;;  %1332 = vmatpush.msrb.mxu2 %v1234_v57  ;;  %v8415_v57 = vsub.f32 %v8396_v52, %v8406_v55 }
  0xb4   : > { %1361 = vmatpush.msrb.mxu3 %v1197_v51 }
  0xb5   : > { %1336 = vmatpush.msrb.mxu2 %v1240_v60  ;;  %v2000_v59 = vand.u32 4294901760, %v8415_v57 }
  0xb6   : > { %1363 = vmatpush.msrb.mxu3 %v1199_v56  ;;  %1016 = vmatmul.f32.vlgmr.msrb.gmra.mxu0 %v8205_v35 }
  0xb7   : > { %1269 = vmatpush.msrb.mxu0 %v1233_v53  ;;  %2185 = vrot.lane.b32.xlu1 %v8385_v48, %s7797_s19  ;;  %v1812_v53 = vand.u32 4294901760, %v1811_v47  ;;  %v2001_v60 = vsub.f32 %v8415_v57, %v2000_v59  ;;  %s7650_s19 = scalar_lea.hbm %s9893_s2, 512 }
  0xb8   : > { %1055 = vmatmul.f32.vlgmr.msrb.gmra.mxu1 %v8156_v9  ;;  %3803 = vrot.lane.b32.xlu0 %v8140_v0, %s7798_s24 }
  0xb9   : > { %1299 = vmatpush.msrb.mxu1 %v1197_v51  ;;  %1272 = vmatpush.msrb.mxu0 %v1239_v58  ;;  %v8392_v51 = vand.u32 4294901760, %v8385_v48  ;;  %v2002_v62 = vand.u32 4294901760, %v2001_v60 }
  0xba   : > { %1090 = vmatmul.f32.gmra.mxu2 %v8185_v21  ;;  %3789 = vrot.lane.b32.xlu2 %v8227_v42, %s7798_s24 }
  0xbb   : > { %1121 = vmatmul.f32.gmra.mxu3 %v8192_v27  ;;  %1301 = vmatpush.msrb.mxu1 %v1199_v56  ;;  %v8403_v0 = vsub.f32 %v8385_v48, %v8392_v51 }
  0xbd   : > { %v1994_v56 = vand.u32 4294901760, %v8403_v0 }
  0xbe   : > { %1024 = vmatmul.f32.gmra.mxu0 %v8224_v41 }
  0xbf   : > { %v1995_v58 = vsub.f32 %v8403_v0, %v1994_v56  ;;  %3805 = vrot.lane.b32.xlu1 %v8151_v6, %s7798_s24 }
  0xc0   : > { %1059 = vmatmul.f32.gmra.mxu1 %v8170_v15  ;;  %3787 = vrot.lane.b32.xlu0 %v8154_v8, %s7798_s24 }
  0xc1   : > { %v1996_v61 = vand.u32 4294901760, %v1995_v58 }
  0xc2   : > { %1206 = vmatmul.f32.vlgmr.msra.gmra.mxu2 %v8205_v35  ;;  %3811 = vrot.lane.b32.xlu2 %v8295_v2, %s7798_s24 }
  0xc3   : > { %1245 = vmatmul.f32.vlgmr.msra.gmra.mxu3 %v8156_v9  ;;  %1459 = vmatpush.msra.mxu2 %v1423_v4 }
  0xc4   : > { %1489 = vmatpush.msra.mxu3 %v1387_v3 }
  0xc5   : > { %1462 = vmatpush.msra.mxu2 %v1429_v11 }
  0xc6   : > { %1491 = vmatpush.msra.mxu3 %v1389_v7  ;;  %1148 = vmatmul.f32.vlgmr.msra.gmra.mxu0 %v8156_v9 }
  0xc7   : > { %1388 = vmatpush.msra.mxu0 %v1387_v3  ;;  %3807 = vrot.lane.b32.xlu1 %v8199_v31, %s7798_s24 }
  0xc8   : > { %1175 = vmatmul.f32.vlgmr.msra.gmra.mxu1 %v8156_v9  ;;  %3809 = vrot.lane.b32.xlu0 %v8252_v49, %s7798_s24 }
  0xc9   : > { %1427 = vmatpush.msra.mxu1 %v1426_v19  ;;  %1390 = vmatpush.msra.mxu0 %v1389_v7 }
  0xca   : > { %1214 = vmatmul.f32.gmra.mxu2 %v8224_v41  ;;  %3795 = vrot.lane.b32.xlu2 %v8325_v23, %s7798_s24 }
  0xcb   : > { %1249 = vmatmul.f32.gmra.mxu3 %v8170_v15  ;;  %1433 = vmatpush.msra.mxu1 %v1432_v24 }
  0xce   : > { %1152 = vmatmul.f32.gmra.mxu0 %v8170_v15 }
  0xcf   : > { %3791 = vrot.lane.b32.xlu1 %v8263_v54, %s7798_s24 }
  0xd0   : > { %1179 = vmatmul.f32.gmra.mxu1 %v8170_v15  ;;  %3793 = vrot.lane.b32.xlu0 %v8306_v5, %s7798_s24 }
  0xd2   : > { %1338 = vmatmul.f32.vlgmr.msrb.gmra.mxu2 %v8156_v9  ;;  %3817 = vrot.lane.b32.xlu2 %v8385_v48, %s7798_s24 }
  0xd3   : > { %1365 = vmatmul.f32.vlgmr.msrb.gmra.mxu3 %v8156_v9  ;;  %1578 = vmatpush.msrb.mxu2 %v1577_v18 }
  0xd4   : > { %1617 = vmatpush.msrb.mxu3 %v1616_v33 }
  0xd5   : > { %1580 = vmatpush.msrb.mxu2 %v1579_v25 }
  0xd6   : > { %1623 = vmatpush.msrb.mxu3 %v1622_v34  ;;  %1275 = vmatmul.f32.vlgmr.msrb.gmra.mxu0 %v8173_v16  ;;  %v8456_v19 = vpop.permute.xlu2 %2173 }
  0xd7   : > { %1522 = vmatpush.msrb.mxu0 %v1424_v10  ;;  %3813 = vrot.lane.b32.xlu1 %v8317_v14, %s7798_s24 }
  0xd8   : > { %1305 = vmatmul.f32.vlgmr.msrb.gmra.mxu1 %v8188_v22  ;;  %3815 = vrot.lane.b32.xlu0 %v8347_v36, %s7798_s24 }
  0xd9   : > { %1551 = vmatpush.msrb.mxu1 %v1387_v3  ;;  %1526 = vmatpush.msrb.mxu0 %v1430_v12 }
  0xda   : > { %1342 = vmatmul.f32.gmra.mxu2 %v8170_v15 }
  0xdb   : > { %1369 = vmatmul.f32.gmra.mxu3 %v8170_v15  ;;  %1553 = vmatpush.msrb.mxu1 %v1389_v7 }
  0xde   : > { %1280 = vmatmul.f32.gmra.mxu0 %v8185_v21  ;;  %v8496_v23 = vpop.permute.xlu2 %2155 }
  0xdf   : > { %3797 = vrot.lane.b32.xlu1 %v8363_v39, %s7798_s24 }
  0xe0   : > { %1311 = vmatmul.f32.gmra.mxu1 %v8192_v27  ;;  %3799 = vrot.lane.b32.xlu0 %v8396_v52, %s7798_s24 }
  0xe2   : > { %1465 = vmatmul.f32.vlgmr.msra.gmra.mxu2 %v8173_v16 }
  0xe3   : > { %1495 = vmatmul.f32.vlgmr.msra.gmra.mxu3 %v8188_v22  ;;  %1712 = vmatpush.msra.mxu2 %v1614_v26 }
  0xe4   : > { %1741 = vmatpush.msra.mxu3 %v1577_v18 }
  0xe5   : > { %1716 = vmatpush.msra.mxu2 %v1620_v30 }
  0xe6   : > { %1743 = vmatpush.msra.mxu3 %v1579_v25  ;;  %1396 = vmatmul.f32.vlgmr.msra.gmra.mxu0 %v8205_v35 }
  0xe7   : > { %1649 = vmatpush.msra.mxu0 %v1613_v20 }
  0xe8   : > { %1435 = vmatmul.f32.vlgmr.msra.gmra.mxu1 %v8156_v9 }
  0xe9   : > { %1679 = vmatpush.msra.mxu1 %v1577_v18  ;;  %1652 = vmatpush.msra.mxu0 %v1619_v28 }
  0xea   : > { %1470 = vmatmul.f32.gmra.mxu2 %v8185_v21 }
  0xeb   : > { %1501 = vmatmul.f32.gmra.mxu3 %v8192_v27  ;;  %1681 = vmatpush.msra.mxu1 %v1579_v25 }
  0xee   : > { %1404 = vmatmul.f32.gmra.mxu0 %v8224_v41 }
  0xf0   : > { %1439 = vmatmul.f32.gmra.mxu1 %v8170_v15 }
  0xf2   : > { %1586 = vmatmul.f32.vlgmr.msrb.gmra.mxu2 %v8205_v35 }
  0xf3   : > { %1625 = vmatmul.f32.vlgmr.msrb.gmra.mxu3 %v8156_v9  ;;  %1839 = vmatpush.msrb.mxu2 %v8358_v38 }
  0xf4   : > { %1869 = vmatpush.msrb.mxu3 %v8352_v37 }
  0xf5   : > { %1842 = vmatpush.msrb.mxu2 %v8374_v44 }
  0xf6   : > { %1871 = vmatpush.msrb.mxu3 %v8366_v40  ;;  %1528 = vmatmul.f32.vlgmr.msrb.gmra.mxu0 %v8156_v9 }
  0xf7   : > { %1768 = vmatpush.msrb.mxu0 %v8352_v37  ;;  %v2170_v8 = vpop.permute.xlu0 %2169 }
  0xf8   : > { %1555 = vmatmul.f32.vlgmr.msrb.gmra.mxu1 %v8156_v9 }
  0xf9   : > { %1807 = vmatpush.msrb.mxu1 %v1806_v50  ;;  %1770 = vmatpush.msrb.mxu0 %v8366_v40 }
  0xfa   : > { %1594 = vmatmul.f32.gmra.mxu2 %v8224_v41 }
  0xfb   : > { %1629 = vmatmul.f32.gmra.mxu3 %v8170_v15  ;;  %1813 = vmatpush.msrb.mxu1 %v1812_v53 }
  0xfe   : > { %1532 = vmatmul.f32.gmra.mxu0 %v8170_v15 }
 0x100   : > { %1559 = vmatmul.f32.gmra.mxu1 %v8170_v15 }
 0x101   : > { %v2152_v7 = vpop.permute.xlu1 %2151 }
 0x102   : > { %1718 = vmatmul.f32.vlgmr.msra.gmra.mxu2 %v8156_v9  ;;  %v2172_v17 = vpop.permute.xlu0 %2171 }
 0x103   : > { %1745 = vmatmul.f32.vlgmr.msra.gmra.mxu3 %v8156_v9  ;;  %v637_v63 = vpop.f32.mrf.mxu0  ;;  %1958 = vmatpush.msra.mxu2 %v8392_v51  ;;  %v2196_v24 = vsel %vm2187_vm1, %v2170_v8, %v2172_v17  ;;  %v2197_v36 = vsel %vm2187_vm1, %v2172_v17, %v8456_v19 }
 0x104   : > { %1997 = vmatpush.msra.mxu3 %v1996_v61  ;;  %v8471_v28 = vand.u32 4294901760, %v2196_v24 }
 0x105   : > { %v676_v6 = vpop.f32.mrf.mxu1  ;;  %v706_v3 = vpop.f32.mrf.mxu2  ;;  %1960 = vmatpush.msra.mxu2 %v8406_v55 }
 0x106   : > { %2003 = vmatpush.msra.mxu3 %v2002_v62  ;;  %v677_v1 = vadd.f32 %v676_v6, %v637_v63  ;;  %1655 = vmatmul.f32.vlgmr.msra.gmra.mxu0 %v8173_v16  ;;  %v736_v4 = vpop.f32.mrf.mxu3  ;;  %v8484_v33 = vsub.f32 %v2196_v24, %v8471_v28  ;;  %v584_v24 = vld [vmem:[#allocation9 + $0x8] sm:$0xff] }
 0x107   : > { %1902 = vmatpush.msra.mxu0 %v1804_v43 }
 0x108   : > { %v707_v10 = vadd.f32 %v706_v3, %v677_v1  ;;  %1685 = vmatmul.f32.vlgmr.msra.gmra.mxu1 %v8188_v22  ;;  %v583_v1 = vld [vmem:[#allocation9] sm:$0xff] }
 0x109   : > { %1931 = vmatpush.msra.mxu1 %v8352_v37  ;;  %1906 = vmatpush.msra.mxu0 %v1810_v46  ;;  %v2154_v5 = vpop.permute.xlu1 %2153  ;;  %v8510_v46 = vand.u32 4294901760, %v2197_v36 }
 0x10a   : > { %v8443_v49 = vadd.f32 %v736_v4, %v707_v10  ;;  %1722 = vmatmul.f32.gmra.mxu2 %v8170_v15  ;;  %v2188_v2 = vsel %vm2187_vm1, %v2152_v7, %v2154_v5  ;;  %v2189_v44 = vsel %vm2187_vm1, %v2154_v5, %v8496_v23 }
 0x10b   : > { %1749 = vmatmul.f32.gmra.mxu3 %v8170_v15  ;;  %v645_v11 = vpop.f32.mrf.mxu0  ;;  %1933 = vmatpush.msra.mxu1 %v8366_v40  ;;  %v8478_v32 = vand.u32 4294901760, %v2188_v2  ;;  %v2277_v40 = vand.u32 4294901760, %v8484_v33  ;;  %v8524_v52 = vsub.f32 %v2197_v36, %v8510_v46 }
 0x10d   : > { %v680_v31 = vpop.f32.mrf.mxu1  ;;  %v711_v42 = vpop.f32.mrf.mxu2  ;;  %v8493_v34 = vsub.f32 %v2188_v2, %v8478_v32  ;;  %v2278_v50 = vsub.f32 %v8484_v33, %v2277_v40 }
 0x10e   : > { %v681_v12 = vadd.f32 %v680_v31, %v645_v11  ;;  %1660 = vmatmul.f32.gmra.mxu0 %v8185_v21  ;;  %v742_v13 = vpop.f32.mrf.mxu3 }
 0x10f   : > { %v2283_v47 = vand.u32 4294901760, %v8493_v34 }
 0x110   : > { %v712_v18 = vadd.f32 %v711_v42, %v681_v12  ;;  %1691 = vmatmul.f32.gmra.mxu1 %v8192_v27  ;;  %v2221_v42 = vsel %vm606_vm0, %v583_v1, 0 }
 0x111   : > { %v2284_v48 = vsub.f32 %v8493_v34, %v2283_v47 }
 0x112   : > { %v8458_v20 = vadd.f32 %v742_v13, %v712_v18  ;;  %1845 = vmatmul.f32.vlgmr.msrb.gmra.mxu2 %v8173_v16  ;;  %v8559_v18 = vand.u32 4294901760, %v2221_v42 }
 0x113   : > { %1875 = vmatmul.f32.vlgmr.msrb.gmra.mxu3 %v8188_v22  ;;  %v8463_v54 = vpop.f32.mrf.mxu0  ;;  %2092 = vmatpush.msrb.mxu2 %v1994_v56  ;;  %v2279_v56 = vand.u32 4294901760, %v2278_v50  ;;  %v2285_v60 = vand.u32 4294901760, %v2284_v48  ;;  %v2176_v50 = vpop.permute.xlu0 %2175 }
 0x114   : > { %2121 = vmatpush.msrb.mxu3 %v8392_v51  ;;  %v8565_v36 = vsub.f32 %v2221_v42, %v8559_v18  ;;  %v2158_v48 = vpop.permute.xlu1 %2157 }
 0x115   : > { %v8469_v25 = vpop.f32.mrf.mxu1  ;;  %v827_v26 = vpop.f32.mrf.mxu2  ;;  %2096 = vmatpush.msrb.mxu2 %v2000_v59  ;;  %v2467_v59 = vand.u32 4294901760, %v8524_v52 }
 0x116   : > { %2123 = vmatpush.msrb.mxu3 %v8406_v55  ;;  %1776 = vmatmul.f32.vlgmr.msrb.gmra.mxu0 %v8205_v35  ;;  %v866_v29 = vpop.f32.mrf.mxu3 }
 0x117   : > { %v867_v30 = vadd.f32 %v866_v29, %v827_v26  ;;  %2029 = vmatpush.msrb.mxu0 %v8403_v0  ;;  %v2468_v8 = vsub.f32 %v8524_v52, %v2467_v59 }
 0x118   : > { %1815 = vmatmul.f32.vlgmr.msrb.gmra.mxu1 %v8156_v9 }
 0x119   : > { %2032 = vmatpush.msrb.mxu0 %v8415_v57  ;;  %2059 = vmatpush.msrb.mxu1 %v8392_v51  ;;  %v8519_v51 = vand.u32 4294901760, %v2189_v44  ;;  %v2469_v31 = vand.u32 4294901760, %v2468_v8 }
 0x11a   : > { %1850 = vmatmul.f32.gmra.mxu2 %v8185_v21 }
 0x11b   : > { %1881 = vmatmul.f32.gmra.mxu3 %v8192_v27  ;;  %v8490_v14 = vpop.f32.mrf.mxu0  ;;  %2061 = vmatpush.msrb.mxu1 %v8406_v55  ;;  %v8637_v8 = vpop.permute.xlu0 %2159 }
 0x11d   : > { %v8502_v37 = vpop.f32.mrf.mxu1  ;;  %v835_v38 = vpop.f32.mrf.mxu2 }
 0x11e   : > { %1784 = vmatmul.f32.gmra.mxu0 %v8224_v41  ;;  %v870_v43 = vpop.f32.mrf.mxu3 }
 0x11f   : > { %v871_v45 = vadd.f32 %v870_v43, %v835_v38 }
 0x120   : > { %1819 = vmatmul.f32.gmra.mxu1 %v8170_v15 }
 0x122   : > { %1966 = vmatmul.f32.vlgmr.msra.gmra.mxu2 %v8205_v35  ;;  %v8532_v35 = vsub.f32 %v2189_v44, %v8519_v51 }
 0x123   : > { %2005 = vmatmul.f32.vlgmr.msra.gmra.mxu3 %v8156_v9  ;;  %v896_v39 = vpop.f32.mrf.mxu0  ;;  %2312 = vmatpush.msra.mxu2 %v8484_v33 }
 0x124   : > { %2342 = vmatpush.msra.mxu3 %v8471_v28  ;;  %v897_v53 = vadd.f32 %v896_v39, %v867_v30  ;;  %v2473_v62 = vand.u32 4294901760, %v8532_v35 }
 0x125   : > { %v926_v0 = vpop.f32.mrf.mxu1  ;;  %v959_v55 = vpop.f32.mrf.mxu2  ;;  %2315 = vmatpush.msra.mxu2 %v8493_v34 }
 0x126   : > { %2344 = vmatpush.msra.mxu3 %v8478_v32  ;;  %v927_v57 = vadd.f32 %v926_v0, %v897_v53  ;;  %1908 = vmatmul.f32.vlgmr.msra.gmra.mxu0 %v8156_v9  ;;  %v986_v58 = vpop.f32.mrf.mxu3  ;;  %v2474_v10 = vsub.f32 %v8532_v35, %v2473_v62 }
 0x127   : > { %2241 = vmatpush.msra.mxu0 %v8471_v28 }
 0x128   : > { %v960_v61 = vadd.f32 %v959_v55, %v927_v57  ;;  %1935 = vmatmul.f32.vlgmr.msra.gmra.mxu1 %v8156_v9  ;;  %v2475_v13 = vand.u32 4294901760, %v2474_v10 }
 0x129   : > { %2280 = vmatpush.msra.mxu1 %v2279_v56  ;;  %2243 = vmatpush.msra.mxu0 %v8478_v32  ;;  %v2190_v56 = vsel %vm2187_vm1, %v8496_v23, %v2158_v48  ;;  %v8625_v23 = vpop.permute.xlu2 %2177 }
 0x12a   : > { %v8542_v63 = vadd.f32 %v986_v58, %v960_v61  ;;  %1974 = vmatmul.f32.gmra.mxu2 %v8224_v41 }
 0x12b   : > { %2009 = vmatmul.f32.gmra.mxu3 %v8170_v15  ;;  %v901_v6 = vpop.f32.mrf.mxu0  ;;  %2286 = vmatpush.msra.mxu1 %v2285_v60  ;;  %v8621_v60 = vand.u32 4294901760, %v2190_v56 }
 0x12c   : > { %v902_v3 = vadd.f32 %v901_v6, %v871_v45 }
 0x12d   : > { %v932_v4 = vpop.f32.mrf.mxu1  ;;  %v963_v7 = vpop.f32.mrf.mxu2 }
 0x12e   : > { %v933_v11 = vadd.f32 %v932_v4, %v902_v3  ;;  %1912 = vmatmul.f32.gmra.mxu0 %v8170_v15  ;;  %v990_v41 = vpop.f32.mrf.mxu3  ;;  %v2191_v4 = vsel %vm2187_vm1, %v2158_v48, %v8637_v8 }
 0x130   : > { %v964_v12 = vadd.f32 %v963_v7, %v933_v11  ;;  %1939 = vmatmul.f32.gmra.mxu1 %v8170_v15 }
 0x132   : > { %v8555_v17 = vadd.f32 %v990_v41, %v964_v12  ;;  %2098 = vmatmul.f32.vlgmr.msrb.gmra.mxu2 %v8156_v9  ;;  %v8654_v41 = vand.u32 4294901760, %v2191_v4 }
 0x133   : > { %2125 = vmatmul.f32.vlgmr.msrb.gmra.mxu3 %v8156_v9  ;;  %2431 = vmatpush.msrb.mxu2 %v8510_v46  ;;  %v1017_v5 = vpop.f32.mrf.mxu0  ;;  %v2224_v9 = vsel %vm606_vm0, %v584_v24, 0 }
 0x134   : > { %2470 = vmatpush.msrb.mxu3 %v2469_v31  ;;  %v8581_v33 = vand.u32 4294901760, %v2224_v9 }
 0x135   : > { %v1056_v2 = vpop.f32.mrf.mxu1  ;;  %v1086_v26 = vpop.f32.mrf.mxu2  ;;  %2433 = vmatpush.msrb.mxu2 %v8519_v51 }
 0x136   : > { %2476 = vmatpush.msrb.mxu3 %v2475_v13  ;;  %v1057_v29 = vadd.f32 %v1056_v2, %v1017_v5  ;;  %2035 = vmatmul.f32.vlgmr.msrb.gmra.mxu0 %v8173_v16  ;;  %v1116_v30 = vpop.f32.mrf.mxu3  ;;  %v8579_v16 = vand.u32 4294901760, %v8565_v36 }
 0x137   : > { %2375 = vmatpush.msrb.mxu0 %v2277_v40 }
 0x138   : > { %v1087_v38 = vadd.f32 %v1086_v26, %v1057_v29  ;;  %2065 = vmatmul.f32.vlgmr.msrb.gmra.mxu1 %v8188_v22  ;;  %v2247_v45 = vsub.f32 %v8565_v36, %v8579_v16  ;;  %v8668_v26 = vsub.f32 %v2191_v4, %v8654_v41 }
 0x139   : > { %2379 = vmatpush.msrb.mxu0 %v2283_v47  ;;  %2404 = vmatpush.msrb.mxu1 %v8471_v28  ;;  %v8588_v47 = vsub.f32 %v2224_v9, %v8581_v33 }
 0x13a   : > { %v8574_v43 = vadd.f32 %v1116_v30, %v1087_v38  ;;  %2102 = vmatmul.f32.gmra.mxu2 %v8170_v15 }
 0x13b   : > { %2129 = vmatmul.f32.gmra.mxu3 %v8170_v15  ;;  %2406 = vmatpush.msrb.mxu1 %v8478_v32  ;;  %v1025_v40 = vpop.f32.mrf.mxu0  ;;  %v8595_v32 = vand.u32 4294901760, %v2247_v45 }
 0x13d   : > { %v1060_v22 = vpop.f32.mrf.mxu1  ;;  %v1091_v44 = vpop.f32.mrf.mxu2 }
 0x13e   : > { %v1061_v34 = vadd.f32 %v1060_v22, %v1025_v40  ;;  %2040 = vmatmul.f32.gmra.mxu0 %v8185_v21  ;;  %v1122_v28 = vpop.f32.mrf.mxu3  ;;  %v8598_v21 = vand.u32 4294901760, %v8588_v47 }
 0x140   : > { %v1092_v15 = vadd.f32 %v1091_v44, %v1061_v34  ;;  %2071 = vmatmul.f32.gmra.mxu1 %v8192_v27  ;;  %v2198_v27 = vsel %vm2187_vm1, %v8456_v19, %v2176_v50  ;;  %v2255_v58 = vsub.f32 %v8588_v47, %v8598_v21  ;;  %v2853_v44 = vand.u32 4294901760, %v8668_v26 }
 0x142   : > { %v8591_v39 = vadd.f32 %v1122_v28, %v1092_v15  ;;  %2318 = vmatmul.f32.vlgmr.msra.gmra.mxu2 %v8565_v36  ;;  %v8629_v61 = vand.u32 4294901760, %v2255_v58 }
 0x143   : > { %2348 = vmatmul.f32.vlgmr.msra.gmra.mxu3 %v8579_v16  ;;  %2565 = vmatpush.msra.mxu2 %v2467_v59  ;;  %v8603_v53 = vpop.f32.mrf.mxu0  ;;  %v8617_v59 = vand.u32 4294901760, %v2198_v27 }
 0x144   : > { %2594 = vmatpush.msra.mxu3 %v8510_v46 }
 0x145   : > { %2569 = vmatpush.msra.mxu2 %v2473_v62  ;;  %v8610_v0 = vpop.f32.mrf.mxu1  ;;  %v1207_v55 = vpop.f32.mrf.mxu2  ;;  %v8632_v62 = vsub.f32 %v2198_v27, %v8617_v59  ;;  %v2854_v27 = vsub.f32 %v8668_v26, %v2853_v44 }
 0x146   : > { %2596 = vmatpush.msra.mxu3 %v8519_v51  ;;  %2249 = vmatmul.f32.vlgmr.msra.gmra.mxu0 %v8595_v32  ;;  %v1246_v57 = vpop.f32.mrf.mxu3 }
 0x147   : > { %2502 = vmatpush.msra.mxu0 %v8524_v52  ;;  %v1247_v19 = vadd.f32 %v1246_v57, %v1207_v55 }
 0x148   : > { %2288 = vmatmul.f32.vlgmr.msra.gmra.mxu1 %v8559_v18 }
 0x149   : > { %2505 = vmatpush.msra.mxu0 %v8532_v35  ;;  %2532 = vmatpush.msra.mxu1 %v8510_v46  ;;  %v2199_v46 = vsel %vm2187_vm1, %v2176_v50, %v8625_v23  ;;  %v8642_v35 = vsub.f32 %v2190_v56, %v8621_v60 }
 0x14a   : > { %2323 = vmatmul.f32.gmra.mxu2 %v8588_v47  ;;  %v8650_v10 = vand.u32 4294901760, %v2199_v46 }
 0x14b   : > { %2354 = vmatmul.f32.gmra.mxu3 %v8598_v21  ;;  %2534 = vmatpush.msra.mxu1 %v8519_v51  ;;  %v8635_v52 = vpop.f32.mrf.mxu0  ;;  %v2657_v51 = vand.u32 4294901760, %v8632_v62  ;;  %v2663_v11 = vand.u32 4294901760, %v8642_v35 }
 0x14c   : > { %v8662_v12 = vsub.f32 %v2199_v46, %v8650_v10 }
 0x14d   : > { %v8644_v6 = vpop.f32.mrf.mxu1  ;;  %v1215_v3 = vpop.f32.mrf.mxu2  ;;  %v2658_v31 = vsub.f32 %v8632_v62, %v2657_v51  ;;  %v2664_v2 = vsub.f32 %v8642_v35, %v2663_v11 }
 0x14e   : > { %2257 = vmatmul.f32.gmra.mxu0 %v8629_v61  ;;  %v1250_v1 = vpop.f32.mrf.mxu3  ;;  %v2847_v9 = vand.u32 4294901760, %v8662_v12 }
 0x14f   : > { %v1251_v7 = vadd.f32 %v1250_v1, %v1215_v3  ;;  %v2659_v38 = vand.u32 4294901760, %v2658_v31  ;;  %v2665_v22 = vand.u32 4294901760, %v2664_v2 }
 0x150   : > { %2292 = vmatmul.f32.gmra.mxu1 %v8581_v33  ;;  %v2848_v28 = vsub.f32 %v8662_v12, %v2847_v9 }
 0x152   : > { %2439 = vmatmul.f32.vlgmr.msrb.gmra.mxu2 %v8595_v32  ;;  %v2849_v57 = vand.u32 4294901760, %v2848_v28 }
 0x153   : > { %2478 = vmatmul.f32.vlgmr.msrb.gmra.mxu3 %v8559_v18  ;;  %2692 = vmatpush.msrb.mxu2 %v8632_v62  ;;  %v1276_v42 = vpop.f32.mrf.mxu0 }
 0x154   : > { %2722 = vmatpush.msrb.mxu3 %v8617_v59  ;;  %v1277_v13 = vadd.f32 %v1276_v42, %v1247_v19  ;;  %v2855_v19 = vand.u32 4294901760, %v2854_v27 }
 0x155   : > { %2695 = vmatpush.msrb.mxu2 %v8642_v35  ;;  %v1306_v5 = vpop.f32.mrf.mxu1  ;;  %v1339_v24 = vpop.f32.mrf.mxu2 }
 0x156   : > { %2724 = vmatpush.msrb.mxu3 %v8621_v60  ;;  %v1307_v29 = vadd.f32 %v1306_v5, %v1277_v13  ;;  %2381 = vmatmul.f32.vlgmr.msrb.gmra.mxu0 %v8559_v18  ;;  %v1366_v30 = vpop.f32.mrf.mxu3 }
 0x157   : > { %2621 = vmatpush.msrb.mxu0 %v8617_v59 }
 0x158   : > { %v1340_v40 = vadd.f32 %v1339_v24, %v1307_v29  ;;  %2408 = vmatmul.f32.vlgmr.msrb.gmra.mxu1 %v8559_v18  ;;  %v2162_v29 = vpop.permute.xlu2 %2161 }
 0x159   : > { %2623 = vmatpush.msrb.mxu0 %v8621_v60  ;;  %2660 = vmatpush.msrb.mxu1 %v2659_v38 }
 0x15a   : > { %v8676_v34 = vadd.f32 %v1366_v30, %v1340_v40  ;;  %2447 = vmatmul.f32.gmra.mxu2 %v8629_v61 }
 0x15b   : > { %2482 = vmatmul.f32.gmra.mxu3 %v8581_v33  ;;  %2666 = vmatpush.msrb.mxu1 %v2665_v22  ;;  %v1281_v45 = vpop.f32.mrf.mxu0  ;;  %v2192_v22 = vsel %vm2187_vm1, %v8637_v8, %v2162_v29 }
 0x15c   : > { %v1282_v15 = vadd.f32 %v1281_v45, %v1251_v7 }
 0x15d   : > { %v1312_v50 = vpop.f32.mrf.mxu1  ;;  %v1343_v48 = vpop.f32.mrf.mxu2 }
 0x15e   : > { %v1313_v55 = vadd.f32 %v1312_v50, %v1282_v15  ;;  %2385 = vmatmul.f32.gmra.mxu0 %v8581_v33  ;;  %v1370_v56 = vpop.f32.mrf.mxu3 }
 0x160   : > { %v1344_v58 = vadd.f32 %v1343_v48, %v1313_v55  ;;  %2412 = vmatmul.f32.gmra.mxu1 %v8581_v33 }
 0x162   : > { %v8684_v62 = vadd.f32 %v1370_v56, %v1344_v58  ;;  %2571 = vmatmul.f32.vlgmr.msra.gmra.mxu2 %v8559_v18 }
 0x163   : > { %2598 = vmatmul.f32.vlgmr.msra.gmra.mxu3 %v8559_v18  ;;  %2811 = vmatpush.msra.mxu2 %v8650_v10  ;;  %v1397_v46 = vpop.f32.mrf.mxu0 }
 0x164   : > { %2850 = vmatpush.msra.mxu3 %v2849_v57 }
 0x165   : > { %v1436_v35 = vpop.f32.mrf.mxu1  ;;  %v1466_v3 = vpop.f32.mrf.mxu2  ;;  %2813 = vmatpush.msra.mxu2 %v8654_v41 }
 0x166   : > { %2856 = vmatpush.msra.mxu3 %v2855_v19  ;;  %v1437_v1 = vadd.f32 %v1436_v35, %v1397_v46  ;;  %2508 = vmatmul.f32.vlgmr.msra.gmra.mxu0 %v8565_v36  ;;  %v1496_v4 = vpop.f32.mrf.mxu3 }
 0x167   : > { %2755 = vmatpush.msra.mxu0 %v2657_v51 }
 0x168   : > { %v1467_v7 = vadd.f32 %v1466_v3, %v1437_v1  ;;  %2538 = vmatmul.f32.vlgmr.msra.gmra.mxu1 %v8579_v16 }
 0x169   : > { %2759 = vmatpush.msra.mxu0 %v2663_v11  ;;  %2784 = vmatpush.msra.mxu1 %v8617_v59  ;;  %v2180_v11 = vpop.permute.xlu1 %2179 }
 0x16a   : > { %v8693_v31 = vadd.f32 %v1496_v4, %v1467_v7  ;;  %2575 = vmatmul.f32.gmra.mxu2 %v8581_v33  ;;  %v2200_v30 = vsel %vm2187_vm1, %v8625_v23, %v2180_v11  ;;  %v8719_v23 = vand.u32 4294901760, %v2192_v22 }
 0x16b   : > { %2602 = vmatmul.f32.gmra.mxu3 %v8581_v33  ;;  %2786 = vmatpush.msra.mxu1 %v8621_v60  ;;  %v1405_v42 = vpop.f32.mrf.mxu0 }
 0x16d   : > { %v1440_v13 = vpop.f32.mrf.mxu1  ;;  %v1471_v5 = vpop.f32.mrf.mxu2 }
 0x16e   : > { %v1441_v24 = vadd.f32 %v1440_v13, %v1405_v42  ;;  %2513 = vmatmul.f32.gmra.mxu0 %v8588_v47  ;;  %v1502_v51 = vpop.f32.mrf.mxu3 }
 0x170   : > { %v1472_v2 = vadd.f32 %v1471_v5, %v1441_v24  ;;  %2544 = vmatmul.f32.gmra.mxu1 %v8598_v21 }
 0x171   : > { %v8733_v15 = vpop.permute.xlu1 %2163 }
 0x172   : > { %v8700_v59 = vadd.f32 %v1502_v51, %v1472_v2  ;;  %2698 = vmatmul.f32.vlgmr.msrb.gmra.mxu2 %v8565_v36  ;;  %v2193_v55 = vsel %vm2187_vm1, %v2162_v29, %v8733_v15 }
 0x173   : > { %2728 = vmatmul.f32.vlgmr.msrb.gmra.mxu3 %v8579_v16  ;;  %2945 = vmatpush.msrb.mxu2 %v2847_v9  ;;  %v8705_v60 = vpop.f32.mrf.mxu0  ;;  %v8715_v9 = vand.u32 4294901760, %v2200_v30  ;;  %v8750_v19 = vand.u32 4294901760, %v2193_v55 }
 0x174   : > { %2974 = vmatpush.msrb.mxu3 %v8650_v10 }
 0x175   : > { %2949 = vmatpush.msrb.mxu2 %v2853_v44  ;;  %v8710_v38 = vpop.f32.mrf.mxu1  ;;  %v1587_v40 = vpop.f32.mrf.mxu2  ;;  %v8728_v8 = vsub.f32 %v2200_v30, %v8715_v9  ;;  %v8764_v13 = vsub.f32 %v2193_v55, %v8750_v19 }
 0x176   : > { %2976 = vmatpush.msrb.mxu3 %v8654_v41  ;;  %2629 = vmatmul.f32.vlgmr.msrb.gmra.mxu0 %v8595_v32  ;;  %v1626_v28 = vpop.f32.mrf.mxu3  ;;  %v8723_v44 = vpop.permute.xlu0 %2181 }
 0x177   : > { %2882 = vmatpush.msrb.mxu0 %v8662_v12  ;;  %v1627_v45 = vadd.f32 %v1626_v28, %v1587_v40  ;;  %v3233_v30 = vand.u32 4294901760, %v8764_v13 }
 0x178   : > { %2668 = vmatmul.f32.vlgmr.msrb.gmra.mxu1 %v8559_v18 }
 0x179   : > { %2885 = vmatpush.msrb.mxu0 %v8668_v26  ;;  %2912 = vmatpush.msrb.mxu1 %v8650_v10  ;;  %v2201_v26 = vsel %vm2187_vm1, %v2180_v11, %v8723_v44  ;;  %v8738_v10 = vsub.f32 %v2192_v22, %v8719_v23 }
 0x17a   : > { %2703 = vmatmul.f32.gmra.mxu2 %v8588_v47  ;;  %v8746_v57 = vand.u32 4294901760, %v2201_v26 }
 0x17b   : > { %2734 = vmatmul.f32.gmra.mxu3 %v8598_v21  ;;  %2914 = vmatpush.msrb.mxu1 %v8654_v41  ;;  %v8731_v12 = vpop.f32.mrf.mxu0  ;;  %v3037_v41 = vand.u32 4294901760, %v8728_v8  ;;  %v3043_v58 = vand.u32 4294901760, %v8738_v10 }
 0x17c   : > { %v8758_v3 = vsub.f32 %v2201_v26, %v8746_v57 }
 0x17d   : > { %v8740_v50 = vpop.f32.mrf.mxu1  ;;  %v1595_v48 = vpop.f32.mrf.mxu2  ;;  %v3038_v46 = vsub.f32 %v8728_v8, %v3037_v41  ;;  %v3044_v42 = vsub.f32 %v8738_v10, %v3043_v58 }
 0x17e   : > { %2637 = vmatmul.f32.gmra.mxu0 %v8629_v61  ;;  %v1630_v27 = vpop.f32.mrf.mxu3  ;;  %v3227_v51 = vand.u32 4294901760, %v8758_v3 }
 0x17f   : > { %v1631_v56 = vadd.f32 %v1630_v27, %v1595_v48  ;;  %v3039_v2 = vand.u32 4294901760, %v3038_v46  ;;  %v3045_v29 = vand.u32 4294901760, %v3044_v42 }
 0x180   : > { %2672 = vmatmul.f32.gmra.mxu1 %v8581_v33  ;;  %v3228_v22 = vsub.f32 %v8758_v3, %v3227_v51 }
 0x182   : > { %2819 = vmatmul.f32.vlgmr.msra.gmra.mxu2 %v8595_v32  ;;  %v3229_v55 = vand.u32 4294901760, %v3228_v22 }
 0x183   : > { %2858 = vmatmul.f32.vlgmr.msra.gmra.mxu3 %v8559_v18  ;;  %3072 = vmatpush.msra.mxu2 %v8728_v8  ;;  %v1656_v35 = vpop.f32.mrf.mxu0 }
 0x184   : > { %3102 = vmatpush.msra.mxu3 %v8715_v9  ;;  %v1657_v1 = vadd.f32 %v1656_v35, %v1627_v45 }
 0x185   : > { %3075 = vmatpush.msra.mxu2 %v8738_v10  ;;  %v1686_v4 = vpop.f32.mrf.mxu1  ;;  %v1719_v7 = vpop.f32.mrf.mxu2  ;;  %v3234_v10 = vsub.f32 %v8764_v13, %v3233_v30 }
 0x186   : > { %3104 = vmatpush.msra.mxu3 %v8719_v23  ;;  %v1687_v5 = vadd.f32 %v1686_v4, %v1657_v1  ;;  %2761 = vmatmul.f32.vlgmr.msra.gmra.mxu0 %v8559_v18  ;;  %v1746_v24 = vpop.f32.mrf.mxu3 }
 0x187   : > { %3001 = vmatpush.msra.mxu0 %v8715_v9  ;;  %v3235_v35 = vand.u32 4294901760, %v3234_v10 }
 0x188   : > { %v1720_v11 = vadd.f32 %v1719_v7, %v1687_v5  ;;  %2788 = vmatmul.f32.vlgmr.msra.gmra.mxu1 %v8559_v18 }
 0x189   : > { %3003 = vmatpush.msra.mxu0 %v8719_v23  ;;  %3040 = vmatpush.msra.mxu1 %v3039_v2 }
 0x18a   : > { %v8772_v40 = vadd.f32 %v1746_v24, %v1720_v11  ;;  %2827 = vmatmul.f32.gmra.mxu2 %v8629_v61 }
 0x18b   : > { %2862 = vmatmul.f32.gmra.mxu3 %v8581_v33  ;;  %3046 = vmatpush.msra.mxu1 %v3045_v29  ;;  %v1661_v28 = vpop.f32.mrf.mxu0 }
 0x18c   : > { %v1662_v45 = vadd.f32 %v1661_v28, %v1631_v56 }
 0x18d   : > { %v1692_v8 = vpop.f32.mrf.mxu1  ;;  %v1723_v26 = vpop.f32.mrf.mxu2 }
 0x18e   : > { %v1693_v48 = vadd.f32 %v1692_v8, %v1662_v45  ;;  %2765 = vmatmul.f32.gmra.mxu0 %v8581_v33  ;;  %v1750_v27 = vpop.f32.mrf.mxu3  ;;  %v2166_v8 = vpop.permute.xlu0 %2165 }
 0x190   : > { %v1724_v46 = vadd.f32 %v1723_v26, %v1693_v48  ;;  %2792 = vmatmul.f32.gmra.mxu1 %v8581_v33 }
 0x192   : > { %v8780_v1 = vadd.f32 %v1750_v27, %v1724_v46  ;;  %2951 = vmatmul.f32.vlgmr.msrb.gmra.mxu2 %v8559_v18  ;;  %v2194_v27 = vsel %vm2187_vm1, %v8733_v15, %v2166_v8 }
 0x193   : > { %2978 = vmatmul.f32.vlgmr.msrb.gmra.mxu3 %v8559_v18  ;;  %3191 = vmatpush.msrb.mxu2 %v8746_v57  ;;  %v1777_v56 = vpop.f32.mrf.mxu0 }
 0x194   : > { %3230 = vmatpush.msrb.mxu3 %v3229_v55 }
 0x195   : > { %v1816_v4 = vpop.f32.mrf.mxu1  ;;  %v1846_v7 = vpop.f32.mrf.mxu2  ;;  %3193 = vmatpush.msrb.mxu2 %v8750_v19 }
 0x196   : > { %3236 = vmatpush.msrb.mxu3 %v3235_v35  ;;  %v1817_v42 = vadd.f32 %v1816_v4, %v1777_v56  ;;  %2888 = vmatmul.f32.vlgmr.msrb.gmra.mxu0 %v8565_v36  ;;  %v1876_v5 = vpop.f32.mrf.mxu3 }
 0x197   : > { %3135 = vmatpush.msrb.mxu0 %v3037_v41 }
 0x198   : > { %v1847_v24 = vadd.f32 %v1846_v7, %v1817_v42  ;;  %2918 = vmatmul.f32.vlgmr.msrb.gmra.mxu1 %v8579_v16 }
 0x199   : > { %3139 = vmatpush.msrb.mxu0 %v3043_v58  ;;  %3164 = vmatpush.msrb.mxu1 %v8715_v9  ;;  %v2184_v58 = vpop.permute.xlu2 %2183 }
 0x19a   : > { %v8789_v2 = vadd.f32 %v1876_v5, %v1847_v24  ;;  %2955 = vmatmul.f32.gmra.mxu2 %v8581_v33  ;;  %v2202_v26 = vsel %vm2187_vm1, %v8723_v44, %v2184_v58  ;;  %v8815_v44 = vand.u32 4294901760, %v2194_v27 }
 0x19b   : > { %2982 = vmatmul.f32.gmra.mxu3 %v8581_v33  ;;  %3166 = vmatpush.msrb.mxu1 %v8719_v23  ;;  %v1785_v11 = vpop.f32.mrf.mxu0 }
 0x19c   : > { %v8829_v4 = vsub.f32 %v2194_v27, %v8815_v44 }
 0x19d   : > { %v1820_v29 = vpop.f32.mrf.mxu1  ;;  %v1851_v22 = vpop.f32.mrf.mxu2 }
 0x19e   : > { %v1821_v28 = vadd.f32 %v1820_v29, %v1785_v11  ;;  %2893 = vmatmul.f32.gmra.mxu0 %v8588_v47  ;;  %v1882_v41 = vpop.f32.mrf.mxu3  ;;  %v3423_v11 = vand.u32 4294901760, %v8829_v4 }
 0x1a0   : > { %v1852_v45 = vadd.f32 %v1851_v22, %v1821_v28  ;;  %2924 = vmatmul.f32.gmra.mxu1 %v8598_v21 }
 0x1a1   : > { %v2168_v35 = vpop.permute.xlu2 %2167 }
 0x1a2   : > { %v8796_v9 = vadd.f32 %v1882_v41, %v1852_v45  ;;  %3078 = vmatmul.f32.vlgmr.msra.gmra.mxu2 %v8565_v36  ;;  %v2195_v42 = vsel %vm2187_vm1, %v2166_v8, %v2168_v35 }
 0x1a3   : > { %3108 = vmatmul.f32.vlgmr.msra.gmra.mxu3 %v8579_v16  ;;  %3325 = vmatpush.msra.mxu2 %v3227_v51  ;;  %v8801_v23 = vpop.f32.mrf.mxu0  ;;  %v8811_v51 = vand.u32 4294901760, %v2202_v26  ;;  %v8840_v29 = vand.u32 4294901760, %v2195_v42 }
 0x1a4   : > { %3354 = vmatpush.msra.mxu3 %v8746_v57 }
 0x1a5   : > { %3329 = vmatpush.msra.mxu2 %v3233_v30  ;;  %v8806_v10 = vpop.f32.mrf.mxu1  ;;  %v1967_v48 = vpop.f32.mrf.mxu2  ;;  %v8822_v15 = vsub.f32 %v2202_v26, %v8811_v51  ;;  %v3424_v26 = vsub.f32 %v8829_v4, %v3423_v11 }
 0x1a6   : > { %3356 = vmatpush.msra.mxu3 %v8750_v19  ;;  %3009 = vmatmul.f32.vlgmr.msra.gmra.mxu0 %v8595_v32  ;;  %v2006_v55 = vpop.f32.mrf.mxu3  ;;  %v2186_v30 = vpop.permute.xlu1 %2185 }
 0x1a7   : > { %3262 = vmatpush.msra.mxu0 %v8758_v3  ;;  %v2007_v46 = vadd.f32 %v2006_v55, %v1967_v48  ;;  %v2203_v56 = vsel %vm2187_vm1, %v2184_v58, %v2186_v30  ;;  %v3417_v5 = vand.u32 4294901760, %v8822_v15  ;;  %v8858_v48 = vsub.f32 %v2195_v42, %v8840_v29 }
 0x1a8   : > { %3048 = vmatmul.f32.vlgmr.msra.gmra.mxu1 %v8559_v18 }
 0x1a9   : > { %3265 = vmatpush.msra.mxu0 %v8764_v13  ;;  %3292 = vmatpush.msra.mxu1 %v8746_v57  ;;  %v3418_v22 = vsub.f32 %v8822_v15, %v3417_v5 }
 0x1aa   : > { %3083 = vmatmul.f32.gmra.mxu2 %v8588_v47 }
 0x1ab   : > { %3114 = vmatmul.f32.gmra.mxu3 %v8598_v21  ;;  %3294 = vmatpush.msra.mxu1 %v8750_v19  ;;  %v8825_v3 = vpop.f32.mrf.mxu0  ;;  %v8836_v19 = vand.u32 4294901760, %v2203_v56  ;;  %v3419_v30 = vand.u32 4294901760, %v3418_v22 }
 0x1ad   : > { %v8831_v13 = vpop.f32.mrf.mxu1  ;;  %v1975_v57 = vpop.f32.mrf.mxu2  ;;  %v8850_v41 = vsub.f32 %v2203_v56, %v8836_v19  ;;  %v3425_v56 = vand.u32 4294901760, %v3424_v26  ;;  %v770_v26 = vadd.f32 %v8463_v54, %v8443_v49 }
 0x1ae   : > { %3017 = vmatmul.f32.gmra.mxu0 %v8629_v61  ;;  %v2010_v7 = vpop.f32.mrf.mxu3 }
 0x1af   : > { %v2011_v24 = vadd.f32 %v2010_v7, %v1975_v57  ;;  %v3613_v57 = vand.u32 4294901760, %v8858_v48 }
 0x1b0   : > { %3052 = vmatmul.f32.gmra.mxu1 %v8581_v33 }
 0x1b2   : > { %3199 = vmatmul.f32.vlgmr.msrb.gmra.mxu2 %v8595_v32 }
 0x1b3   : > { %3238 = vmatmul.f32.vlgmr.msrb.gmra.mxu3 %v8559_v18  ;;  %3452 = vmatpush.msrb.mxu2 %v8822_v15  ;;  %v2036_v28 = vpop.f32.mrf.mxu0 }
 0x1b4   : > { %3482 = vmatpush.msrb.mxu3 %v8811_v51  ;;  %v2037_v45 = vadd.f32 %v2036_v28, %v2007_v46  ;;  %v3607_v46 = vand.u32 4294901760, %v8850_v41 }
 0x1b5   : > { %3455 = vmatpush.msrb.mxu2 %v8829_v4  ;;  %v2066_v58 = vpop.f32.mrf.mxu1  ;;  %v2099_v8 = vpop.f32.mrf.mxu2 }
 0x1b6   : > { %3484 = vmatpush.msrb.mxu3 %v8815_v44  ;;  %v2067_v27 = vadd.f32 %v2066_v58, %v2037_v45  ;;  %3141 = vmatmul.f32.vlgmr.msrb.gmra.mxu0 %v8559_v18  ;;  %v2126_v55 = vpop.f32.mrf.mxu3  ;;  %v3608_v42 = vsub.f32 %v8850_v41, %v3607_v46 }
 0x1b7   : > { %3381 = vmatpush.msrb.mxu0 %v8811_v51 }
 0x1b8   : > { %v2100_v35 = vadd.f32 %v2099_v8, %v2067_v27  ;;  %3168 = vmatmul.f32.vlgmr.msrb.gmra.mxu1 %v8559_v18  ;;  %v3614_v8 = vsub.f32 %v8858_v48, %v3613_v57 }
 0x1b9   : > { %3383 = vmatpush.msrb.mxu0 %v8815_v44  ;;  %3420 = vmatpush.msrb.mxu1 %v3419_v30  ;;  %v3609_v30 = vand.u32 4294901760, %v3608_v42  ;;  %v774_v42 = vadd.f32 %v8490_v14, %v8458_v20 }
 0x1ba   : > { %v8866_v7 = vadd.f32 %v2126_v55, %v2100_v35  ;;  %3207 = vmatmul.f32.gmra.mxu2 %v8629_v61 }
 0x1bb   : > { %3242 = vmatmul.f32.gmra.mxu3 %v8581_v33  ;;  %3426 = vmatpush.msrb.mxu1 %v3425_v56  ;;  %v2041_v22 = vpop.f32.mrf.mxu0  ;;  %v3615_v56 = vand.u32 4294901760, %v3614_v8  ;;  %v3804_v8 = vpop.permute.xlu0 %3803 }
 0x1bc   : > { %v2042_v28 = vadd.f32 %v2041_v22, %v2011_v24  ;;  %v797_v24 = vadd.f32 %v8469_v25, %v770_v26 }
 0x1bd   : > { %v2072_v45 = vpop.f32.mrf.mxu1  ;;  %v2103_v58 = vpop.f32.mrf.mxu2 }
 0x1be   : > { %v2073_v27 = vadd.f32 %v2072_v45, %v2042_v28  ;;  %3145 = vmatmul.f32.gmra.mxu0 %v8581_v33  ;;  %v2130_v55 = vpop.f32.mrf.mxu3 }
 0x1c0   : > { %v2104_v35 = vadd.f32 %v2103_v58, %v2073_v27  ;;  %3172 = vmatmul.f32.gmra.mxu1 %v8581_v33  ;;  %v801_v27 = vadd.f32 %v8502_v37, %v774_v42  ;;  %v3786_v37 = vpop.permute.xlu2 %3785 }
 0x1c2   : > { %v8881_v22 = vadd.f32 %v2130_v55, %v2104_v35  ;;  %3331 = vmatmul.f32.vlgmr.msra.gmra.mxu2 %v8559_v18 }
 0x1c3   : > { %3358 = vmatmul.f32.vlgmr.msra.gmra.mxu3 %v8559_v18  ;;  %3571 = vmatpush.msra.mxu2 %v8836_v19  ;;  %v2250_v49 = vpop.f32.mrf.mxu0  ;;  %v3788_v35 = vpop.permute.xlu0 %3787 }
 0x1c4   : > { %3610 = vmatpush.msra.mxu3 %v3609_v30  ;;  %v2251_v54 = vadd.f32 %v2250_v49, %v797_v24  ;;  %v3822_v49 = vsel %vm3821_vm2, %v3786_v37, %v3788_v35 }
 0x1c5   : > { %v2289_v28 = vpop.f32.mrf.mxu1  ;;  %v2319_v45 = vpop.f32.mrf.mxu2  ;;  %3573 = vmatpush.msra.mxu2 %v8840_v29 }
 0x1c6   : > { %3616 = vmatpush.msra.mxu3 %v3615_v56  ;;  %v2290_v25 = vadd.f32 %v2289_v28, %v2251_v54  ;;  %3268 = vmatmul.f32.vlgmr.msra.gmra.mxu0 %v8565_v36  ;;  %v2349_v58 = vpop.f32.mrf.mxu3 }
 0x1c7   : > { %3515 = vmatpush.msra.mxu0 %v3417_v5 }
 0x1c8   : > { %v2320_v26 = vadd.f32 %v2319_v45, %v2290_v25  ;;  %3298 = vmatmul.f32.vlgmr.msra.gmra.mxu1 %v8579_v16  ;;  %v8926_v25 = vand.u32 4294901760, %v3822_v49 }
 0x1c9   : > { %3519 = vmatpush.msra.mxu0 %v3423_v11  ;;  %3544 = vmatpush.msra.mxu1 %v8811_v51  ;;  %v3806_v11 = vpop.permute.xlu1 %3805 }
 0x1ca   : > { %v8897_v55 = vadd.f32 %v2349_v58, %v2320_v26  ;;  %3335 = vmatmul.f32.gmra.mxu2 %v8581_v33  ;;  %v8944_v26 = vpop.permute.xlu2 %3789 }
 0x1cb   : > { %3362 = vmatmul.f32.gmra.mxu3 %v8581_v33  ;;  %3546 = vmatpush.msra.mxu1 %v8815_v44  ;;  %v2258_v20 = vpop.f32.mrf.mxu0  ;;  %v3830_v44 = vsel %vm3821_vm2, %v3804_v8, %v3806_v11 }
 0x1cc   : > { %v2259_v14 = vadd.f32 %v2258_v20, %v801_v27  ;;  %v8920_v45 = vand.u32 4294901760, %v3830_v44 }
 0x1cd   : > { %v2293_v15 = vpop.f32.mrf.mxu1  ;;  %v2324_v5 = vpop.f32.mrf.mxu2 }
 0x1ce   : > { %v2294_v30 = vadd.f32 %v2293_v15, %v2259_v14  ;;  %3273 = vmatmul.f32.gmra.mxu0 %v8588_v47  ;;  %v2355_v4 = vpop.f32.mrf.mxu3  ;;  %v3823_v15 = vsel %vm3821_vm2, %v3788_v35, %v8944_v26 }
 0x1d0   : > { %v2325_v51 = vadd.f32 %v2324_v5, %v2294_v30  ;;  %3304 = vmatmul.f32.gmra.mxu1 %v8598_v21 }
 0x1d1   : > { %v8934_v8 = vpop.permute.xlu1 %3807 }
 0x1d2   : > { %v8904_v56 = vadd.f32 %v2355_v4, %v2325_v51  ;;  %3458 = vmatmul.f32.vlgmr.msrb.gmra.mxu2 %v8565_v36  ;;  %v8962_v51 = vand.u32 4294901760, %v3823_v15 }
 0x1d3   : > { %3488 = vmatmul.f32.vlgmr.msrb.gmra.mxu3 %v8579_v16  ;;  %3705 = vmatpush.msrb.mxu2 %v3607_v46  ;;  %v8912_v24 = vpop.f32.mrf.mxu0 }
 0x1d4   : > { %3734 = vmatpush.msrb.mxu3 %v8836_v19 }
 0x1d5   : > { %3709 = vmatpush.msrb.mxu2 %v3613_v57  ;;  %v8918_v54 = vpop.f32.mrf.mxu1  ;;  %v2440_v28 = vpop.f32.mrf.mxu2  ;;  %v8932_v57 = vsub.f32 %v3830_v44, %v8920_v45 }
 0x1d6   : > { %3736 = vmatpush.msrb.mxu3 %v8840_v29  ;;  %v2441_v42 = vadd.f32 %v2440_v28, %v8542_v63  ;;  %3389 = vmatmul.f32.vlgmr.msrb.gmra.mxu0 %v8595_v32  ;;  %v2479_v46 = vpop.f32.mrf.mxu3  ;;  %v8979_v28 = vsub.f32 %v3823_v15, %v8962_v51 }
 0x1d7   : > { %3642 = vmatpush.msrb.mxu0 %v8850_v41  ;;  %v8942_v41 = vsub.f32 %v3822_v49, %v8926_v25  ;;  %v3911_v20 = vand.u32 4294901760, %v8932_v57 }
 0x1d8   : > { %v2480_v58 = vadd.f32 %v2479_v46, %v2441_v42  ;;  %3428 = vmatmul.f32.vlgmr.msrb.gmra.mxu1 %v8559_v18  ;;  %v4107_v15 = vand.u32 4294901760, %v8979_v28 }
 0x1d9   : > { %3645 = vmatpush.msrb.mxu0 %v8858_v48  ;;  %3672 = vmatpush.msrb.mxu1 %v8836_v19  ;;  %v3831_v19 = vsel %vm3821_vm2, %v3806_v11, %v8934_v8  ;;  %v9824_v30 = vand.u32 4294901760, %v8942_v41  ;;  %v3912_v11 = vsub.f32 %v8932_v57, %v3911_v20 }
 0x1da   : > { %3463 = vmatmul.f32.gmra.mxu2 %v8588_v47  ;;  %v8955_v5 = vand.u32 4294901760, %v3831_v19 }
 0x1db   : > { %3494 = vmatmul.f32.gmra.mxu3 %v8598_v21  ;;  %3674 = vmatpush.msrb.mxu1 %v8840_v29  ;;  %v8939_v63 = vpop.f32.mrf.mxu0  ;;  %v3918_v35 = vsub.f32 %v8942_v41, %v9824_v30  ;;  %v3913_v42 = vand.u32 4294901760, %v3912_v11 }
 0x1dc   : > { %v8971_v37 = vsub.f32 %v3831_v19, %v8955_v5 }
 0x1dd   : > { %v8948_v48 = vpop.f32.mrf.mxu1  ;;  %v2448_v27 = vpop.f32.mrf.mxu2 }
 0x1de   : > { %v2449_v14 = vadd.f32 %v2448_v27, %v8555_v17  ;;  %3397 = vmatmul.f32.gmra.mxu0 %v8629_v61  ;;  %v2483_v29 = vpop.f32.mrf.mxu3  ;;  %v7476_v27 = vld [vmem:[%s450_s17 + $0x8] sm:%s8968_s7] }
 0x1df   : > { %3819 = vrot.lane.b32.xlu1 %v7476_v27, %s7798_s24 }
 0x1e0   : > { %v2484_v4 = vadd.f32 %v2483_v29, %v2449_v14  ;;  %3432 = vmatmul.f32.gmra.mxu1 %v8581_v33  ;;  %v9823_v14 = vand.u32 4294901760, %v8971_v37 }
 0x1e2   : > { %3579 = vmatmul.f32.vlgmr.msra.gmra.mxu2 %v8595_v32 }
 0x1e3   : > { %3618 = vmatmul.f32.vlgmr.msra.gmra.mxu3 %v8559_v18  ;;  %v2509_v17 = vpop.f32.mrf.mxu0  ;;  %3946 = vmatpush.msra.mxu2 %v8932_v57 }
 0x1e4   : > { %3976 = vmatpush.msra.mxu3 %v8920_v45  ;;  %v2510_v32 = vadd.f32 %v2509_v17, %v2480_v58  ;;  %v3919_v58 = vand.u32 4294901760, %v3918_v35  ;;  %v4102_v17 = vsub.f32 %v8971_v37, %v9823_v14 }
 0x1e5   : > { %v2539_v44 = vpop.f32.mrf.mxu1  ;;  %v2572_v49 = vpop.f32.mrf.mxu2  ;;  %3949 = vmatpush.msra.mxu2 %v8942_v41 }
 0x1e6   : > { %3978 = vmatpush.msra.mxu3 %v8926_v25  ;;  %v2540_v46 = vadd.f32 %v2539_v44, %v2510_v32  ;;  %3521 = vmatmul.f32.vlgmr.msra.gmra.mxu0 %v8559_v18  ;;  %v2599_v19 = vpop.f32.mrf.mxu3  ;;  %v3747_v44 = vld [vmem:[#allocation9 + $0x20] sm:$0xff] }
 0x1e7   : > { %3875 = vmatpush.msra.mxu0 %v8920_v45  ;;  %v3855_v14 = vsel %vm606_vm0, %v3747_v44, 0 }
 0x1e8   : > { %v2573_v29 = vadd.f32 %v2572_v49, %v2540_v46  ;;  %3548 = vmatmul.f32.vlgmr.msra.gmra.mxu1 %v8559_v18  ;;  %v4108_v46 = vsub.f32 %v8979_v28, %v4107_v15 }
 0x1e9   : > { %3914 = vmatpush.msra.mxu1 %v3913_v42  ;;  %3877 = vmatpush.msra.mxu0 %v8926_v25 }
 0x1ea   : > { %v8993_v11 = vadd.f32 %v2599_v19, %v2573_v29  ;;  %3587 = vmatmul.f32.gmra.mxu2 %v8629_v61  ;;  %v1150_v19 = vadd.f32 %v8603_v53, %v8574_v43  ;;  %v4103_v29 = vand.u32 4294901760, %v4102_v17  ;;  %v9013_v43 = vand.u32 4294901760, %v3855_v14 }
 0x1eb   : > { %3622 = vmatmul.f32.gmra.mxu3 %v8581_v33  ;;  %v2514_v35 = vpop.f32.mrf.mxu0  ;;  %3920 = vmatpush.msra.mxu1 %v3919_v58 }
 0x1ec   : > { %v2515_v32 = vadd.f32 %v2514_v35, %v2484_v4  ;;  %v4109_v4 = vand.u32 4294901760, %v4108_v46  ;;  %v1177_v58 = vadd.f32 %v8610_v0, %v1150_v19  ;;  %v1154_v0 = vadd.f32 %v8635_v52, %v8591_v39 }
 0x1ed   : > { %v2545_v49 = vpop.f32.mrf.mxu1  ;;  %v2576_v42 = vpop.f32.mrf.mxu2 }
 0x1ee   : > { %v2546_v61 = vadd.f32 %v2545_v49, %v2515_v32  ;;  %3525 = vmatmul.f32.gmra.mxu0 %v8581_v33  ;;  %v2603_v27 = vpop.f32.mrf.mxu3  ;;  %v3748_v32 = vld [vmem:[#allocation9 + $0x28] sm:$0xff]  ;;  %v1181_v39 = vadd.f32 %v8644_v6, %v1154_v0 }
 0x1ef   : > { %v3858_v46 = vsel %vm606_vm0, %v3748_v32, 0 }
 0x1f0   : > { %v2577_v30 = vadd.f32 %v2576_v42, %v2546_v61  ;;  %3552 = vmatmul.f32.gmra.mxu1 %v8581_v33  ;;  %v9021_v42 = vsub.f32 %v3855_v14, %v9013_v43  ;;  %v9880_v61 = vand.u32 4294901760, %v8942_v41  ;;  %v9038_v57 = vand.u32 4294901760, %v3858_v46 }
 0x1f2   : > { %v9009_v35 = vadd.f32 %v2603_v27, %v2577_v30  ;;  %3711 = vmatmul.f32.vlgmr.msrb.gmra.mxu2 %v8559_v18  ;;  %v9036_v52 = vand.u32 4294901760, %v9021_v42 }
 0x1f3   : > { %3738 = vmatmul.f32.vlgmr.msrb.gmra.mxu3 %v8559_v18  ;;  %4065 = vmatpush.msrb.mxu2 %v8955_v5  ;;  %v2630_v53 = vpop.f32.mrf.mxu0 }
 0x1f4   : > { %4104 = vmatpush.msrb.mxu3 %v4103_v29  ;;  %v2631_v17 = vadd.f32 %v2630_v53, %v1177_v58  ;;  %v3881_v27 = vsub.f32 %v9021_v42, %v9036_v52  ;;  %v3792_v53 = vpop.permute.xlu1 %3791 }
 0x1f5   : > { %v2669_v44 = vpop.f32.mrf.mxu1  ;;  %v2699_v49 = vpop.f32.mrf.mxu2  ;;  %4067 = vmatpush.msrb.mxu2 %v8962_v51  ;;  %v3824_v0 = vsel %vm3821_vm2, %v8944_v26, %v3792_v53 }
 0x1f6   : > { %4110 = vmatpush.msrb.mxu3 %v4109_v4  ;;  %v2670_v30 = vadd.f32 %v2669_v44, %v2631_v17  ;;  %3648 = vmatmul.f32.vlgmr.msrb.gmra.mxu0 %v8565_v36  ;;  %v2729_v18 = vpop.f32.mrf.mxu3  ;;  %v3810_v4 = vpop.permute.xlu0 %3809  ;;  %v9881_v17 = vand.u32 4294901760, %v8971_v37  ;;  %v9085_v26 = vand.u32 4294901760, %v3824_v0 }
 0x1f7   : > { %4009 = vmatpush.msrb.mxu0 %v3911_v20 }
 0x1f8   : > { %v2700_v19 = vadd.f32 %v2699_v49, %v2670_v30  ;;  %3678 = vmatmul.f32.vlgmr.msrb.gmra.mxu1 %v8579_v16 }
 0x1f9   : > { %4038 = vmatpush.msrb.mxu1 %v8920_v45  ;;  %4013 = vmatpush.msrb.mxu0 %v9880_v61 }
 0x1fa   : > { %v9031_v36 = vadd.f32 %v2729_v18, %v2700_v19  ;;  %3715 = vmatmul.f32.gmra.mxu2 %v8581_v33  ;;  %v5396_v19 = vld [vmem:[%s9882_s28] sm:$0xff]  ;;  %s7288_s28 = sshll.u32 %s7074_s20, 3 }
 0x1fb   : > { %3742 = vmatmul.f32.gmra.mxu3 %v8581_v33  ;;  %4040 = vmatpush.msrb.mxu1 %v8926_v25  ;;  %v2638_v16 = vpop.f32.mrf.mxu0  ;;  %v9045_v33 = vsub.f32 %v3858_v46, %v9038_v57  ;;  %v9052_v25 = vand.u32 4294901760, %v3881_v27  ;;  %s7076_s4 = scalar_lea.hbm %s9892_s30, %s7288_s28 }
 0x1fc   : > { %v2639_v45 = vadd.f32 %v2638_v16, %v1181_v39  ;;  %v9089_v39 = vpop.permute.xlu2 %3811  ;;  %s7079_s16 = sshll.u32 %s7076_s4, 4  ;;  %s7080_s16 = int_to_ptr.hbm [resolvable:$true] %s7079_s16 }
 0x1fd   : > { %v2673_v20 = vpop.f32.mrf.mxu1  ;;  %v2704_v41 = vpop.f32.mrf.mxu2 }
 0x1fe   : > { %v2674_v14 = vadd.f32 %v2673_v20, %v2639_v45  ;;  %3653 = vmatmul.f32.gmra.mxu0 %v8588_v47  ;;  %v2735_v6 = vpop.f32.mrf.mxu3  ;;  %v9055_v47 = vand.u32 4294901760, %v9045_v33  ;;  %v9101_v20 = vpop.permute.xlu0 %3793 }
 0x1ff   : > { %v3825_v27 = vsel %vm3821_vm2, %v3792_v53, %v9101_v20 }
 0x200   : > { %v2705_v29 = vadd.f32 %v2704_v41, %v2674_v14  ;;  %3684 = vmatmul.f32.gmra.mxu1 %v8598_v21  ;;  %v3832_v21 = vsel %vm3821_vm2, %v8934_v8, %v3810_v4  ;;  %v3889_v8 = vsub.f32 %v9045_v33, %v9055_v47 }
 0x201   : > { %v9075_v46 = vand.u32 4294901760, %v3832_v21 }
 0x202   : > { %v9048_v58 = vadd.f32 %v2735_v6, %v2705_v29  ;;  %3952 = vmatmul.f32.vlgmr.msra.gmra.mxu2 %v9021_v42 }
 0x203   : > { %3982 = vmatmul.f32.vlgmr.msra.gmra.mxu3 %v9036_v52  ;;  %4199 = vmatpush.msra.mxu2 %v9881_v17  ;;  %v9060_v32 = vpop.f32.mrf.mxu0  ;;  %v9096_v16 = vsub.f32 %v3832_v21, %v9075_v46 }
 0x204   : > { %4228 = vmatpush.msra.mxu3 %v8955_v5 }
 0x205   : > { %4203 = vmatpush.msra.mxu2 %v4107_v15  ;;  %v9067_v44 = vpop.f32.mrf.mxu1  ;;  %v2820_v49 = vpop.f32.mrf.mxu2  ;;  %v7799_v15 = vmov 0   ;;  %v4291_v29 = vand.u32 4294901760, %v9096_v16 }
 0x206   : > { %4230 = vmatpush.msra.mxu3 %v8962_v51  ;;  %v2821_v30 = vadd.f32 %v2820_v49, %v8676_v34  ;;  %3883 = vmatmul.f32.vlgmr.msra.gmra.mxu0 %v9052_v25  ;;  %v2859_v18 = vpop.f32.mrf.mxu3  ;;  %v7479_v34 = vld [vmem:[%s450_s17] sm:%s8968_s7]  ;;  %v9123_v49 = vand.u32 4294901760, %v3825_v27  ;;  %s7284_s17 = sshll.u32 %s523_s13, 4  ;;  %s7644_s13 = sshra.s32 %s7080_s16, 4  ;;  %s7645_s13 = int_to_ptr.hbm [resolvable:$true] %s7644_s13 }
 0x207   : > { %4136 = vmatpush.msra.mxu0 %v8971_v37  ;;  %7466 = vset.pattern.permute.xlu1 %v7799_v15  ;;  %v9093_v37 = vand.u32 4294901760, %v3889_v8  ;;  %v4292_v53 = vsub.f32 %v9096_v16, %v4291_v29  ;;  %s527_s15 = sadd.s32 %s7284_s17, %s525_s25  ;;  %s7646_s25 = scalar_lea.hbm %s7645_s13, 128 }
 0x208   : > { %v2860_v61 = vadd.f32 %v2859_v18, %v2821_v30  ;;  %3922 = vmatmul.f32.vlgmr.msra.gmra.mxu1 %v9013_v43  ;;  %5400 = vperm.xlu1 %7466, %v5396_v19   ;;  %p7647_p11 = scmp.ne.s32.totalorder %s7645_s13, %s7646_s25  ;;  %p7651_p6 = scmp.lt.s32.totalorder %s7645_s13, %s9893_s2 }
 0x209   : > { %4139 = vmatpush.msra.mxu0 %v8979_v28  ;;  %4166 = vmatpush.msra.mxu1 %v8955_v5  ;;  %v3833_v5 = vsel %vm3821_vm2, %v3810_v4, %v9089_v39  ;;  %v9107_v28 = vsub.f32 %v3824_v0, %v9085_v26  ;;  %v5397_v4 = vld [vmem:[%s9883_s0 + $0x8] sm:$0xff]  ;;  %p7652_p0 = scmp.lt.s32.totalorder %s7650_s19, %s7646_s25 }
 0x20a   : > { %3957 = vmatmul.f32.gmra.mxu2 %v9045_v33  ;;  %3801 = vrot.lane.b32.xlu2 %v7479_v34, %s7798_s24  ;;  %v9116_v17 = vand.u32 4294901760, %v3833_v5  ;;  %v9141_v34 = vsub.f32 %v3825_v27, %v9123_v49  ;;  %s9891_s24 = sld [smem:[#allocation36_spill]]  ;;  %p7648_p12 = pnand %p7647_p11, %p8039_p9 }
 0x20b   : > { %3988 = vmatmul.f32.gmra.mxu3 %v9055_v47  ;;  %4168 = vmatpush.msra.mxu1 %v8962_v51  ;;  %v9099_v45 = vpop.f32.mrf.mxu0  ;;  %p7653_p2 = por %p7652_p0, %p7651_p6 }
 0x20c   : > { %7465 = vset.pattern.permute.xlu0 %v7799_v15  ;;  %7467 = vset.pattern.permute.xlu2 %v7799_v15  ;;  %v9133_v30 = vsub.f32 %v3833_v5, %v9116_v17  ;;  %v4293_v5 = vand.u32 4294901760, %v4292_v53  ;;  %p7649_p3 = pneg %p7648_p12 }
 0x20d   : > { %v9109_v41 = vpop.f32.mrf.mxu1  ;;  %v2828_v14 = vpop.f32.mrf.mxu2  ;;  %5405 = vperm.xlu0 %7465, %v5397_v4  }
 0x20e   : > { %v2829_v6 = vadd.f32 %v2828_v14, %v8684_v62  ;;  %3891 = vmatmul.f32.gmra.mxu0 %v9093_v37  ;;  %v2863_v51 = vpop.f32.mrf.mxu3  ;;  %v9826_v62 = vand.u32 4294901760, %v9107_v28  ;;  %p7654_p8 = pnand %p7653_p2, %p7649_p3 }
 0x210   : > { %v2864_v21 = vadd.f32 %v2863_v51, %v2829_v6  ;;  %3926 = vmatmul.f32.gmra.mxu1 %v9038_v57  ;;  %v4298_v19 = vsub.f32 %v9107_v28, %v9826_v62  ;;  %s528_s7 = scalar_lea.vmem %s9891_s24, %s527_s15 }
 0x212   : > { %4073 = vmatmul.f32.vlgmr.msrb.gmra.mxu2 %v9052_v25  ;;  %v4299_v4 = vand.u32 4294901760, %v4298_v19 }
 0x213   : > { %4112 = vmatmul.f32.vlgmr.msrb.gmra.mxu3 %v9013_v43  ;;  %4326 = vmatpush.msrb.mxu2 %v9096_v16  ;;  %v2889_v0 = vpop.f32.mrf.mxu0 }
 0x214   : > { %4356 = vmatpush.msrb.mxu3 %v9075_v46  ;;  %v2890_v18 = vadd.f32 %v2889_v0, %v2860_v61  ;;  %v9825_v61 = vand.u32 4294901760, %v9133_v30  ;;  %v9827_v0 = vand.u32 4294901760, %v9141_v34 }
 0x215   : > { %4329 = vmatpush.msrb.mxu2 %v9107_v28  ;;  %v2919_v8 = vpop.f32.mrf.mxu1  ;;  %v2952_v15 = vpop.f32.mrf.mxu2 }
 0x216   : > { %4358 = vmatpush.msrb.mxu3 %v9085_v26  ;;  %v2920_v14 = vadd.f32 %v2919_v8, %v2890_v18  ;;  %4015 = vmatmul.f32.vlgmr.msrb.gmra.mxu0 %v9013_v43  ;;  %v2979_v6 = vpop.f32.mrf.mxu3  ;;  %v4482_v18 = vsub.f32 %v9133_v30, %v9825_v61  ;;  %v4488_v19 = vsub.f32 %v9141_v34, %v9827_v0  ;;  %v5443_v61 = vld [vmem:[%s9884_s22 + $0x8] sm:$0xff] }
 0x217   : > { %4255 = vmatpush.msrb.mxu0 %v9075_v46  ;;  %5451 = vperm.xlu1 %7466, %v5443_v61   ;;  %v1534_v61 = vadd.f32 %v8731_v12, %v8700_v59 }
 0x218   : > { %v2953_v51 = vadd.f32 %v2952_v15, %v2920_v14  ;;  %4042 = vmatmul.f32.vlgmr.msrb.gmra.mxu1 %v9013_v43 }
 0x219   : > { %4257 = vmatpush.msrb.mxu0 %v9085_v26  ;;  %4294 = vmatpush.msrb.mxu1 %v4293_v5 }
 0x21a   : > { %v9149_v27 = vadd.f32 %v2979_v6, %v2953_v51  ;;  %4081 = vmatmul.f32.gmra.mxu2 %v9093_v37  ;;  %v1530_v6 = vadd.f32 %v8705_v60, %v8693_v31 }
 0x21b   : > { %4116 = vmatmul.f32.gmra.mxu3 %v9038_v57  ;;  %4300 = vmatpush.msrb.mxu1 %v4299_v4  ;;  %v2894_v53 = vpop.f32.mrf.mxu0  ;;  %v4483_v4 = vand.u32 4294901760, %v4482_v18 }
 0x21c   : > { %v2895_v8 = vadd.f32 %v2894_v53, %v2864_v21  ;;  %v4489_v53 = vand.u32 4294901760, %v4488_v19  ;;  %v1557_v62 = vadd.f32 %v8710_v38, %v1530_v6  ;;  %v1561_v19 = vadd.f32 %v8740_v50, %v1534_v61  ;;  %v3814_v50 = vpop.permute.xlu1 %3813 }
 0x21d   : > { %v2925_v15 = vpop.f32.mrf.mxu1  ;;  %v2956_v14 = vpop.f32.mrf.mxu2 }
 0x21e   : > { %v2926_v5 = vadd.f32 %v2925_v15, %v2895_v8  ;;  %4019 = vmatmul.f32.gmra.mxu0 %v9038_v57  ;;  %v2983_v51 = vpop.f32.mrf.mxu3 }
 0x220   : > { %v2957_v21 = vadd.f32 %v2956_v14, %v2926_v5  ;;  %4046 = vmatmul.f32.gmra.mxu1 %v9038_v57 }
 0x222   : > { %v9167_v0 = vadd.f32 %v2983_v51, %v2957_v21  ;;  %4205 = vmatmul.f32.vlgmr.msra.gmra.mxu2 %v9013_v43 }
 0x223   : > { %4232 = vmatmul.f32.vlgmr.msra.gmra.mxu3 %v9013_v43  ;;  %4445 = vmatpush.msra.mxu2 %v9116_v17  ;;  %v3010_v31 = vpop.f32.mrf.mxu0 }
 0x224   : > { %4484 = vmatpush.msra.mxu3 %v4483_v4  ;;  %v3011_v60 = vadd.f32 %v3010_v31, %v1557_v62  ;;  %v9885_v62 = vand.u32 4294901760, %v9107_v28  ;;  %v3796_v4 = vpop.permute.xlu2 %3795  ;;  %v9887_v31 = vand.u32 4294901760, %v9141_v34 }
 0x225   : > { %v3049_v8 = vpop.f32.mrf.mxu1  ;;  %v3079_v18 = vpop.f32.mrf.mxu2  ;;  %4447 = vmatpush.msra.mxu2 %v9123_v49 }
 0x226   : > { %4490 = vmatpush.msra.mxu3 %v4489_v53  ;;  %v3050_v38 = vadd.f32 %v3049_v8, %v3011_v60  ;;  %4142 = vmatmul.f32.vlgmr.msra.gmra.mxu0 %v9021_v42  ;;  %v3109_v15 = vpop.f32.mrf.mxu3  ;;  %v3834_v53 = vsel %vm3821_vm2, %v9089_v39, %v3814_v50 }
 0x227   : > { %4389 = vmatpush.msra.mxu0 %v4291_v29 }
 0x228   : > { %v3080_v14 = vadd.f32 %v3079_v18, %v3050_v38  ;;  %4172 = vmatmul.f32.vlgmr.msra.gmra.mxu1 %v9036_v52  ;;  %v3826_v18 = vsel %vm3821_vm2, %v9101_v20, %v3796_v4 }
 0x229   : > { %4393 = vmatpush.msra.mxu0 %v9885_v62  ;;  %4418 = vmatpush.msra.mxu1 %v9075_v46  ;;  %v9218_v62 = vpop.permute.xlu0 %3815 }
 0x22a   : > { %v9183_v6 = vadd.f32 %v3109_v15, %v3080_v14  ;;  %4209 = vmatmul.f32.gmra.mxu2 %v9038_v57  ;;  %v9210_v15 = vand.u32 4294901760, %v3834_v53  ;;  %v9214_v14 = vand.u32 4294901760, %v3826_v18 }
 0x22b   : > { %4236 = vmatmul.f32.gmra.mxu3 %v9038_v57  ;;  %4420 = vmatpush.msra.mxu1 %v9085_v26  ;;  %v3018_v59 = vpop.f32.mrf.mxu0  ;;  %v9886_v26 = vand.u32 4294901760, %v9133_v30 }
 0x22c   : > { %v3019_v12 = vadd.f32 %v3018_v59, %v1561_v19 }
 0x22d   : > { %v3053_v16 = vpop.f32.mrf.mxu1  ;;  %v3084_v29 = vpop.f32.mrf.mxu2 }
 0x22e   : > { %v3054_v5 = vadd.f32 %v3053_v16, %v3019_v12  ;;  %4147 = vmatmul.f32.gmra.mxu0 %v9045_v33  ;;  %v3115_v28 = vpop.f32.mrf.mxu3 }
 0x230   : > { %v3085_v51 = vadd.f32 %v3084_v29, %v3054_v5  ;;  %4178 = vmatmul.f32.gmra.mxu1 %v9055_v47 }
 0x232   : > { %v9190_v46 = vadd.f32 %v3115_v28, %v3085_v51  ;;  %4332 = vmatmul.f32.vlgmr.msrb.gmra.mxu2 %v9021_v42 }
 0x233   : > { %4362 = vmatmul.f32.vlgmr.msrb.gmra.mxu3 %v9036_v52  ;;  %4579 = vmatpush.msrb.mxu2 %v9886_v26  ;;  %v9197_v21 = vpop.f32.mrf.mxu0 }
 0x234   : > { %4608 = vmatpush.msrb.mxu3 %v9116_v17 }
 0x235   : > { %4583 = vmatpush.msrb.mxu2 %v9887_v31  ;;  %v9204_v60 = vpop.f32.mrf.mxu1  ;;  %v3200_v8 = vpop.f32.mrf.mxu2 }
 0x236   : > { %4610 = vmatpush.msrb.mxu3 %v9123_v49  ;;  %v3201_v61 = vadd.f32 %v3200_v8, %v8772_v40  ;;  %4263 = vmatmul.f32.vlgmr.msrb.gmra.mxu0 %v9052_v25  ;;  %v3239_v38 = vpop.f32.mrf.mxu3  ;;  %v9223_v40 = vsub.f32 %v3834_v53, %v9210_v15 }
 0x237   : > { %4516 = vmatpush.msrb.mxu0 %v9133_v30  ;;  %v9228_v30 = vpop.permute.xlu1 %3797 }
 0x238   : > { %v3240_v39 = vadd.f32 %v3239_v38, %v3201_v61  ;;  %4302 = vmatmul.f32.vlgmr.msrb.gmra.mxu1 %v9013_v43  ;;  %v9829_v29 = vand.u32 4294901760, %v9223_v40 }
 0x239   : > { %4519 = vmatpush.msrb.mxu0 %v9141_v34  ;;  %4546 = vmatpush.msrb.mxu1 %v9116_v17  ;;  %v3835_v34 = vsel %vm3821_vm2, %v3814_v50, %v9218_v62  ;;  %v9233_v17 = vsub.f32 %v3826_v18, %v9214_v14 }
 0x23a   : > { %4337 = vmatmul.f32.gmra.mxu2 %v9045_v33  ;;  %v9242_v5 = vand.u32 4294901760, %v3835_v34 }
 0x23b   : > { %4368 = vmatmul.f32.gmra.mxu3 %v9055_v47  ;;  %4548 = vmatpush.msrb.mxu1 %v9123_v49  ;;  %v9226_v20 = vpop.f32.mrf.mxu0  ;;  %v3827_v49 = vsel %vm3821_vm2, %v3796_v4, %v9228_v30  ;;  %v9828_v51 = vand.u32 4294901760, %v9233_v17 }
 0x23c   : > { %v9246_v50 = vand.u32 4294901760, %v3827_v49  ;;  %v9256_v26 = vsub.f32 %v3835_v34, %v9242_v5 }
 0x23d   : > { %v9235_v19 = vpop.f32.mrf.mxu1  ;;  %v3208_v59 = vpop.f32.mrf.mxu2  ;;  %v4678_v18 = vsub.f32 %v9233_v17, %v9828_v51 }
 0x23e   : > { %v3209_v12 = vadd.f32 %v3208_v59, %v8780_v1  ;;  %4271 = vmatmul.f32.gmra.mxu0 %v9093_v37  ;;  %v3243_v16 = vpop.f32.mrf.mxu3  ;;  %v4672_v1 = vsub.f32 %v9223_v40, %v9829_v29  ;;  %v9264_v61 = vsub.f32 %v3827_v49, %v9246_v50 }
 0x240   : > { %v3244_v28 = vadd.f32 %v3243_v16, %v3209_v12  ;;  %4306 = vmatmul.f32.gmra.mxu1 %v9038_v57  ;;  %v4673_v34 = vand.u32 4294901760, %v4672_v1  ;;  %v4679_v16 = vand.u32 4294901760, %v4678_v18 }
 0x242   : > { %4453 = vmatmul.f32.vlgmr.msra.gmra.mxu2 %v9052_v25 }
 0x243   : > { %4492 = vmatmul.f32.vlgmr.msra.gmra.mxu3 %v9013_v43  ;;  %4706 = vmatpush.msra.mxu2 %v9223_v40  ;;  %v3269_v4 = vpop.f32.mrf.mxu0 }
 0x244   : > { %4736 = vmatpush.msra.mxu3 %v9210_v15  ;;  %v3270_v53 = vadd.f32 %v3269_v4, %v3240_v39  ;;  %v4861_v39 = vand.u32 4294901760, %v9256_v26  ;;  %v4867_v4 = vand.u32 4294901760, %v9264_v61 }
 0x245   : > { %4709 = vmatpush.msra.mxu2 %v9233_v17  ;;  %v3299_v31 = vpop.f32.mrf.mxu1  ;;  %v3332_v8 = vpop.f32.mrf.mxu2 }
 0x246   : > { %4738 = vmatpush.msra.mxu3 %v9214_v14  ;;  %v3300_v38 = vadd.f32 %v3299_v31, %v3270_v53  ;;  %4395 = vmatmul.f32.vlgmr.msra.gmra.mxu0 %v9013_v43  ;;  %v3359_v59 = vpop.f32.mrf.mxu3  ;;  %v4862_v53 = vsub.f32 %v9256_v26, %v4861_v39  ;;  %v4868_v18 = vsub.f32 %v9264_v61, %v4867_v4 }
 0x247   : > { %4635 = vmatpush.msra.mxu0 %v9210_v15 }
 0x248   : > { %v3333_v12 = vadd.f32 %v3332_v8, %v3300_v38  ;;  %4422 = vmatmul.f32.vlgmr.msra.gmra.mxu1 %v9013_v43  ;;  %v4863_v51 = vand.u32 4294901760, %v4862_v53  ;;  %v1914_v53 = vadd.f32 %v8825_v3, %v8796_v9 }
 0x249   : > { %4637 = vmatpush.msra.mxu0 %v9214_v14  ;;  %4674 = vmatpush.msra.mxu1 %v4673_v34 }
 0x24a   : > { %v9272_v49 = vadd.f32 %v3359_v59, %v3333_v12  ;;  %4461 = vmatmul.f32.gmra.mxu2 %v9093_v37  ;;  %v1910_v59 = vadd.f32 %v8801_v23, %v8789_v2 }
 0x24b   : > { %4496 = vmatmul.f32.gmra.mxu3 %v9038_v57  ;;  %4680 = vmatpush.msra.mxu1 %v4679_v16  ;;  %v3274_v1 = vpop.f32.mrf.mxu0  ;;  %v4869_v16 = vand.u32 4294901760, %v4868_v18 }
 0x24c   : > { %v3275_v31 = vadd.f32 %v3274_v1, %v3244_v28  ;;  %v1937_v28 = vadd.f32 %v8806_v10, %v1910_v59  ;;  %v1941_v59 = vadd.f32 %v8831_v13, %v1914_v53  ;;  %v3818_v13 = vpop.permute.xlu2 %3817 }
 0x24d   : > { %v3305_v8 = vpop.f32.mrf.mxu1  ;;  %v3336_v38 = vpop.f32.mrf.mxu2 }
 0x24e   : > { %v3306_v34 = vadd.f32 %v3305_v8, %v3275_v31  ;;  %4399 = vmatmul.f32.gmra.mxu0 %v9038_v57  ;;  %v3363_v12 = vpop.f32.mrf.mxu3 }
 0x250   : > { %v3337_v29 = vadd.f32 %v3336_v38, %v3306_v34  ;;  %4426 = vmatmul.f32.gmra.mxu1 %v9038_v57  ;;  %v9888_v38 = vand.u32 4294901760, %v9223_v40 }
 0x252   : > { %v9287_v1 = vadd.f32 %v3363_v12, %v3337_v29  ;;  %4585 = vmatmul.f32.vlgmr.msrb.gmra.mxu2 %v9013_v43 }
 0x253   : > { %4612 = vmatmul.f32.vlgmr.msrb.gmra.mxu3 %v9013_v43  ;;  %4825 = vmatpush.msrb.mxu2 %v9242_v5  ;;  %v3390_v2 = vpop.f32.mrf.mxu0 }
 0x254   : > { %4864 = vmatpush.msrb.mxu3 %v4863_v51  ;;  %v3391_v23 = vadd.f32 %v3390_v2, %v1937_v28  ;;  %v9889_v51 = vand.u32 4294901760, %v9233_v17  ;;  %v3800_v2 = vpop.permute.xlu0 %3799 }
 0x255   : > { %v3429_v31 = vpop.f32.mrf.mxu1  ;;  %v3459_v8 = vpop.f32.mrf.mxu2  ;;  %4827 = vmatpush.msrb.mxu2 %v9246_v50  ;;  %v3828_v53 = vsel %vm3821_vm2, %v9228_v30, %v3800_v2 }
 0x256   : > { %4870 = vmatpush.msrb.mxu3 %v4869_v16  ;;  %v3430_v10 = vadd.f32 %v3429_v31, %v3391_v23  ;;  %4522 = vmatmul.f32.vlgmr.msrb.gmra.mxu0 %v9021_v42  ;;  %v3489_v29 = vpop.f32.mrf.mxu3  ;;  %v3836_v23 = vsel %vm3821_vm2, %v9218_v62, %v3818_v13 }
 0x257   : > { %4769 = vmatpush.msrb.mxu0 %v9888_v38  ;;  %v3820_v38 = vpop.permute.xlu1 %3819 }
 0x258   : > { %v3460_v18 = vadd.f32 %v3459_v8, %v3430_v10  ;;  %4552 = vmatmul.f32.vlgmr.msrb.gmra.mxu1 %v9036_v52 }
 0x259   : > { %4773 = vmatpush.msrb.mxu0 %v9889_v51  ;;  %4798 = vmatpush.msrb.mxu1 %v9210_v15 }
 0x25a   : > { %v9303_v34 = vadd.f32 %v3489_v29, %v3460_v18  ;;  %4589 = vmatmul.f32.gmra.mxu2 %v9038_v57  ;;  %v9330_v29 = vand.u32 4294901760, %v3836_v23  ;;  %v3837_v18 = vsel %vm3821_vm2, %v3818_v13, %v3820_v38 }
 0x25b   : > { %4616 = vmatmul.f32.gmra.mxu3 %v9038_v57  ;;  %4800 = vmatpush.msrb.mxu1 %v9214_v14  ;;  %v3398_v9 = vpop.f32.mrf.mxu0 }
 0x25c   : > { %v3399_v3 = vadd.f32 %v3398_v9, %v1941_v59 }
 0x25d   : > { %v3433_v40 = vpop.f32.mrf.mxu1  ;;  %v3464_v12 = vpop.f32.mrf.mxu2 }
 0x25e   : > { %v3434_v16 = vadd.f32 %v3433_v40, %v3399_v3  ;;  %4527 = vmatmul.f32.gmra.mxu0 %v9045_v33  ;;  %v3495_v17 = vpop.f32.mrf.mxu3  ;;  %v9356_v40 = vand.u32 4294901760, %v3837_v18 }
 0x260   : > { %v3465_v28 = vadd.f32 %v3464_v12, %v3434_v16  ;;  %4558 = vmatmul.f32.gmra.mxu1 %v9055_v47  ;;  %v9368_v13 = vsub.f32 %v3837_v18, %v9356_v40 }
 0x262   : > { %v9310_v15 = vadd.f32 %v3495_v17, %v3465_v28  ;;  %4712 = vmatmul.f32.vlgmr.msra.gmra.mxu2 %v9021_v42 }
 0x263   : > { %4742 = vmatmul.f32.vlgmr.msra.gmra.mxu3 %v9036_v52  ;;  %4959 = vmatpush.msra.mxu2 %v4861_v39  ;;  %v9317_v14 = vpop.f32.mrf.mxu0 }
 0x264   : > { %4988 = vmatpush.msra.mxu3 %v9242_v5 }
 0x265   : > { %4963 = vmatpush.msra.mxu2 %v4867_v4  ;;  %v9324_v31 = vpop.f32.mrf.mxu1  ;;  %v3580_v8 = vpop.f32.mrf.mxu2  ;;  %v9334_v4 = vand.u32 4294901760, %v3828_v53 }
 0x266   : > { %4990 = vmatpush.msra.mxu3 %v9246_v50  ;;  %v3581_v39 = vadd.f32 %v3580_v8, %v8866_v7  ;;  %4643 = vmatmul.f32.vlgmr.msra.gmra.mxu0 %v9052_v25  ;;  %v3619_v10 = vpop.f32.mrf.mxu3  ;;  %v9341_v7 = vsub.f32 %v3836_v23, %v9330_v29 }
 0x267   : > { %4896 = vmatpush.msra.mxu0 %v9256_v26  ;;  %v3802_v26 = vpop.permute.xlu2 %3801  ;;  %v9348_v51 = vsub.f32 %v3828_v53, %v9334_v4 }
 0x268   : > { %v3620_v62 = vadd.f32 %v3619_v10, %v3581_v39  ;;  %4682 = vmatmul.f32.vlgmr.msra.gmra.mxu1 %v9013_v43  ;;  %v3829_v3 = vsel %vm3821_vm2, %v3800_v2, %v3802_v26 }
 0x269   : > { %4899 = vmatpush.msra.mxu0 %v9264_v61  ;;  %4926 = vmatpush.msra.mxu1 %v9242_v5  ;;  %v5057_v16 = vand.u32 4294901760, %v9348_v51  ;;  %v9360_v17 = vand.u32 4294901760, %v3829_v3 }
 0x26a   : > { %4717 = vmatmul.f32.gmra.mxu2 %v9045_v33 }
 0x26b   : > { %4748 = vmatmul.f32.gmra.mxu3 %v9055_v47  ;;  %4928 = vmatpush.msra.mxu1 %v9246_v50  ;;  %v9344_v30 = vpop.f32.mrf.mxu0  ;;  %v5051_v50 = vand.u32 4294901760, %v9341_v7  ;;  %v5058_v53 = vsub.f32 %v9348_v51, %v5057_v16  ;;  %v9374_v39 = vsub.f32 %v3829_v3, %v9360_v17 }
 0x26d   : > { %v9350_v61 = vpop.f32.mrf.mxu1  ;;  %v3588_v5 = vpop.f32.mrf.mxu2  ;;  %v5059_v18 = vand.u32 4294901760, %v5058_v53 }
 0x26e   : > { %v3589_v59 = vadd.f32 %v3588_v5, %v8881_v22  ;;  %4651 = vmatmul.f32.gmra.mxu0 %v9093_v37  ;;  %v3623_v9 = vpop.f32.mrf.mxu3  ;;  %v5052_v22 = vsub.f32 %v9341_v7, %v5051_v50 }
 0x270   : > { %v3624_v12 = vadd.f32 %v3623_v9, %v3589_v59  ;;  %4686 = vmatmul.f32.gmra.mxu1 %v9038_v57 }
 0x272   : > { %4833 = vmatmul.f32.vlgmr.msrb.gmra.mxu2 %v9052_v25 }
 0x273   : > { %4872 = vmatmul.f32.vlgmr.msrb.gmra.mxu3 %v9013_v43  ;;  %5086 = vmatpush.msrb.mxu2 %v9341_v7  ;;  %v3649_v28 = vpop.f32.mrf.mxu0  ;;  %v5241_v7 = vand.u32 4294901760, %v9368_v13 }
 0x274   : > { %5116 = vmatpush.msrb.mxu3 %v9330_v29  ;;  %v3650_v2 = vadd.f32 %v3649_v28, %v3620_v62  ;;  %v5053_v62 = vand.u32 4294901760, %v5052_v22 }
 0x275   : > { %5089 = vmatpush.msrb.mxu2 %v9348_v51  ;;  %v3679_v23 = vpop.f32.mrf.mxu1  ;;  %v3712_v8 = vpop.f32.mrf.mxu2  ;;  %v5247_v51 = vand.u32 4294901760, %v9374_v39  ;;  %v5242_v59 = vsub.f32 %v9368_v13, %v5241_v7 }
 0x276   : > { %5118 = vmatpush.msrb.mxu3 %v9334_v4  ;;  %v3680_v10 = vadd.f32 %v3679_v23, %v3650_v2  ;;  %4775 = vmatmul.f32.vlgmr.msrb.gmra.mxu0 %v9013_v43  ;;  %v3739_v38 = vpop.f32.mrf.mxu3 }
 0x277   : > { %5015 = vmatpush.msrb.mxu0 %v9330_v29  ;;  %v5248_v2 = vsub.f32 %v9374_v39, %v5247_v51  ;;  %v5243_v53 = vand.u32 4294901760, %v5242_v59 }
 0x278   : > { %v3713_v26 = vadd.f32 %v3712_v8, %v3680_v10  ;;  %4802 = vmatmul.f32.vlgmr.msrb.gmra.mxu1 %v9013_v43 }
 0x279   : > { %5017 = vmatpush.msrb.mxu0 %v9334_v4  ;;  %5054 = vmatpush.msrb.mxu1 %v5053_v62 }
 0x27a   : > { %v9382_v5 = vadd.f32 %v3739_v38, %v3713_v26  ;;  %4841 = vmatmul.f32.gmra.mxu2 %v9093_v37  ;;  %v5249_v38 = vand.u32 4294901760, %v5248_v2 }
 0x27b   : > { %4876 = vmatmul.f32.gmra.mxu3 %v9038_v57  ;;  %5060 = vmatpush.msrb.mxu1 %v5059_v18  ;;  %v3654_v9 = vpop.f32.mrf.mxu0 }
 0x27c   : > { %v3655_v3 = vadd.f32 %v3654_v9, %v3624_v12 }
 0x27d   : > { %v3685_v22 = vpop.f32.mrf.mxu1  ;;  %v3716_v28 = vpop.f32.mrf.mxu2 }
 0x27e   : > { %v3686_v23 = vadd.f32 %v3685_v22, %v3655_v3  ;;  %4779 = vmatmul.f32.gmra.mxu0 %v9038_v57  ;;  %v3743_v8 = vpop.f32.mrf.mxu3 }
 0x280   : > { %v3717_v10 = vadd.f32 %v3716_v28, %v3686_v23  ;;  %4806 = vmatmul.f32.gmra.mxu1 %v9038_v57 }
 0x282   : > { %v9390_v62 = vadd.f32 %v3743_v8, %v3717_v10  ;;  %4965 = vmatmul.f32.vlgmr.msra.gmra.mxu2 %v9013_v43 }
 0x283   : > { %4992 = vmatmul.f32.vlgmr.msra.gmra.mxu3 %v9013_v43  ;;  %5205 = vmatpush.msra.mxu2 %v9356_v40  ;;  %v3884_v12 = vpop.f32.mrf.mxu0 }
 0x284   : > { %5244 = vmatpush.msra.mxu3 %v5243_v53 }
 0x285   : > { %v3923_v26 = vpop.f32.mrf.mxu1  ;;  %v3953_v18 = vpop.f32.mrf.mxu2  ;;  %5207 = vmatpush.msra.mxu2 %v9360_v17 }
 0x286   : > { %5250 = vmatpush.msra.mxu3 %v5249_v38  ;;  %4902 = vmatmul.f32.vlgmr.msra.gmra.mxu0 %v9021_v42  ;;  %v3983_v59 = vpop.f32.mrf.mxu3  ;;  %v3924_v9 = vadd.f32 %v3923_v26, %v3884_v12  ;;  %v9413_v26 = vpop.permute.xlu1 %5400 }
 0x287   : > { %5149 = vmatpush.msra.mxu0 %v5051_v50  ;;  %v2383_v50 = vadd.f32 %v8912_v24, %v8897_v55 }
 0x288   : > { %4932 = vmatmul.f32.vlgmr.msra.gmra.mxu1 %v9036_v52  ;;  %v3954_v2 = vadd.f32 %v3953_v18, %v3924_v9 }
 0x289   : > { %5153 = vmatpush.msra.mxu0 %v5057_v16  ;;  %5178 = vmatpush.msra.mxu1 %v9330_v29  ;;  %v2410_v38 = vadd.f32 %v8918_v54, %v2383_v50 }
 0x28a   : > { %4969 = vmatmul.f32.gmra.mxu2 %v9038_v57  ;;  %v3984_v29 = vadd.f32 %v3983_v59, %v3954_v2 }
 0x28b   : > { %4996 = vmatmul.f32.gmra.mxu3 %v9038_v57  ;;  %5180 = vmatpush.msra.mxu1 %v9334_v4  ;;  %v3892_v3 = vpop.f32.mrf.mxu0 }
 0x28d   : > { %v3927_v22 = vpop.f32.mrf.mxu1  ;;  %v3958_v28 = vpop.f32.mrf.mxu2 }
 0x28e   : > { %4907 = vmatmul.f32.gmra.mxu0 %v9045_v33  ;;  %v3989_v23 = vpop.f32.mrf.mxu3  ;;  %v3928_v16 = vadd.f32 %v3927_v22, %v3892_v3 }
 0x290   : > { %4938 = vmatmul.f32.gmra.mxu1 %v9055_v47  ;;  %v3959_v12 = vadd.f32 %v3958_v28, %v3928_v16 }
 0x292   : > { %5092 = vmatmul.f32.vlgmr.msrb.gmra.mxu2 %v9021_v42  ;;  %v3990_v54 = vadd.f32 %v3989_v23, %v3959_v12 }
 0x293   : > { %5122 = vmatmul.f32.vlgmr.msrb.gmra.mxu3 %v9036_v52  ;;  %5339 = vmatpush.msrb.mxu2 %v5241_v7  ;;  %v4016_v4 = vpop.f32.mrf.mxu0 }
 0x294   : > { %5368 = vmatpush.msrb.mxu3 %v9356_v40  ;;  %v4017_v8 = vadd.f32 %v4016_v4, %v3984_v29 }
 0x295   : > { %5343 = vmatpush.msrb.mxu2 %v5247_v51  ;;  %v4043_v53 = vpop.f32.mrf.mxu1  ;;  %v4074_v10 = vpop.f32.mrf.mxu2  ;;  %v2387_v51 = vadd.f32 %v8939_v63, %v8904_v56 }
 0x296   : > { %5370 = vmatpush.msrb.mxu3 %v9360_v17  ;;  %v4044_v55 = vadd.f32 %v4043_v53, %v4017_v8  ;;  %5023 = vmatmul.f32.vlgmr.msrb.gmra.mxu0 %v9052_v25  ;;  %v4113_v24 = vpop.f32.mrf.mxu3  ;;  %v9426_v63 = vpop.permute.xlu0 %5405 }
 0x297   : > { %5276 = vmatpush.msrb.mxu0 %v9368_v13  ;;  %v4114_v23 = vadd.f32 %v4113_v24, %v4074_v10 }
 0x298   : > { %v5380_v7 = vadd.f32 %v4044_v55, %v2410_v38  ;;  %5062 = vmatmul.f32.vlgmr.msrb.gmra.mxu1 %v9013_v43 }
 0x299   : > { %5279 = vmatpush.msrb.mxu0 %v9374_v39  ;;  %5306 = vmatpush.msrb.mxu1 %v9356_v40  ;;  %v2414_v39 = vadd.f32 %v8948_v48, %v2387_v51 }
 0x29a   : > { %5097 = vmatmul.f32.gmra.mxu2 %v9045_v33  ;;  %v5408_v18 = vadd.f32 %v9413_v26, %v5380_v7 }
 0x29b   : > { %5128 = vmatmul.f32.gmra.mxu3 %v9055_v47  ;;  %5308 = vmatpush.msrb.mxu1 %v9360_v17  ;;  %v4020_v13 = vpop.f32.mrf.mxu0 }
 0x29c   : > { %v4021_v59 = vadd.f32 %v4020_v13, %v3990_v54  ;;  %v5424_v22 = vmax.f32 %v5408_v18, 0.0  ;;  %v5440_v18 = vld [vmem:[#allocation11] sm:$0xff] }
 0x29d   : > { %v4047_v9 = vpop.f32.mrf.mxu1  ;;  %v4082_v3 = vpop.f32.mrf.mxu2 }
 0x29e   : > { %v4048_v40 = vadd.f32 %v4047_v9, %v4021_v59  ;;  %5031 = vmatmul.f32.gmra.mxu0 %v9093_v37  ;;  %v4117_v56 = vpop.f32.mrf.mxu3  ;;  %v9429_v2 = vand.u32 4294901760, %v5424_v22 }
 0x29f   : > { %v4118_v24 = vadd.f32 %v4117_v56, %v4082_v3 }
 0x2a0   : > { %v5388_v28 = vadd.f32 %v4048_v40, %v2414_v39  ;;  %5066 = vmatmul.f32.gmra.mxu1 %v9038_v57  ;;  %v5516_v8 = vsub.f32 %v5424_v22, %v9429_v2 }
 0x2a2   : > { %5213 = vmatmul.f32.vlgmr.msra.gmra.mxu2 %v9052_v25  ;;  %v5416_v17 = vadd.f32 %v9426_v63, %v5388_v28  ;;  %v5517_v10 = vand.u32 4294901760, %v5516_v8 }
 0x2a3   : > { %5252 = vmatmul.f32.vlgmr.msra.gmra.mxu3 %v9013_v43  ;;  %v4143_v50 = vpop.f32.mrf.mxu0 }
 0x2a4   : > { %v4144_v48 = vadd.f32 %v4143_v50, %v4114_v23  ;;  %v5432_v29 = vmax.f32 %v5416_v17, 0.0  ;;  %v5518_v39 = vsub.f32 %v5516_v8, %v5517_v10  ;;  %v5455_v23 = vsel %vm606_vm0, %v5440_v18, 0 }
 0x2a5   : > { %v4173_v16 = vpop.f32.mrf.mxu1  ;;  %v4206_v4 = vpop.f32.mrf.mxu2 }
 0x2a6   : > { %v4174_v53 = vadd.f32 %v4173_v16, %v4144_v48  ;;  %5155 = vmatmul.f32.vlgmr.msra.gmra.mxu0 %v9013_v43  ;;  %v4233_v38 = vpop.f32.mrf.mxu3  ;;  %v5474_v12 = vand.u32 4294901760, %v5432_v29  ;;  %v5519_v50 = vand.u32 4294901760, %v5518_v39  ;;  %v9446_v48 = vand.u32 4294901760, %v5455_v23 }
 0x2a8   : > { %v4207_v55 = vadd.f32 %v4206_v4, %v4174_v53  ;;  %5182 = vmatmul.f32.vlgmr.msra.gmra.mxu1 %v9013_v43  ;;  %5475 = vmatpush.msra.mxu0 %v5474_v12  ;;  %v5510_v25 = vsub.f32 %v5432_v29, %v5474_v12 }
 0x2a9   : > { %5576 = vmatpush.msra.mxu3 %v5474_v12 }
 0x2aa   : > { %v4234_v7 = vadd.f32 %v4233_v38, %v4207_v55  ;;  %5221 = vmatmul.f32.gmra.mxu2 %v9093_v37  ;;  %5477 = vmatpush.msra.mxu0 %v9429_v2  ;;  %v5511_v51 = vand.u32 4294901760, %v5510_v25 }
 0x2ab   : > { %5546 = vmatpush.msra.mxu2 %v5510_v25  ;;  %5578 = vmatpush.msra.mxu3 %v9429_v2  ;;  %v4148_v54 = vpop.f32.mrf.mxu0 }
 0x2ac   : > { %v5381_v13 = vadd.f32 %v4234_v7, %v8993_v11  ;;  %v4149_v59 = vadd.f32 %v4148_v54, %v4118_v24  ;;  %5256 = vmatmul.f32.gmra.mxu3 %v9038_v57  ;;  %v5512_v9 = vsub.f32 %v5510_v25, %v5511_v51  ;;  %v9454_v25 = vsub.f32 %v5455_v23, %v9446_v48 }
 0x2ad   : > { %5549 = vmatpush.msra.mxu2 %v5516_v8  ;;  %v4179_v22 = vpop.f32.mrf.mxu1  ;;  %v4210_v3 = vpop.f32.mrf.mxu2  ;;  %v5441_v8 = vld [vmem:[#allocation11 + $0x8] sm:$0xff] }
 0x2ae   : > { %v5409_v37 = vadd.f32 %v9413_v26, %v5381_v13  ;;  %v4180_v40 = vadd.f32 %v4179_v22, %v4149_v59  ;;  %5159 = vmatmul.f32.gmra.mxu0 %v9038_v57  ;;  %v4237_v56 = vpop.f32.mrf.mxu3  ;;  %v5513_v28 = vand.u32 4294901760, %v5512_v9  ;;  %v5458_v54 = vsel %vm606_vm0, %v5441_v8, 0 }
 0x2af   : > { %v9465_v9 = vand.u32 4294901760, %v5458_v54 }
 0x2b0   : > { %v4211_v17 = vadd.f32 %v4210_v3, %v4180_v40  ;;  %5186 = vmatmul.f32.gmra.mxu1 %v9038_v57  ;;  %v5425_v11 = vmax.f32 %v5409_v37, 0.0  ;;  %v2763_v40 = vadd.f32 %v9060_v32, %v9031_v36 }
 0x2b1   : > { %5514 = vmatpush.msra.mxu1 %v5513_v28 }
 0x2b2   : > { %v4238_v29 = vadd.f32 %v4237_v56, %v4211_v17  ;;  %5345 = vmatmul.f32.vlgmr.msrb.gmra.mxu2 %v9013_v43  ;;  %v9451_v55 = vand.u32 4294901760, %v5425_v11 }
 0x2b3   : > { %5520 = vmatpush.msra.mxu1 %v5519_v50  ;;  %v4264_v16 = vpop.f32.mrf.mxu0 }
 0x2b4   : > { %v5389_v4 = vadd.f32 %v4238_v29, %v9009_v35  ;;  %5372 = vmatmul.f32.vlgmr.msrb.gmra.mxu3 %v9013_v43  ;;  %v9461_v35 = vand.u32 4294901760, %v9454_v25  ;;  %v5706_v43 = vsub.f32 %v5425_v11, %v9451_v55 }
 0x2b5   : > { %v4303_v53 = vpop.f32.mrf.mxu1  ;;  %v4333_v38 = vpop.f32.mrf.mxu2 }
 0x2b6   : > { %v5417_v24 = vadd.f32 %v9426_v63, %v5389_v4  ;;  %5282 = vmatmul.f32.vlgmr.msrb.gmra.mxu0 %v9021_v42  ;;  %v4363_v7 = vpop.f32.mrf.mxu3  ;;  %v4304_v13 = vadd.f32 %v4303_v53, %v4264_v16  ;;  %v5481_v22 = vsub.f32 %v9454_v25, %v9461_v35  ;;  %v2790_v16 = vadd.f32 %v9067_v44, %v2763_v40  ;;  %v5442_v44 = vld [vmem:[%s9884_s22] sm:$0xff] }
 0x2b7   : > { %5609 = vmatpush.msrb.mxu0 %v5511_v51  ;;  %v5707_v51 = vand.u32 4294901760, %v5706_v43  ;;  %5446 = vperm.xlu2 %7467, %v5442_v44  }
 0x2b8   : > { %v5433_v18 = vmax.f32 %v5417_v24, 0.0  ;;  %5312 = vmatmul.f32.vlgmr.msrb.gmra.mxu1 %v9036_v52  ;;  %v4334_v3 = vadd.f32 %v4333_v38, %v4304_v13  ;;  %v9479_v56 = vand.u32 4294901760, %v5481_v22 }
 0x2b9   : > { %5613 = vmatpush.msrb.mxu0 %v5517_v10  ;;  %5638 = vmatpush.msrb.mxu1 %v5474_v12  ;;  %v5708_v28 = vsub.f32 %v5706_v43, %v5707_v51 }
 0x2ba   : > { %5349 = vmatmul.f32.gmra.mxu2 %v9038_v57  ;;  %v5664_v59 = vand.u32 4294901760, %v5433_v18  ;;  %v4364_v23 = vadd.f32 %v4363_v7, %v4334_v3  ;;  %v2767_v7 = vadd.f32 %v9099_v45, %v9048_v58 }
 0x2bb   : > { %5640 = vmatpush.msrb.mxu1 %v9429_v2  ;;  %v4272_v42 = vpop.f32.mrf.mxu0  ;;  %v9474_v2 = vsub.f32 %v5458_v54, %v9465_v9  ;;  %v5709_v32 = vand.u32 4294901760, %v5708_v28 }
 0x2bc   : > { %5376 = vmatmul.f32.gmra.mxu3 %v9038_v57  ;;  %5665 = vmatpush.msrb.mxu2 %v5664_v59  ;;  %v5700_v52 = vsub.f32 %v5433_v18, %v5664_v59  ;;  %v2794_v58 = vadd.f32 %v9109_v41, %v2767_v7 }
 0x2bd   : > { %v4307_v10 = vpop.f32.mrf.mxu1  ;;  %v4338_v12 = vpop.f32.mrf.mxu2  ;;  %v9483_v11 = vand.u32 4294901760, %v9474_v2 }
 0x2be   : > { %5287 = vmatmul.f32.gmra.mxu0 %v9045_v33  ;;  %5667 = vmatpush.msrb.mxu2 %v9451_v55  ;;  %v4369_v39 = vpop.f32.mrf.mxu3  ;;  %v5701_v37 = vand.u32 4294901760, %v5700_v52  ;;  %v4308_v17 = vadd.f32 %v4307_v10, %v4272_v42 }
 0x2bf   : > { %v5489_v38 = vsub.f32 %v9474_v2, %v9483_v11 }
 0x2c0   : > { %5318 = vmatmul.f32.gmra.mxu1 %v9055_v47  ;;  %v5702_v57 = vsub.f32 %v5700_v52, %v5701_v37  ;;  %v4339_v4 = vadd.f32 %v4338_v12, %v4308_v17 }
 0x2c1   : > { %v9499_v13 = vand.u32 4294901760, %v5489_v38 }
 0x2c2   : > { %5552 = vmatmul.f32.vlgmr.msra.gmra.mxu2 %v9454_v25  ;;  %v5703_v33 = vand.u32 4294901760, %v5702_v57  ;;  %v4370_v54 = vadd.f32 %v4369_v39, %v4339_v4 }
 0x2c3   : > { %5799 = vmatpush.msra.mxu2 %v5701_v37  ;;  %v4396_v50 = vpop.f32.mrf.mxu0 }
 0x2c4   : > { %v4397_v29 = vadd.f32 %v4396_v50, %v4364_v23  ;;  %5582 = vmatmul.f32.vlgmr.msra.gmra.mxu3 %v9461_v35 }
 0x2c5   : > { %5704 = vmatpush.msrb.mxu3 %v5703_v33  ;;  %5803 = vmatpush.msra.mxu2 %v5707_v51  ;;  %v4423_v47 = vpop.f32.mrf.mxu1  ;;  %v4454_v36 = vpop.f32.mrf.mxu2 }
 0x2c6   : > { %v4424_v8 = vadd.f32 %v4423_v47, %v4397_v29  ;;  %5483 = vmatmul.f32.vlgmr.msra.gmra.mxu0 %v9479_v56  ;;  %v4493_v53 = vpop.f32.mrf.mxu3 }
 0x2c7   : > { %5710 = vmatpush.msrb.mxu3 %v5709_v32  ;;  %5736 = vmatpush.msra.mxu0 %v5700_v52 }
 0x2c8   : > { %v5382_v24 = vadd.f32 %v4424_v8, %v2790_v16  ;;  %5522 = vmatmul.f32.vlgmr.msra.gmra.mxu1 %v9446_v48 }
 0x2c9   : > { %5828 = vmatpush.msra.mxu3 %v5664_v59  ;;  %5739 = vmatpush.msra.mxu0 %v5706_v43 }
 0x2ca   : > { %5766 = vmatpush.msra.mxu1 %v5664_v59  ;;  %v5410_v18 = vadd.f32 %v9413_v26, %v5382_v24  ;;  %5557 = vmatmul.f32.gmra.mxu2 %v9474_v2 }
 0x2cb   : > { %5830 = vmatpush.msra.mxu3 %v9451_v55  ;;  %v4400_v43 = vpop.f32.mrf.mxu0 }
 0x2cc   : > { %5768 = vmatpush.msra.mxu1 %v9451_v55  ;;  %v4401_v59 = vadd.f32 %v4400_v43, %v4370_v54  ;;  %5588 = vmatmul.f32.gmra.mxu3 %v9483_v11  ;;  %v5426_v42 = vmax.f32 %v5410_v18, 0.0  ;;  %v4494_v55 = vadd.f32 %v4493_v53, %v4454_v36 }
 0x2cd   : > { %v4427_v52 = vpop.f32.mrf.mxu1  ;;  %v4462_v10 = vpop.f32.mrf.mxu2 }
 0x2ce   : > { %v4428_v45 = vadd.f32 %v4427_v52, %v4401_v59  ;;  %5491 = vmatmul.f32.gmra.mxu0 %v9499_v13  ;;  %v4497_v12 = vpop.f32.mrf.mxu3  ;;  %v9506_v22 = vand.u32 4294901760, %v5426_v42 }
 0x2cf   : > { %v4498_v36 = vadd.f32 %v4497_v12, %v4462_v10 }
 0x2d0   : > { %v5390_v51 = vadd.f32 %v4428_v45, %v2794_v58  ;;  %5526 = vmatmul.f32.gmra.mxu1 %v9465_v9  ;;  %v5896_v28 = vsub.f32 %v5426_v42, %v9506_v22 }
 0x2d2   : > { %v5418_v3 = vadd.f32 %v9426_v63, %v5390_v51  ;;  %5673 = vmatmul.f32.vlgmr.msrb.gmra.mxu2 %v9479_v56  ;;  %v5897_v47 = vand.u32 4294901760, %v5896_v28 }
 0x2d3   : > { %v4523_v39 = vpop.f32.mrf.mxu0 }
 0x2d4   : > { %v5434_v37 = vmax.f32 %v5418_v3, 0.0  ;;  %v4524_v57 = vadd.f32 %v4523_v39, %v4494_v55  ;;  %5712 = vmatmul.f32.vlgmr.msrb.gmra.mxu3 %v9446_v48  ;;  %v5898_v7 = vsub.f32 %v5896_v28, %v5897_v47 }
 0x2d5   : > { %v4553_v41 = vpop.f32.mrf.mxu1  ;;  %v4586_v40 = vpop.f32.mrf.mxu2 }
 0x2d6   : > { %v4554_v23 = vadd.f32 %v4553_v41, %v4524_v57  ;;  %5615 = vmatmul.f32.vlgmr.msrb.gmra.mxu0 %v9446_v48  ;;  %v4613_v17 = vpop.f32.mrf.mxu3  ;;  %v5854_v33 = vand.u32 4294901760, %v5434_v37 }
 0x2d8   : > { %v4587_v50 = vadd.f32 %v4586_v40, %v4554_v23  ;;  %5642 = vmatmul.f32.vlgmr.msrb.gmra.mxu1 %v9446_v48  ;;  %5855 = vmatpush.msrb.mxu0 %v5854_v33  ;;  %v5890_v29 = vsub.f32 %v5434_v37, %v5854_v33 }
 0x2d9   : > { %5956 = vmatpush.msrb.mxu3 %v5854_v33 }
 0x2da   : > { %v4614_v32 = vadd.f32 %v4613_v17, %v4587_v50  ;;  %5681 = vmatmul.f32.gmra.mxu2 %v9499_v13  ;;  %5857 = vmatpush.msrb.mxu0 %v9506_v22  ;;  %v5891_v16 = vand.u32 4294901760, %v5890_v29 }
 0x2db   : > { %5926 = vmatpush.msrb.mxu2 %v5890_v29  ;;  %5958 = vmatpush.msrb.mxu3 %v9506_v22  ;;  %v4528_v4 = vpop.f32.mrf.mxu0 }
 0x2dc   : > { %v5383_v8 = vadd.f32 %v4614_v32, %v9149_v27  ;;  %v4529_v53 = vadd.f32 %v4528_v4, %v4498_v36  ;;  %5716 = vmatmul.f32.gmra.mxu3 %v9465_v9  ;;  %v5892_v38 = vsub.f32 %v5890_v29, %v5891_v16  ;;  %v5899_v27 = vand.u32 4294901760, %v5898_v7 }
 0x2dd   : > { %5929 = vmatpush.msrb.mxu2 %v5896_v28  ;;  %v4559_v24 = vpop.f32.mrf.mxu1  ;;  %v4590_v44 = vpop.f32.mrf.mxu2 }
 0x2de   : > { %v5411_v54 = vadd.f32 %v9413_v26, %v5383_v8  ;;  %v4560_v18 = vadd.f32 %v4559_v24, %v4529_v53  ;;  %5619 = vmatmul.f32.gmra.mxu0 %v9465_v9  ;;  %v4617_v43 = vpop.f32.mrf.mxu3  ;;  %v5893_v59 = vand.u32 4294901760, %v5892_v38 }
 0x2e0   : > { %v4591_v42 = vadd.f32 %v4590_v44, %v4560_v18  ;;  %5646 = vmatmul.f32.gmra.mxu1 %v9465_v9  ;;  %v5427_v52 = vmax.f32 %v5411_v54, 0.0 }
 0x2e1   : > { %5894 = vmatpush.msrb.mxu1 %v5893_v59  ;;  %v3147_v59 = vadd.f32 %v9226_v20, %v9190_v46 }
 0x2e2   : > { %v4618_v10 = vadd.f32 %v4617_v43, %v4591_v42  ;;  %5805 = vmatmul.f32.vlgmr.msra.gmra.mxu2 %v9446_v48  ;;  %v6046_v55 = vand.u32 4294901760, %v5427_v52 }
 0x2e3   : > { %5900 = vmatpush.msrb.mxu1 %v5899_v27  ;;  %v4644_v58 = vpop.f32.mrf.mxu0 }
 0x2e4   : > { %v5391_v45 = vadd.f32 %v4618_v10, %v9167_v0  ;;  %5832 = vmatmul.f32.vlgmr.msra.gmra.mxu3 %v9446_v48  ;;  %v6086_v57 = vsub.f32 %v5427_v52, %v6046_v55 }
 0x2e5   : > { %v4683_v12 = vpop.f32.mrf.mxu1  ;;  %v4713_v51 = vpop.f32.mrf.mxu2 }
 0x2e6   : > { %v5419_v3 = vadd.f32 %v9426_v63, %v5391_v45  ;;  %5742 = vmatmul.f32.vlgmr.msra.gmra.mxu0 %v9454_v25  ;;  %v4743_v39 = vpop.f32.mrf.mxu3  ;;  %v4684_v41 = vadd.f32 %v4683_v12, %v4644_v58  ;;  %v6087_v50 = vand.u32 4294901760, %v6086_v57  ;;  %v3174_v12 = vadd.f32 %v9235_v19, %v3147_v59 }
 0x2e7   : > { %5989 = vmatpush.msra.mxu0 %v5891_v16 }
 0x2e8   : > { %v5435_v37 = vmax.f32 %v5419_v3, 0.0  ;;  %5772 = vmatmul.f32.vlgmr.msra.gmra.mxu1 %v9461_v35  ;;  %v4714_v29 = vadd.f32 %v4713_v51, %v4684_v41  ;;  %v6088_v32 = vsub.f32 %v6086_v57, %v6087_v50 }
 0x2e9   : > { %5993 = vmatpush.msra.mxu0 %v5897_v47  ;;  %6018 = vmatpush.msra.mxu1 %v5854_v33 }
 0x2ea   : > { %5809 = vmatmul.f32.gmra.mxu2 %v9465_v9  ;;  %v6044_v0 = vand.u32 4294901760, %v5435_v37  ;;  %v4744_v16 = vadd.f32 %v4743_v39, %v4714_v29  ;;  %v6089_v7 = vand.u32 4294901760, %v6088_v32 }
 0x2eb   : > { %6020 = vmatpush.msra.mxu1 %v9506_v22  ;;  %v4652_v40 = vpop.f32.mrf.mxu0  ;;  %v3143_v22 = vadd.f32 %v9197_v21, %v9183_v6 }
 0x2ec   : > { %5836 = vmatmul.f32.gmra.mxu3 %v9465_v9  ;;  %6045 = vmatpush.msra.mxu2 %v6044_v0  ;;  %v6080_v28 = vsub.f32 %v5435_v37, %v6044_v0 }
 0x2ed   : > { %v4687_v23 = vpop.f32.mrf.mxu1  ;;  %v4718_v17 = vpop.f32.mrf.mxu2  ;;  %v3170_v54 = vadd.f32 %v9204_v60, %v3143_v22 }
 0x2ee   : > { %5747 = vmatmul.f32.gmra.mxu0 %v9474_v2  ;;  %6047 = vmatpush.msra.mxu2 %v6046_v55  ;;  %v4749_v33 = vpop.f32.mrf.mxu3  ;;  %v6081_v47 = vand.u32 4294901760, %v6080_v28  ;;  %v4688_v4 = vadd.f32 %v4687_v23, %v4652_v40 }
 0x2f0   : > { %5778 = vmatmul.f32.gmra.mxu1 %v9483_v11  ;;  %v6082_v36 = vsub.f32 %v6080_v28, %v6081_v47  ;;  %v4719_v18 = vadd.f32 %v4718_v17, %v4688_v4 }
 0x2f2   : > { %5932 = vmatmul.f32.vlgmr.msrb.gmra.mxu2 %v9454_v25  ;;  %v6083_v8 = vand.u32 4294901760, %v6082_v36  ;;  %v4750_v42 = vadd.f32 %v4749_v33, %v4719_v18 }
 0x2f3   : > { %6179 = vmatpush.msrb.mxu2 %v6081_v47  ;;  %v4776_v53 = vpop.f32.mrf.mxu0 }
 0x2f4   : > { %v4777_v38 = vadd.f32 %v4776_v53, %v4744_v16  ;;  %5962 = vmatmul.f32.vlgmr.msrb.gmra.mxu3 %v9461_v35 }
 0x2f5   : > { %6084 = vmatpush.msra.mxu3 %v6083_v8  ;;  %6183 = vmatpush.msrb.mxu2 %v6087_v50  ;;  %v4803_v24 = vpop.f32.mrf.mxu1  ;;  %v4834_v44 = vpop.f32.mrf.mxu2 }
 0x2f6   : > { %v4804_v43 = vadd.f32 %v4803_v24, %v4777_v38  ;;  %5863 = vmatmul.f32.vlgmr.msrb.gmra.mxu0 %v9479_v56  ;;  %v4873_v6 = vpop.f32.mrf.mxu3 }
 0x2f7   : > { %6090 = vmatpush.msra.mxu3 %v6089_v7  ;;  %6116 = vmatpush.msrb.mxu0 %v6080_v28  ;;  %v4874_v39 = vadd.f32 %v4873_v6, %v4834_v44 }
 0x2f8   : > { %v5384_v21 = vadd.f32 %v4804_v43, %v3170_v54  ;;  %5902 = vmatmul.f32.vlgmr.msrb.gmra.mxu1 %v9446_v48 }
 0x2f9   : > { %6208 = vmatpush.msrb.mxu3 %v6044_v0  ;;  %6119 = vmatpush.msrb.mxu0 %v6086_v57 }
 0x2fa   : > { %6146 = vmatpush.msrb.mxu1 %v6044_v0  ;;  %v5412_v52 = vadd.f32 %v9413_v26, %v5384_v21  ;;  %5937 = vmatmul.f32.gmra.mxu2 %v9474_v2 }
 0x2fb   : > { %6210 = vmatpush.msrb.mxu3 %v6046_v55  ;;  %v4780_v60 = vpop.f32.mrf.mxu0 }
 0x2fc   : > { %6148 = vmatpush.msrb.mxu1 %v6046_v55  ;;  %v4781_v27 = vadd.f32 %v4780_v60, %v4750_v42  ;;  %5968 = vmatmul.f32.gmra.mxu3 %v9483_v11  ;;  %v5428_v10 = vmax.f32 %v5412_v52, 0.0 }
 0x2fd   : > { %v4807_v58 = vpop.f32.mrf.mxu1  ;;  %v4842_v45 = vpop.f32.mrf.mxu2 }
 0x2fe   : > { %v4808_v51 = vadd.f32 %v4807_v58, %v4781_v27  ;;  %5871 = vmatmul.f32.gmra.mxu0 %v9499_v13  ;;  %v4877_v46 = vpop.f32.mrf.mxu3  ;;  %v9548_v3 = vand.u32 4294901760, %v5428_v10 }
 0x2ff   : > { %v4878_v47 = vadd.f32 %v4877_v46, %v4842_v45 }
 0x300   : > { %v5392_v20 = vadd.f32 %v4808_v51, %v3174_v12  ;;  %5906 = vmatmul.f32.gmra.mxu1 %v9465_v9  ;;  %v6276_v40 = vsub.f32 %v5428_v10, %v9548_v3 }
 0x302   : > { %v5420_v55 = vadd.f32 %v9426_v63, %v5392_v20  ;;  %6053 = vmatmul.f32.vlgmr.msra.gmra.mxu2 %v9479_v56  ;;  %v6277_v33 = vand.u32 4294901760, %v6276_v40 }
 0x303   : > { %v4903_v37 = vpop.f32.mrf.mxu0 }
 0x304   : > { %v5436_v57 = vmax.f32 %v5420_v55, 0.0  ;;  %v4904_v41 = vadd.f32 %v4903_v37, %v4874_v39  ;;  %6092 = vmatmul.f32.vlgmr.msra.gmra.mxu3 %v9446_v48  ;;  %v6278_v24 = vsub.f32 %v6276_v40, %v6277_v33 }
 0x305   : > { %v4933_v19 = vpop.f32.mrf.mxu1  ;;  %v4966_v0 = vpop.f32.mrf.mxu2 }
 0x306   : > { %v4934_v28 = vadd.f32 %v4933_v19, %v4904_v41  ;;  %5995 = vmatmul.f32.vlgmr.msra.gmra.mxu0 %v9446_v48  ;;  %v4993_v23 = vpop.f32.mrf.mxu3  ;;  %v6234_v17 = vand.u32 4294901760, %v5436_v57 }
 0x308   : > { %v4967_v50 = vadd.f32 %v4966_v0, %v4934_v28  ;;  %6022 = vmatmul.f32.vlgmr.msra.gmra.mxu1 %v9446_v48  ;;  %6235 = vmatpush.msra.mxu0 %v6234_v17  ;;  %v6270_v29 = vsub.f32 %v5436_v57, %v6234_v17 }
 0x309   : > { %6336 = vmatpush.msra.mxu3 %v6234_v17 }
 0x30a   : > { %v4994_v36 = vadd.f32 %v4993_v23, %v4967_v50  ;;  %6061 = vmatmul.f32.gmra.mxu2 %v9499_v13  ;;  %6237 = vmatpush.msra.mxu0 %v9548_v3  ;;  %v6271_v32 = vand.u32 4294901760, %v6270_v29 }
 0x30b   : > { %6306 = vmatpush.msra.mxu2 %v6270_v29  ;;  %6338 = vmatpush.msra.mxu3 %v9548_v3  ;;  %v4908_v22 = vpop.f32.mrf.mxu0 }
 0x30c   : > { %v5385_v16 = vadd.f32 %v4994_v36, %v9272_v49  ;;  %v4909_v4 = vadd.f32 %v4908_v22, %v4878_v47  ;;  %6096 = vmatmul.f32.gmra.mxu3 %v9465_v9  ;;  %v6272_v8 = vsub.f32 %v6270_v29, %v6271_v32  ;;  %v6279_v49 = vand.u32 4294901760, %v6278_v24 }
 0x30d   : > { %6309 = vmatpush.msra.mxu2 %v6276_v40  ;;  %v4939_v53 = vpop.f32.mrf.mxu1  ;;  %v4970_v38 = vpop.f32.mrf.mxu2 }
 0x30e   : > { %v5413_v44 = vadd.f32 %v9413_v26, %v5385_v16  ;;  %v4940_v7 = vadd.f32 %v4939_v53, %v4909_v4  ;;  %5999 = vmatmul.f32.gmra.mxu0 %v9465_v9  ;;  %v4997_v54 = vpop.f32.mrf.mxu3  ;;  %v6273_v18 = vand.u32 4294901760, %v6272_v8  ;;  %v3527_v4 = vadd.f32 %v9344_v30, %v9310_v15 }
 0x310   : > { %v4971_v43 = vadd.f32 %v4970_v38, %v4940_v7  ;;  %6026 = vmatmul.f32.gmra.mxu1 %v9465_v9  ;;  %v5429_v6 = vmax.f32 %v5413_v44, 0.0 }
 0x311   : > { %6274 = vmatpush.msra.mxu1 %v6273_v18 }
 0x312   : > { %v4998_v21 = vadd.f32 %v4997_v54, %v4971_v43  ;;  %6185 = vmatmul.f32.vlgmr.msrb.gmra.mxu2 %v9446_v48  ;;  %v6426_v27 = vand.u32 4294901760, %v5429_v6  ;;  %v3554_v54 = vadd.f32 %v9350_v61, %v3527_v4 }
 0x313   : > { %6280 = vmatpush.msra.mxu1 %v6279_v49  ;;  %v5024_v59 = vpop.f32.mrf.mxu0 }
 0x314   : > { %v5393_v42 = vadd.f32 %v4998_v21, %v9287_v1  ;;  %6212 = vmatmul.f32.vlgmr.msrb.gmra.mxu3 %v9446_v48  ;;  %v6466_v12 = vsub.f32 %v5429_v6, %v6426_v27 }
 0x315   : > { %v5063_v52 = vpop.f32.mrf.mxu1  ;;  %v5093_v60 = vpop.f32.mrf.mxu2 }
 0x316   : > { %v5421_v10 = vadd.f32 %v9426_v63, %v5393_v42  ;;  %6122 = vmatmul.f32.vlgmr.msrb.gmra.mxu0 %v9454_v25  ;;  %v5123_v58 = vpop.f32.mrf.mxu3  ;;  %v5064_v51 = vadd.f32 %v5063_v52, %v5024_v59  ;;  %v6467_v37 = vand.u32 4294901760, %v6466_v12 }
 0x317   : > { %6369 = vmatpush.msrb.mxu0 %v6271_v32 }
 0x318   : > { %v5437_v45 = vmax.f32 %v5421_v10, 0.0  ;;  %6152 = vmatmul.f32.vlgmr.msrb.gmra.mxu1 %v9461_v35  ;;  %v5094_v57 = vadd.f32 %v5093_v60, %v5064_v51  ;;  %v6468_v40 = vsub.f32 %v6466_v12, %v6467_v37 }
 0x319   : > { %6373 = vmatpush.msrb.mxu0 %v6277_v33  ;;  %6398 = vmatpush.msrb.mxu1 %v6234_v17 }
 0x31a   : > { %6189 = vmatmul.f32.gmra.mxu2 %v9465_v9  ;;  %v6424_v1 = vand.u32 4294901760, %v5437_v45  ;;  %v5124_v28 = vadd.f32 %v5123_v58, %v5094_v57  ;;  %v6469_v36 = vand.u32 4294901760, %v6468_v40 }
 0x31b   : > { %6400 = vmatpush.msrb.mxu1 %v9548_v3  ;;  %v5032_v46 = vpop.f32.mrf.mxu0  ;;  %v3523_v3 = vadd.f32 %v9317_v14, %v9303_v34 }
 0x31c   : > { %6216 = vmatmul.f32.gmra.mxu3 %v9465_v9  ;;  %6425 = vmatpush.msrb.mxu2 %v6424_v1  ;;  %v6460_v20 = vsub.f32 %v5437_v45, %v6424_v1 }
 0x31d   : > { %v5067_v39 = vpop.f32.mrf.mxu1  ;;  %v5098_v55 = vpop.f32.mrf.mxu2  ;;  %v3550_v32 = vadd.f32 %v9324_v31, %v3523_v3 }
 0x31e   : > { %6127 = vmatmul.f32.gmra.mxu0 %v9474_v2  ;;  %6427 = vmatpush.msrb.mxu2 %v6426_v27  ;;  %v5129_v41 = vpop.f32.mrf.mxu3  ;;  %v6461_v19 = vand.u32 4294901760, %v6460_v20  ;;  %v5068_v23 = vadd.f32 %v5067_v39, %v5032_v46 }
 0x320   : > { %6158 = vmatmul.f32.gmra.mxu1 %v9483_v11  ;;  %v6462_v0 = vsub.f32 %v6460_v20, %v6461_v19  ;;  %v5099_v22 = vadd.f32 %v5098_v55, %v5068_v23 }
 0x322   : > { %6312 = vmatmul.f32.vlgmr.msra.gmra.mxu2 %v9454_v25  ;;  %v6463_v17 = vand.u32 4294901760, %v6462_v0  ;;  %v5130_v8 = vadd.f32 %v5129_v41, %v5099_v22 }
 0x323   : > { %6559 = vmatpush.msra.mxu2 %v6461_v19  ;;  %v5156_v50 = vpop.f32.mrf.mxu0 }
 0x324   : > { %v5157_v29 = vadd.f32 %v5156_v50, %v5124_v28  ;;  %6342 = vmatmul.f32.vlgmr.msra.gmra.mxu3 %v9461_v35 }
 0x325   : > { %6464 = vmatpush.msrb.mxu3 %v6463_v17  ;;  %6563 = vmatpush.msra.mxu2 %v6467_v37  ;;  %v5183_v33 = vpop.f32.mrf.mxu1  ;;  %v5214_v47 = vpop.f32.mrf.mxu2 }
 0x326   : > { %v5184_v16 = vadd.f32 %v5183_v33, %v5157_v29  ;;  %6243 = vmatmul.f32.vlgmr.msra.gmra.mxu0 %v9479_v56  ;;  %v5253_v34 = vpop.f32.mrf.mxu3 }
 0x327   : > { %6470 = vmatpush.msrb.mxu3 %v6469_v36  ;;  %6496 = vmatpush.msra.mxu0 %v6460_v20  ;;  %v5254_v6 = vadd.f32 %v5253_v34, %v5214_v47 }
 0x328   : > { %v5386_v14 = vadd.f32 %v5184_v16, %v3550_v32  ;;  %6282 = vmatmul.f32.vlgmr.msra.gmra.mxu1 %v9446_v48 }
 0x329   : > { %6588 = vmatpush.msra.mxu3 %v6424_v1  ;;  %6499 = vmatpush.msra.mxu0 %v6466_v12 }
 0x32a   : > { %6526 = vmatpush.msra.mxu1 %v6424_v1  ;;  %v5414_v53 = vadd.f32 %v9413_v26, %v5386_v14  ;;  %6317 = vmatmul.f32.gmra.mxu2 %v9474_v2 }
 0x32b   : > { %6590 = vmatpush.msra.mxu3 %v6426_v27  ;;  %v5160_v31 = vpop.f32.mrf.mxu0 }
 0x32c   : > { %6528 = vmatpush.msra.mxu1 %v6426_v27  ;;  %v5161_v38 = vadd.f32 %v5160_v31, %v5130_v8  ;;  %6348 = vmatmul.f32.gmra.mxu3 %v9483_v11  ;;  %v5430_v24 = vmax.f32 %v5414_v53, 0.0  ;;  %v9627_v31 = vpop.permute.xlu1 %5451 }
 0x32d   : > { %v5187_v44 = vpop.f32.mrf.mxu1  ;;  %v5222_v7 = vpop.f32.mrf.mxu2 }
 0x32e   : > { %v5188_v18 = vadd.f32 %v5187_v44, %v5161_v38  ;;  %6251 = vmatmul.f32.gmra.mxu0 %v9499_v13  ;;  %v9590_v43 = vand.u32 4294901760, %v5430_v24 }
 0x32f   : > { %v5257_v15 = vpop.f32.mrf.mxu3 }
 0x330   : > { %v5394_v30 = vadd.f32 %v5188_v18, %v3554_v54  ;;  %6286 = vmatmul.f32.gmra.mxu1 %v9465_v9  ;;  %v6656_v60 = vsub.f32 %v5430_v24, %v9590_v43  ;;  %v5258_v1 = vadd.f32 %v5257_v15, %v5222_v7 }
 0x332   : > { %v5422_v49 = vadd.f32 %v9426_v63, %v5394_v30  ;;  %6433 = vmatmul.f32.vlgmr.msrb.gmra.mxu2 %v9479_v56  ;;  %v6657_v51 = vand.u32 4294901760, %v6656_v60 }
 0x333   : > { %v5283_v21 = vpop.f32.mrf.mxu0 }
 0x334   : > { %v5438_v59 = vmax.f32 %v5422_v49, 0.0  ;;  %v5284_v42 = vadd.f32 %v5283_v21, %v5254_v6  ;;  %6472 = vmatmul.f32.vlgmr.msrb.gmra.mxu3 %v9446_v48  ;;  %v6658_v0 = vsub.f32 %v6656_v60, %v6657_v51 }
 0x335   : > { %v5313_v61 = vpop.f32.mrf.mxu1  ;;  %v5346_v52 = vpop.f32.mrf.mxu2 }
 0x336   : > { %v5314_v27 = vadd.f32 %v5313_v61, %v5284_v42  ;;  %6375 = vmatmul.f32.vlgmr.msrb.gmra.mxu0 %v9446_v48  ;;  %v6614_v10 = vand.u32 4294901760, %v5438_v59  ;;  %v6659_v50 = vand.u32 4294901760, %v6658_v0  ;;  %v9638_v61 = vld [vmem:[%s528_s7] sm:$0xff] }
 0x337   : > { %v5373_v58 = vpop.f32.mrf.mxu3 }
 0x338   : > { %v5347_v45 = vadd.f32 %v5346_v52, %v5314_v27  ;;  %6402 = vmatmul.f32.vlgmr.msrb.gmra.mxu1 %v9446_v48  ;;  %6615 = vmatpush.msrb.mxu0 %v6614_v10  ;;  %v6650_v12 = vsub.f32 %v5438_v59, %v6614_v10  ;;  %v6980_v27 = vld [vmem:[%s8111_s21] sm:$0xff] }
 0x339   : > { %6716 = vmatpush.msrb.mxu3 %v6614_v10 }
 0x33a   : > { %v5374_v46 = vadd.f32 %v5373_v58, %v5347_v45  ;;  %6441 = vmatmul.f32.gmra.mxu2 %v9499_v13  ;;  %6617 = vmatpush.msrb.mxu0 %v9590_v43  ;;  %v6651_v20 = vand.u32 4294901760, %v6650_v12 }
 0x33b   : > { %6686 = vmatpush.msrb.mxu2 %v6650_v12  ;;  %6718 = vmatpush.msrb.mxu3 %v9590_v43  ;;  %v5288_v39 = vpop.f32.mrf.mxu0 }
 0x33c   : > { %v5387_v55 = vadd.f32 %v5374_v46, %v9382_v5  ;;  %v5289_v37 = vadd.f32 %v5288_v39, %v5258_v1  ;;  %6476 = vmatmul.f32.gmra.mxu3 %v9465_v9  ;;  %v6652_v57 = vsub.f32 %v6650_v12, %v6651_v20 }
 0x33d   : > { %6689 = vmatpush.msrb.mxu2 %v6656_v60  ;;  %v5319_v41 = vpop.f32.mrf.mxu1  ;;  %v5350_v19 = vpop.f32.mrf.mxu2 }
 0x33e   : > { %v5415_v40 = vadd.f32 %v9413_v26, %v5387_v55  ;;  %v5320_v3 = vadd.f32 %v5319_v41, %v5289_v37  ;;  %6379 = vmatmul.f32.gmra.mxu0 %v9465_v9  ;;  %v6653_v28 = vand.u32 4294901760, %v6652_v57  ;;  %v9611_v26 = vpop.permute.xlu2 %5446  ;;  %v6988_v41 = vld [vmem:[%s8111_s21 + $0x40] sm:$0xff] }
 0x33f   : > { %v5377_v23 = vpop.f32.mrf.mxu3 }
 0x340   : > { %v5351_v17 = vadd.f32 %v5350_v19, %v5320_v3  ;;  %6406 = vmatmul.f32.gmra.mxu1 %v9465_v9  ;;  %v5431_v5 = vmax.f32 %v5415_v40, 0.0 }
 0x341   : > { %6654 = vmatpush.msrb.mxu1 %v6653_v28 }
 0x342   : > { %v5378_v29 = vadd.f32 %v5377_v23, %v5351_v17  ;;  %6565 = vmatmul.f32.vlgmr.msra.gmra.mxu2 %v9446_v48  ;;  %v9615_v22 = vand.u32 4294901760, %v5431_v5 }
 0x343   : > { %6660 = vmatpush.msrb.mxu1 %v6659_v50  ;;  %v5484_v33 = vpop.f32.mrf.mxu0 }
 0x344   : > { %v5395_v47 = vadd.f32 %v5378_v29, %v9390_v62  ;;  %6592 = vmatmul.f32.vlgmr.msra.gmra.mxu3 %v9446_v48  ;;  %v5485_v34 = vadd.f32 %v5484_v33, %v9611_v26  ;;  %v6846_v62 = vsub.f32 %v5431_v5, %v9615_v22 }
 0x345   : > { %v5523_v36 = vpop.f32.mrf.mxu1  ;;  %v5553_v32 = vpop.f32.mrf.mxu2 }
 0x346   : > { %v5423_v16 = vadd.f32 %v9426_v63, %v5395_v47  ;;  %6502 = vmatmul.f32.vlgmr.msra.gmra.mxu0 %v9454_v25  ;;  %v5524_v8 = vadd.f32 %v5523_v36, %v5485_v34  ;;  %v6847_v7 = vand.u32 4294901760, %v6846_v62 }
 0x347   : > { %6749 = vmatpush.msra.mxu0 %v6651_v20  ;;  %v5583_v14 = vpop.f32.mrf.mxu3 }
 0x348   : > { %v5439_v4 = vmax.f32 %v5423_v16, 0.0  ;;  %6532 = vmatmul.f32.vlgmr.msra.gmra.mxu1 %v9461_v35  ;;  %v5554_v54 = vadd.f32 %v5553_v32, %v5524_v8  ;;  %v6848_v6 = vsub.f32 %v6846_v62, %v6847_v7  ;;  %v6981_v16 = vld [vmem:[%s8111_s21 + $0x8] sm:$0xff] }
 0x349   : > { %6753 = vmatpush.msra.mxu0 %v6657_v51  ;;  %6778 = vmatpush.msra.mxu1 %v6614_v10  ;;  %v7014_v51 = vperm.slane %v9638_v61, 0 }
 0x34a   : > { %6569 = vmatmul.f32.gmra.mxu2 %v9465_v9  ;;  %v6804_v53 = vand.u32 4294901760, %v5439_v4  ;;  %v5584_v49 = vadd.f32 %v5583_v14, %v5554_v54  ;;  %v6849_v58 = vand.u32 4294901760, %v6848_v6  ;;  %v7015_v14 = vperm.slane %v9638_v61, 1  ;;  %v6989_v54 = vld [vmem:[%s8111_s21 + $0x48] sm:$0xff] }
 0x34b   : > { %6780 = vmatpush.msra.mxu1 %v9590_v43  ;;  %v5492_v63 = vpop.f32.mrf.mxu0 }
 0x34c   : > { %6596 = vmatmul.f32.gmra.mxu3 %v9465_v9  ;;  %6805 = vmatpush.msra.mxu2 %v6804_v53  ;;  %v6840_v38 = vsub.f32 %v5439_v4, %v6804_v53  ;;  %v5493_v18 = vadd.f32 %v5492_v63, %v9627_v31 }
 0x34d   : > { %v5527_v24 = vpop.f32.mrf.mxu1  ;;  %v5558_v44 = vpop.f32.mrf.mxu2 }
 0x34e   : > { %6507 = vmatmul.f32.gmra.mxu0 %v9474_v2  ;;  %6807 = vmatpush.msra.mxu2 %v9615_v22  ;;  %v6841_v15 = vand.u32 4294901760, %v6840_v38  ;;  %v5528_v21 = vadd.f32 %v5527_v24, %v5493_v18 }
 0x34f   : > { %v5589_v30 = vpop.f32.mrf.mxu3 }
 0x350   : > { %6538 = vmatmul.f32.gmra.mxu1 %v9483_v11  ;;  %v6842_v43 = vsub.f32 %v6840_v38, %v6841_v15  ;;  %v5559_v45 = vadd.f32 %v5558_v44, %v5528_v21 }
 0x352   : > { %6692 = vmatmul.f32.vlgmr.msrb.gmra.mxu2 %v9454_v25  ;;  %v6843_v59 = vand.u32 4294901760, %v6842_v43  ;;  %v5590_v20 = vadd.f32 %v5589_v30, %v5559_v45 }
 0x353   : > { %6939 = vmatpush.msrb.mxu2 %v6841_v15  ;;  %v5616_v42 = vpop.f32.mrf.mxu0 }
 0x354   : > { %v5617_v52 = vadd.f32 %v5616_v42, %v5584_v49  ;;  %6722 = vmatmul.f32.vlgmr.msrb.gmra.mxu3 %v9461_v35 }
 0x355   : > { %6844 = vmatpush.msra.mxu3 %v6843_v59  ;;  %6943 = vmatpush.msrb.mxu2 %v6847_v7  ;;  %v5643_v60 = vpop.f32.mrf.mxu1  ;;  %v5674_v10 = vpop.f32.mrf.mxu2 }
 0x356   : > { %v5644_v12 = vadd.f32 %v5643_v60, %v5617_v52  ;;  %6623 = vmatmul.f32.vlgmr.msrb.gmra.mxu0 %v9479_v56  ;;  %v5675_v0 = vadd.f32 %v5674_v10, %v9611_v26 }
 0x357   : > { %6850 = vmatpush.msra.mxu3 %v6849_v58  ;;  %6876 = vmatpush.msrb.mxu0 %v6840_v38  ;;  %v5713_v1 = vpop.f32.mrf.mxu3 }
 0x358   : > { %v6996_v46 = vadd.f32 %v6980_v27, %v5644_v12  ;;  %6662 = vmatmul.f32.vlgmr.msrb.gmra.mxu1 %v9446_v48  ;;  %v5714_v23 = vadd.f32 %v5713_v1, %v5675_v0 }
 0x359   : > { %6968 = vmatpush.msrb.mxu3 %v6804_v53  ;;  %6879 = vmatpush.msrb.mxu0 %v6846_v62 }
 0x35a   : > { %6906 = vmatpush.msrb.mxu1 %v6804_v53  ;;  %v7030_v39 = vmul.f32 %v7014_v51, %v6996_v46  ;;  %6697 = vmatmul.f32.gmra.mxu2 %v9474_v2 }
 0x35b   : > { %6970 = vmatpush.msrb.mxu3 %v9615_v22  ;;  %v5620_v55 = vpop.f32.mrf.mxu0 }
 0x35c   : > { %6908 = vmatpush.msrb.mxu1 %v9615_v22  ;;  %7046 = vst [vmem:[%s9650_s23] sm:$0xff] %v7030_v39  ;;  %v5621_v37 = vadd.f32 %v5620_v55, %v5590_v20  ;;  %6728 = vmatmul.f32.gmra.mxu3 %v9483_v11  ;;  %v7016_v20 = vperm.slane %v9638_v61, 2 }
 0x35d   : > { %v5647_v57 = vpop.f32.mrf.mxu1  ;;  %v5682_v19 = vpop.f32.mrf.mxu2 }
 0x35e   : > { %v5648_v40 = vadd.f32 %v5647_v57, %v5621_v37  ;;  %6631 = vmatmul.f32.gmra.mxu0 %v9499_v13  ;;  %v5683_v47 = vadd.f32 %v5682_v19, %v9627_v31  ;;  %v6990_v19 = vld [vmem:[%s8111_s21 + $0x50] sm:$0xff] }
 0x35f   : > { %v5717_v3 = vpop.f32.mrf.mxu3 }
 0x360   : > { %v7004_v28 = vadd.f32 %v6988_v41, %v5648_v40  ;;  %6666 = vmatmul.f32.gmra.mxu1 %v9465_v9  ;;  %v5718_v34 = vadd.f32 %v5717_v3, %v5683_v47 }
 0x362   : > { %v7038_v17 = vmul.f32 %v7014_v51, %v7004_v28  ;;  %6813 = vmatmul.f32.vlgmr.msra.gmra.mxu2 %v9479_v56  ;;  %v6982_v51 = vld [vmem:[%s8111_s21 + $0x10] sm:$0xff] }
 0x363   : > { %v5743_v5 = vpop.f32.mrf.mxu0 }
 0x364   : > { %7054 = vst [vmem:[%s9650_s23 + $0x40] sm:$0xff] %v7038_v17  ;;  %v5744_v50 = vadd.f32 %v5743_v5, %v5714_v23  ;;  %6852 = vmatmul.f32.vlgmr.msra.gmra.mxu3 %v9446_v48 }
 0x365   : > { %v5773_v29 = vpop.f32.mrf.mxu1  ;;  %v5806_v33 = vpop.f32.mrf.mxu2 }
 0x366   : > { %v5774_v36 = vadd.f32 %v5773_v29, %v5744_v50  ;;  %6755 = vmatmul.f32.vlgmr.msra.gmra.mxu0 %v9446_v48 }
 0x367   : > { %v5833_v32 = vpop.f32.mrf.mxu3 }
 0x368   : > { %v5807_v22 = vadd.f32 %v5806_v33, %v5774_v36  ;;  %6782 = vmatmul.f32.vlgmr.msra.gmra.mxu1 %v9446_v48 }
 0x36a   : > { %v5834_v56 = vadd.f32 %v5833_v32, %v5807_v22  ;;  %6821 = vmatmul.f32.gmra.mxu2 %v9499_v13 }
 0x36b   : > { %v5748_v4 = vpop.f32.mrf.mxu0 }
 0x36c   : > { %v6997_v62 = vadd.f32 %v6981_v16, %v5834_v56  ;;  %v5749_v8 = vadd.f32 %v5748_v4, %v5718_v34  ;;  %6856 = vmatmul.f32.gmra.mxu3 %v9465_v9  ;;  %v6983_v34 = vld [vmem:[%s8111_s21 + $0x18] sm:$0xff]  ;;  %v7017_v4 = vperm.slane %v9638_v61, 3 }
 0x36d   : > { %v5779_v53 = vpop.f32.mrf.mxu1  ;;  %v5810_v63 = vpop.f32.mrf.mxu2 }
 0x36e   : > { %v7031_v38 = vmul.f32 %v7015_v14, %v6997_v62  ;;  %v5780_v24 = vadd.f32 %v5779_v53, %v5749_v8  ;;  %6759 = vmatmul.f32.gmra.mxu0 %v9465_v9 }
 0x36f   : > { %v5837_v44 = vpop.f32.mrf.mxu3 }
 0x370   : > { %7047 = vst [vmem:[%s9650_s23 + $0x8] sm:$0xff] %v7031_v38  ;;  %v5811_v7 = vadd.f32 %v5810_v63, %v5780_v24  ;;  %6786 = vmatmul.f32.gmra.mxu1 %v9465_v9 }
 0x372   : > { %v5838_v18 = vadd.f32 %v5837_v44, %v5811_v7  ;;  %6945 = vmatmul.f32.vlgmr.msrb.gmra.mxu2 %v9446_v48 }
 0x373   : > { %v5864_v13 = vpop.f32.mrf.mxu0 }
 0x374   : > { %v7005_v15 = vadd.f32 %v6989_v54, %v5838_v18  ;;  %6972 = vmatmul.f32.vlgmr.msrb.gmra.mxu3 %v9446_v48  ;;  %v5865_v49 = vadd.f32 %v5864_v13, %v9611_v26  ;;  %v6991_v18 = vld [vmem:[%s8111_s21 + $0x58] sm:$0xff] }
 0x375   : > { %v5903_v30 = vpop.f32.mrf.mxu1  ;;  %v5933_v43 = vpop.f32.mrf.mxu2 }
 0x376   : > { %v7039_v6 = vmul.f32 %v7015_v14, %v7005_v15  ;;  %6882 = vmatmul.f32.vlgmr.msrb.gmra.mxu0 %v9454_v25  ;;  %v5904_v59 = vadd.f32 %v5903_v30, %v5865_v49 }
 0x377   : > { %v5963_v21 = vpop.f32.mrf.mxu3 }
 0x378   : > { %7055 = vst [vmem:[%s9650_s23 + $0x48] sm:$0xff] %v7039_v6  ;;  %6912 = vmatmul.f32.vlgmr.msrb.gmra.mxu1 %v9461_v35  ;;  %v5934_v60 = vadd.f32 %v5933_v43, %v5904_v59 }
 0x37a   : > { %6949 = vmatmul.f32.gmra.mxu2 %v9465_v9  ;;  %v5964_v25 = vadd.f32 %v5963_v21, %v5934_v60 }
 0x37b   : > { %v5872_v42 = vpop.f32.mrf.mxu0 }
 0x37c   : > { %6976 = vmatmul.f32.gmra.mxu3 %v9465_v9  ;;  %v5873_v27 = vadd.f32 %v5872_v42, %v9627_v31 }
 0x37d   : > { %v5907_v52 = vpop.f32.mrf.mxu1  ;;  %v5938_v48 = vpop.f32.mrf.mxu2 }
 0x37e   : > { %6887 = vmatmul.f32.gmra.mxu0 %v9474_v2  ;;  %v5908_v35 = vadd.f32 %v5907_v52, %v5873_v27 }
 0x37f   : > { %v5969_v10 = vpop.f32.mrf.mxu3 }
 0x380   : > { %6918 = vmatmul.f32.gmra.mxu1 %v9483_v11  ;;  %v5939_v9 = vadd.f32 %v5938_v48, %v5908_v35 }
 0x382   : > { %v5970_v2 = vadd.f32 %v5969_v10, %v5939_v9 }
 0x383   : > { %v5996_v58 = vpop.f32.mrf.mxu0 }
 0x384   : > { %v5997_v45 = vadd.f32 %v5996_v58, %v5964_v25 }
 0x385   : > { %v6023_v12 = vpop.f32.mrf.mxu1  ;;  %v6054_v1 = vpop.f32.mrf.mxu2 }
 0x386   : > { %v6024_v46 = vadd.f32 %v6023_v12, %v5997_v45  ;;  %v6055_v40 = vadd.f32 %v6054_v1, %v9611_v26  ;;  %v6984_v1 = vld [vmem:[%s8111_s21 + $0x20] sm:$0xff] }
 0x387   : > { %v6093_v39 = vpop.f32.mrf.mxu3 }
 0x388   : > { %v6998_v55 = vadd.f32 %v6982_v51, %v6024_v46  ;;  %v6094_v17 = vadd.f32 %v6093_v39, %v6055_v40  ;;  %v7018_v39 = vperm.slane %v9638_v61, 4 }
 0x38a   : > { %v7032_v37 = vmul.f32 %v7016_v20, %v6998_v55 }
 0x38b   : > { %v6000_v57 = vpop.f32.mrf.mxu0 }
 0x38c   : > { %7048 = vst [vmem:[%s9650_s23 + $0x10] sm:$0xff] %v7032_v37  ;;  %v6001_v11 = vadd.f32 %v6000_v57, %v5970_v2 }
 0x38d   : > { %v6027_v41 = vpop.f32.mrf.mxu1  ;;  %v6062_v0 = vpop.f32.mrf.mxu2 }
 0x38e   : > { %v6028_v3 = vadd.f32 %v6027_v41, %v6001_v11  ;;  %v6063_v36 = vadd.f32 %v6062_v0, %v9627_v31  ;;  %v6992_v0 = vld [vmem:[%s8111_s21 + $0x60] sm:$0xff] }
 0x38f   : > { %v6097_v28 = vpop.f32.mrf.mxu3 }
 0x390   : > { %v7006_v23 = vadd.f32 %v6990_v19, %v6028_v3  ;;  %v6098_v56 = vadd.f32 %v6097_v28, %v6063_v36 }
 0x392   : > { %v7040_v5 = vmul.f32 %v7016_v20, %v7006_v23 }
 0x393   : > { %v6123_v50 = vpop.f32.mrf.mxu0 }
 0x394   : > { %7056 = vst [vmem:[%s9650_s23 + $0x50] sm:$0xff] %v7040_v5  ;;  %v6124_v29 = vadd.f32 %v6123_v50, %v6094_v17 }
 0x395   : > { %v6153_v33 = vpop.f32.mrf.mxu1  ;;  %v6186_v47 = vpop.f32.mrf.mxu2 }
 0x396   : > { %v6154_v32 = vadd.f32 %v6153_v33, %v6124_v29 }
 0x397   : > { %v6213_v22 = vpop.f32.mrf.mxu3 }
 0x398   : > { %v6187_v16 = vadd.f32 %v6186_v47, %v6154_v32 }
 0x39a   : > { %v6214_v14 = vadd.f32 %v6213_v22, %v6187_v16 }
 0x39b   : > { %v6128_v62 = vpop.f32.mrf.mxu0 }
 0x39c   : > { %v6999_v8 = vadd.f32 %v6983_v34, %v6214_v14  ;;  %v6129_v53 = vadd.f32 %v6128_v62, %v6098_v56  ;;  %v6985_v56 = vld [vmem:[%s8111_s21 + $0x28] sm:$0xff]  ;;  %v7019_v62 = vperm.slane %v9638_v61, 5 }
 0x39d   : > { %v6159_v63 = vpop.f32.mrf.mxu1  ;;  %v6190_v38 = vpop.f32.mrf.mxu2 }
 0x39e   : > { %v7033_v24 = vmul.f32 %v7017_v4, %v6999_v8  ;;  %v6160_v44 = vadd.f32 %v6159_v63, %v6129_v53 }
 0x39f   : > { %v6217_v7 = vpop.f32.mrf.mxu3 }
 0x3a0   : > { %7049 = vst [vmem:[%s9650_s23 + $0x18] sm:$0xff] %v7033_v24  ;;  %v6191_v54 = vadd.f32 %v6190_v38, %v6160_v44 }
 0x3a2   : > { %v6218_v13 = vadd.f32 %v6217_v7, %v6191_v54 }
 0x3a3   : > { %v6244_v15 = vpop.f32.mrf.mxu0 }
 0x3a4   : > { %v7007_v30 = vadd.f32 %v6991_v18, %v6218_v13  ;;  %v6245_v21 = vadd.f32 %v6244_v15, %v9611_v26  ;;  %v6993_v13 = vld [vmem:[%s8111_s21 + $0x68] sm:$0xff] }
 0x3a5   : > { %v6283_v43 = vpop.f32.mrf.mxu1  ;;  %v6313_v6 = vpop.f32.mrf.mxu2 }
 0x3a6   : > { %v7041_v49 = vmul.f32 %v7017_v4, %v7007_v30  ;;  %v6284_v42 = vadd.f32 %v6283_v43, %v6245_v21 }
 0x3a7   : > { %v6343_v59 = vpop.f32.mrf.mxu3 }
 0x3a8   : > { %7057 = vst [vmem:[%s9650_s23 + $0x58] sm:$0xff] %v7041_v49  ;;  %v6314_v27 = vadd.f32 %v6313_v6, %v6284_v42 }
 0x3aa   : > { %v6344_v35 = vadd.f32 %v6343_v59, %v6314_v27 }
 0x3ab   : > { %v6252_v52 = vpop.f32.mrf.mxu0 }
 0x3ac   : > { %v6253_v10 = vadd.f32 %v6252_v52, %v9627_v31 }
 0x3ad   : > { %v6287_v48 = vpop.f32.mrf.mxu1  ;;  %v6318_v60 = vpop.f32.mrf.mxu2 }
 0x3ae   : > { %v6288_v58 = vadd.f32 %v6287_v48, %v6253_v10 }
 0x3af   : > { %v6349_v25 = vpop.f32.mrf.mxu3 }
 0x3b0   : > { %v6319_v46 = vadd.f32 %v6318_v60, %v6288_v58 }
 0x3b2   : > { %v6350_v37 = vadd.f32 %v6349_v25, %v6319_v46 }
 0x3b3   : > { %v6376_v45 = vpop.f32.mrf.mxu0 }
 0x3b4   : > { %v6377_v12 = vadd.f32 %v6376_v45, %v6344_v35 }
 0x3b5   : > { %v6403_v51 = vpop.f32.mrf.mxu1  ;;  %v6434_v9 = vpop.f32.mrf.mxu2 }
 0x3b6   : > { %v6404_v20 = vadd.f32 %v6403_v51, %v6377_v12  ;;  %v6435_v3 = vadd.f32 %v6434_v9, %v9611_v26  ;;  %v6986_v9 = vld [vmem:[%s8111_s21 + $0x30] sm:$0xff] }
 0x3b7   : > { %v6473_v55 = vpop.f32.mrf.mxu3 }
 0x3b8   : > { %v7000_v2 = vadd.f32 %v6984_v1, %v6404_v20  ;;  %v6474_v5 = vadd.f32 %v6473_v55, %v6435_v3  ;;  %v7020_v55 = vperm.slane %v9638_v61, 6 }
 0x3ba   : > { %v7034_v57 = vmul.f32 %v7018_v39, %v7000_v2 }
 0x3bb   : > { %v6380_v11 = vpop.f32.mrf.mxu0 }
 0x3bc   : > { %7050 = vst [vmem:[%s9650_s23 + $0x20] sm:$0xff] %v7034_v57  ;;  %v6381_v41 = vadd.f32 %v6380_v11, %v6350_v37 }
 0x3bd   : > { %v6407_v19 = vpop.f32.mrf.mxu1  ;;  %v6442_v40 = vpop.f32.mrf.mxu2 }
 0x3be   : > { %v6408_v28 = vadd.f32 %v6407_v19, %v6381_v41  ;;  %v6443_v32 = vadd.f32 %v6442_v40, %v9627_v31  ;;  %v6994_v40 = vld [vmem:[%s8111_s21 + $0x70] sm:$0xff] }
 0x3bf   : > { %v6477_v23 = vpop.f32.mrf.mxu3 }
 0x3c0   : > { %v7008_v17 = vadd.f32 %v6992_v0, %v6408_v28  ;;  %v6478_v14 = vadd.f32 %v6477_v23, %v6443_v32 }
 0x3c2   : > { %v7042_v50 = vmul.f32 %v7018_v39, %v7008_v17 }
 0x3c3   : > { %v6503_v29 = vpop.f32.mrf.mxu0 }
 0x3c4   : > { %7058 = vst [vmem:[%s9650_s23 + $0x60] sm:$0xff] %v7042_v50  ;;  %v6504_v33 = vadd.f32 %v6503_v29, %v6474_v5 }
 0x3c5   : > { %v6533_v47 = vpop.f32.mrf.mxu1  ;;  %v6566_v36 = vpop.f32.mrf.mxu2 }
 0x3c6   : > { %v6534_v22 = vadd.f32 %v6533_v47, %v6504_v33 }
 0x3c7   : > { %v6593_v16 = vpop.f32.mrf.mxu3 }
 0x3c8   : > { %v6567_v34 = vadd.f32 %v6566_v36, %v6534_v22 }
 0x3ca   : > { %v6594_v4 = vadd.f32 %v6593_v16, %v6567_v34 }
 0x3cb   : > { %v6508_v8 = vpop.f32.mrf.mxu0 }
 0x3cc   : > { %v7001_v53 = vadd.f32 %v6985_v56, %v6594_v4  ;;  %v6509_v63 = vadd.f32 %v6508_v8, %v6478_v14 }
 0x3cd   : > { %v6539_v38 = vpop.f32.mrf.mxu1  ;;  %v6570_v24 = vpop.f32.mrf.mxu2 }
 0x3ce   : > { %v7035_v44 = vmul.f32 %v7019_v62, %v7001_v53  ;;  %v6540_v7 = vadd.f32 %v6539_v38, %v6509_v63 }
 0x3cf   : > { %v6597_v54 = vpop.f32.mrf.mxu3 }
 0x3d0   : > { %7051 = vst [vmem:[%s9650_s23 + $0x28] sm:$0xff] %v7035_v44  ;;  %v6571_v18 = vadd.f32 %v6570_v24, %v6540_v7 }
 0x3d2   : > { %v6598_v15 = vadd.f32 %v6597_v54, %v6571_v18 }
 0x3d3   : > { %v6624_v30 = vpop.f32.mrf.mxu0 }
 0x3d4   : > { %v7009_v43 = vadd.f32 %v6993_v13, %v6598_v15  ;;  %v6625_v59 = vadd.f32 %v6624_v30, %v9611_v26 }
 0x3d5   : > { %v6663_v6 = vpop.f32.mrf.mxu1  ;;  %v6693_v49 = vpop.f32.mrf.mxu2 }
 0x3d6   : > { %v7043_v21 = vmul.f32 %v7019_v62, %v7009_v43  ;;  %v6664_v52 = vadd.f32 %v6663_v6, %v6625_v59  ;;  %v7021_v62 = vperm.slane %v9638_v61, 7  ;;  %v6995_v61 = vld [vmem:[%s8111_s21 + $0x78] sm:$0xff] }
 0x3d7   : > { %v6723_v42 = vpop.f32.mrf.mxu3 }
 0x3d8   : > { %7059 = vst [vmem:[%s9650_s23 + $0x68] sm:$0xff] %v7043_v21  ;;  %v6694_v10 = vadd.f32 %v6693_v49, %v6664_v52 }
 0x3da   : > { %v6724_v58 = vadd.f32 %v6723_v42, %v6694_v10 }
 0x3db   : > { %v6632_v48 = vpop.f32.mrf.mxu0 }
 0x3dc   : > { %v6633_v25 = vadd.f32 %v6632_v48, %v9627_v31 }
 0x3dd   : > { %v6667_v60 = vpop.f32.mrf.mxu1  ;;  %v6698_v27 = vpop.f32.mrf.mxu2 }
 0x3de   : > { %v6668_v45 = vadd.f32 %v6667_v60, %v6633_v25 }
 0x3df   : > { %v6729_v35 = vpop.f32.mrf.mxu3 }
 0x3e0   : > { %v6699_v20 = vadd.f32 %v6698_v27, %v6668_v45 }
 0x3e2   : > { %v6730_v57 = vadd.f32 %v6729_v35, %v6699_v20 }
 0x3e3   : > { %v6756_v12 = vpop.f32.mrf.mxu0 }
 0x3e4   : > { %v6757_v51 = vadd.f32 %v6756_v12, %v6724_v58 }
 0x3e5   : > { %v6783_v1 = vpop.f32.mrf.mxu1  ;;  %v6814_v46 = vpop.f32.mrf.mxu2 }
 0x3e6   : > { %v6784_v39 = vadd.f32 %v6783_v1, %v6757_v51  ;;  %v6815_v28 = vadd.f32 %v6814_v46, %v9611_v26  ;;  %v6987_v26 = vld [vmem:[%s8111_s21 + $0x38] sm:$0xff] }
 0x3e7   : > { %v6853_v2 = vpop.f32.mrf.mxu3 }
 0x3e8   : > { %v7002_v37 = vadd.f32 %v6986_v9, %v6784_v39  ;;  %v6854_v50 = vadd.f32 %v6853_v2, %v6815_v28 }
 0x3ea   : > { %v7036_v11 = vmul.f32 %v7020_v55, %v7002_v37 }
 0x3eb   : > { %v6760_v41 = vpop.f32.mrf.mxu0 }
 0x3ec   : > { %7052 = vst [vmem:[%s9650_s23 + $0x30] sm:$0xff] %v7036_v11  ;;  %v6761_v19 = vadd.f32 %v6760_v41, %v6730_v57 }
 0x3ed   : > { %v6787_v0 = vpop.f32.mrf.mxu1  ;;  %v6822_v3 = vpop.f32.mrf.mxu2 }
 0x3ee   : > { %v6788_v23 = vadd.f32 %v6787_v0, %v6761_v19  ;;  %v6823_v22 = vadd.f32 %v6822_v3, %v9627_v31 }
 0x3ef   : > { %v6857_v17 = vpop.f32.mrf.mxu3 }
 0x3f0   : > { %v7010_v5 = vadd.f32 %v6994_v40, %v6788_v23  ;;  %v6858_v14 = vadd.f32 %v6857_v17, %v6823_v22 }
 0x3f2   : > { %v7044_v29 = vmul.f32 %v7020_v55, %v7010_v5 }
 0x3f3   : > { %v6883_v33 = vpop.f32.mrf.mxu0 }
 0x3f4   : > { %7060 = vst [vmem:[%s9650_s23 + $0x70] sm:$0xff] %v7044_v29  ;;  %v6884_v47 = vadd.f32 %v6883_v33, %v6854_v50 }
 0x3f5   : > { %v6913_v36 = vpop.f32.mrf.mxu1  ;;  %v6946_v32 = vpop.f32.mrf.mxu2 }
 0x3f6   : > { %v6914_v16 = vadd.f32 %v6913_v36, %v6884_v47 }
 0x3f7   : > { %v6973_v34 = vpop.f32.mrf.mxu3 }
 0x3f8   : > { %v6947_v56 = vadd.f32 %v6946_v32, %v6914_v16 }
 0x3fa   : > { %v6974_v4 = vadd.f32 %v6973_v34, %v6947_v56 }
 0x3fb   : > { %v6888_v8 = vpop.f32.mrf.mxu0 }
 0x3fc   : > { %v7003_v53 = vadd.f32 %v6987_v26, %v6974_v4  ;;  %v6889_v63 = vadd.f32 %v6888_v8, %v6858_v14 }
 0x3fd   : > { %v6919_v38 = vpop.f32.mrf.mxu1  ;;  %v6950_v24 = vpop.f32.mrf.mxu2 }
 0x3fe   : > { %v7037_v31 = vmul.f32 %v7021_v62, %v7003_v53  ;;  %v6920_v44 = vadd.f32 %v6919_v38, %v6889_v63 }
 0x3ff   : > { %v6977_v7 = vpop.f32.mrf.mxu3 }
 0x400   : > { %7053 = vst [vmem:[%s9650_s23 + $0x38] sm:$0xff] %v7037_v31  ;;  %v6951_v54 = vadd.f32 %v6950_v24, %v6920_v44 }
 0x402   : > { %v6978_v18 = vadd.f32 %v6977_v7, %v6951_v54 }
 0x404   : > { %v7011_v13 = vadd.f32 %v6995_v61, %v6978_v18 }
 0x406   : > { %v7045_v15 = vmul.f32 %v7021_v62, %v7011_v13 }
 0x408   : > { %7061 = vst [vmem:[%s9650_s23 + $0x78] sm:$0xff] %v7045_v15 }
 0x409   : > { %7657 = shalt.err (!%p7654_p8)
}
 0x40a   : > { %s7800_s27 = smov 1024   ;;  %s7801_s24 = smov 2048  }
 0x40b   : > { %s7802_s7 = smov 64  }
 0x40c   : > { %7311 = dma.vmem_to_hbm [thread:$0]  (%p8039_p9), %s7078_s5, 2048, %s7080_s16, %s7063_s10, %s7800_s27, %s7801_s24, %s7802_s7  }
 0x40d PF: > { %p7339_p5 = scmp.ge.s32.totalorder %s7788_s18, 2  ;;  %s7094_s23 = sand.u32 1, %s7760_s11  }
 0x40e   : > { %s7095_s6 = scalar_lea.sflag [#allocation5], %s7094_s23 }
 0x40f   : > { %p7331_p4 = pnand %p7339_p5, %p8050_p13 }
 0x411   : > { %p7332_p1 = pneg %p7331_p4 }
 0x413   : > { %7731 = dma.done.wait (%p7332_p1), %s7095_s6, 2048  }
 0x414   : > { %7733 = vsyncadd (%p7332_p1), %s7095_s6, 4294965248  ;;  %s28_s18 = sadd.s32 1, %s7788_s18   ;;  %s9895_s27 = sld [smem:[#allocation19_spill]] }
 0x415   : > { %p9745_p7 = scmp.ge.s32.totalorder %s28_s18, 6   ;;  %s9896_s30 = sld [smem:[#allocation20_spill]] }
 0x416   : > { %s9897_s9 = sld [smem:[#allocation21_spill]]  ;;  %s9905_s28 = smov %s7744_s29 }
 0x417   : > { %s9898_s10 = sld [smem:[#allocation31_spill]]  ;;  %s9906_s29 = smov %s8089_s1 }
 0x418   : > { %s9899_s26 = sld [smem:[#allocation22_spill]]  ;;  %s9907_s11 = smov %s7764_s12 }
 0x419   : > { %s9900_s13 = sld [smem:[#allocation32_spill]] }
 0x41a   : > { %s9901_s14 = sld [smem:[#allocation25_spill]]  ;;  %27 = sbr.rel (!%p9745_p7) target bundleno = 23 (0x17), region = 134 }
 0x41b   : > { %s9902_s15 = sld [smem:[#allocation26_spill]] }
 0x41c   : > { %s9903_s16 = sld [smem:[#allocation28_spill]] }
 0x41d   : > { %s9904_s17 = sld [smem:[#allocation29_spill]] }
 0x41e   : > { %s9908_s12 = smov %s9899_s26 }
 0x41f   :  { %7101 = vsyncpa [#allocation4], 1 }
 0x420   :  { %7103 = vsyncpa [#allocation4 + $0x1], 1 }
 0x421   :  { %7104 = vsyncpa [#allocation7], 1 }
 0x422   :  { %7106 = vsyncpa [#allocation7 + $0x1], 1 }
 0x423   :  { %7107 = vsyncpa [#allocation10], 1 }
 0x424   :  { %7108 = vsyncpa [#allocation5], 1 }
 0x425   :  { %7110 = vsyncpa [#allocation5 + $0x1], 1 }

</bundles_post_ra>
